<compile_context>
chip_gen: v6e
topology: v6e:2x2x1
jax: 0.10.0
libtpu: 0.0.40
codegen_flags: <defaults>
</compile_context>

<pallas_src>
import numpy as np
import jax
import jax.numpy as jnp
from jax.experimental import pallas as pl
from jax.experimental.pallas import tpu as pltpu

# ----------------------------- module configuration ------------------------------------
N_QUBITS = 4                     # small, even, so sub_dim x sub_dim density matrices exist
N_LAYERS = 1
DIM = 1 << N_QUBITS              # 16
SUB = 1 << (N_QUBITS // 2)       # 4  (= sub_dim = dimA = dimB)
VEC = SUB * SUB                  # 16 (vectorised 4x4 density matrix)
GROWS = VEC * VEC                # 256 rows of the flattened superoperator
BB = 512                         # batch elements per grid step (lane tile, multiple of 128)


# ----------------------------- circuit unitary (host glue) -----------------------------
def _circuit_unitary(w, n, n_layers):
    """Dense unitary of: XYZLayer(w) ; n_layers x (CNOT chain + ring CNOT) ; XYZLayer(w)."""
    eye2 = np.eye(2, dtype=np.complex128)

    def kron_place(ops):
        # qubit 0 = most significant bit (leftmost Kronecker factor), consistent with
        # kron(inputA, inputB) putting A on the first n/2 qubits.
        m = np.array([[1.0 + 0.0j]])
        for q in range(n):
            m = np.kron(m, ops.get(q, eye2))
        return m

    def rx(t):
        c, s = np.cos(t / 2), np.sin(t / 2)
        return np.array([[c, -1j * s], [-1j * s, c]], dtype=np.complex128)

    def ry(t):
        c, s = np.cos(t / 2), np.sin(t / 2)
        return np.array([[c, -s], [s, c]], dtype=np.complex128)

    def rz(t):
        return np.array([[np.exp(-1j * t / 2), 0], [0, np.exp(1j * t / 2)]],
                        dtype=np.complex128)

    def xyz_layer():
        U = np.eye(1 << n, dtype=np.complex128)
        for q in range(n):
            g = rz(w[3 * q + 2]) @ ry(w[3 * q + 1]) @ rx(w[3 * q + 0])
            U = kron_place({q: g}) @ U
        return U

    def cnot(c, t):
        P0 = np.array([[1, 0], [0, 0]], dtype=np.complex128)
        P1 = np.array([[0, 0], [0, 1]], dtype=np.complex128)
        X = np.array([[0, 1], [1, 0]], dtype=np.complex128)
        return kron_place({c: P0}) + kron_place({c: P1, t: X})

    U = xyz_layer()
    for _ in range(n_layers):
        for q in range(n - 1):
            U = cnot(q, q + 1) @ U
        U = cnot(n - 1, 0) @ U
    U = xyz_layer() @ U
    return U


def _superoperator_planes(U):
    """Fold evolution + partial trace into a fixed bilinear map (host, parameter-only).

    K[(a,c),(x,y),(p,q)] = sum_b U[(a,b),(x,p)] conj(U[(c,b),(y,q)])
    out[a,c] = sum K[(a,c),(x,y),(p,q)] A[x,y] B[p,q]
    """
    U4 = U.reshape(SUB, SUB, SUB, SUB)                 # [a, b, x, p] row=(a,b), col=(x,p)
    K3 = np.einsum('abxp,cbyq->acxypq', U4, U4.conj()).reshape(VEC, VEC, VEC)
    G = K3.reshape(GROWS, VEC)                         # rows = o*16 + pA, cols = pB
    Gr = np.asarray(G.real, np.float32)
    Gi = np.asarray(G.imag, np.float32)
    # Segment-sum matrix: Seg[o, o'*16 + pA] = delta(o, o')
    Seg = np.kron(np.eye(VEC, dtype=np.float32), np.ones((1, VEC), np.float32))
    return (jnp.asarray(Gr), jnp.asarray(Gi), jnp.asarray(Gr + Gi), jnp.asarray(Seg))


# ----------------------------- Pallas kernel --------------------------------------------
def _qumutual_kernel(gr_ref, gi_ref, gs_ref, seg_ref,      # (256,16)x3, (16,256) constants
                     ar_ref, ai_ref, br_ref, bi_ref,       # (16, BB) batch-along-lanes planes
                     or_ref, oi_ref):                      # (16, BB) outputs
    f32 = jnp.float32
    Gr = gr_ref[...]
    Gi = gi_ref[...]
    Gs = gs_ref[...]          # Gr + Gi, precomputed on host (Karatsuba)
    Seg = seg_ref[...]
    Ar = ar_ref[...]
    Ai = ai_ref[...]
    Br = br_ref[...]
    Bi = bi_ref[...]

    # H = G @ vecB   (complex GEMM, 3 real MXU passes via Karatsuba)
    p1 = jnp.dot(Gr, Br, preferred_element_type=f32)           # (256, BB)
    p2 = jnp.dot(Gi, Bi, preferred_element_type=f32)
    p3 = jnp.dot(Gs, Br + Bi, preferred_element_type=f32)
    hr = p1 - p2
    hi = p3 - p1 - p2

    # Z = H * vecA, with vecA broadcast over the 16 output slots (row j uses vecA[j % 16]).
    ar_rep = jnp.concatenate([Ar] * VEC, axis=0)               # (256, BB)
    ai_rep = jnp.concatenate([Ai] * VEC, axis=0)
    zr = hr * ar_rep - hi * ai_rep
    zi = hr * ai_rep + hi * ar_rep

    # out = Seg @ Z : segment-sum the 16 pA slots of each output element (K = 256).
    or_ref[...] = jnp.dot(Seg, zr, preferred_element_type=f32)
    oi_ref[...] = jnp.dot(Seg, zi, preferred_element_type=f32)


# ----------------------------- Qu_mutual forward (wrapper) ------------------------------
def qu_mutual_forward(inputA, inputB, dimA, dimB, weight, w_mul,
                      n_qubits=N_QUBITS, n_layers=N_LAYERS, block_batch=BB):
    assert dimA == dimB, 'dimA must be equal to dimB'
    if inputA.ndim == 2 and inputB.ndim == 2:
        inputA = inputA[None]
        inputB = inputB[None]
    assert inputA.ndim == 3 and inputB.ndim == 3
    assert inputA.shape[0] == inputB.shape[0]
    assert inputA.shape[1] == SUB and inputA.shape[2] == SUB
    assert inputB.shape[1] == SUB and inputB.shape[2] == SUB
    batch = inputA.shape[0]

    # Parameter-only host glue: circuit unitary -> bilinear superoperator planes.
    w = np.asarray(weight, dtype=np.float64) * float(w_mul)
    U = _circuit_unitary(w, n_qubits, n_layers)
    Gr, Gi, Gs, Seg = _superoperator_planes(U)

    # Fuse the two paths in one call: first half keeps A / traces B, second half keeps B.
    total = 2 * batch
    total_pad = ((total + block_batch - 1) // block_batch) * block_batch
    keep_v = jnp.concatenate([inputA, inputB], axis=0).reshape(total, VEC)
    trace_v = jnp.concatenate([inputB, inputA], axis=0).reshape(total, VEC)

    def planes_t(v):
        vr = jnp.real(v).astype(jnp.float32)
        vi = jnp.imag(v).astype(jnp.float32)
        pad = total_pad - total
        if pad:
            vr = jnp.pad(vr, ((0, pad), (0, 0)))
            vi = jnp.pad(vi, ((0, pad), (0, 0)))
        return vr.T, vi.T                              # (VEC, total_pad): batch on lanes

    Ar, Ai = planes_t(keep_v)
    Br, Bi = planes_t(trace_v)

    grid = (total_pad // block_batch,)
    const_g = pl.BlockSpec((GROWS, VEC), lambda n: (0, 0))
    const_s = pl.BlockSpec((VEC, GROWS), lambda n: (0, 0))
    batched = pl.BlockSpec((VEC, block_batch), lambda n: (0, n))

    out_r, out_i = pl.pallas_call(
        _qumutual_kernel,
        out_shape=(jax.ShapeDtypeStruct((VEC, total_pad), jnp.float32),
                   jax.ShapeDtypeStruct((VEC, total_pad), jnp.float32)),
        grid_spec=pltpu.PrefetchScalarGridSpec(
            num_scalar_prefetch=0,
            grid=grid,
            in_specs=[const_g, const_g, const_g, const_s,
                      batched, batched, batched, batched],
            out_specs=[batched, batched],
        ),
        compiler_params=pltpu.CompilerParams(dimension_semantics=("parallel",)),
    )(Gr, Gi, Gs, Seg, Ar, Ai, Br, Bi)

    # Single complex construct at the module boundary; row index o = 4a + c.
    out = (out_r[:, :total] + 1j * out_i[:, :total]).astype(jnp.complex64)
    out = out.T.reshape(total, SUB, SUB)
    return out[:batch], out[batch:], U   # U returned only for the numpy reference check


# ----------------------------- numpy reference -------------------------------------------
def _ref_forward(A, B, U):
    A = np.asarray(A, np.complex128)
    B = np.asarray(B, np.complex128)
    batch = A.shape[0]
    rho = np.einsum('nij,nkl->nikjl', A, B).reshape(batch, DIM, DIM)
    rho2 = U @ rho @ U.conj().T
    r4 = rho2.reshape(batch, SUB, SUB, SUB, SUB)
    return np.einsum('nabcb->nac', r4)


# ----------------------------- main -------------------------------------------------------
if __name__ == "__main__":
    key = jax.random.PRNGKey(0)
    kw, kar, kai, kbr, kbi = jax.random.split(key, 5)

    # Parameter init exactly like the module's __init__ (use_wscale=True, lrmul=1, gain=sqrt(2)).
    gain, lrmul = 2.0 ** 0.5, 1.0
    he_std = gain * 5.0 ** (-0.5)
    init_std = 1.0 / lrmul
    w_mul = he_std * lrmul
    weight = jax.random.uniform(kw, (6 * N_QUBITS,), minval=0.0,
                                maxval=2.0 * np.pi) * init_std

    # Deterministic small density-matrix inputs: rho = X X^H / Tr(X X^H).
    batch = 2

    def rand_density(kr, ki):
        xr = jax.random.normal(kr, (batch, SUB, SUB), dtype=jnp.float32)
        xi = jax.random.normal(ki, (batch, SUB, SUB), dtype=jnp.float32)
        x = (xr + 1j * xi).astype(jnp.complex64)
        rho = jnp.einsum('nij,nkj->nik', x, jnp.conj(x))
        tr = jnp.trace(rho, axis1=1, axis2=2)[:, None, None]
        return rho / tr

    inputA = rand_density(kar, kai)
    inputB = rand_density(kbr, kbi)

    mutualBatA, mutualAatB, U = qu_mutual_forward(inputA, inputB, SUB, SUB, weight, w_mul)
    jax.block_until_ready((mutualBatA, mutualAatB))

    # Sanity checks against a pure-numpy reference (loose tolerance: MXU default precision).
    refBatA = _ref_forward(np.asarray(inputA), np.asarray(inputB), U)
    refAatB = _ref_forward(np.asarray(inputB), np.asarray(inputA), U)
    assert mutualBatA.shape == (batch, SUB, SUB) and mutualAatB.shape == (batch, SUB, SUB)
    assert np.allclose(np.asarray(mutualBatA), refBatA, atol=2e-2, rtol=2e-2)
    assert np.allclose(np.asarray(mutualAatB), refAatB, atol=2e-2, rtol=2e-2)
    # Partial trace of a trace-1 state stays trace-1.
    assert np.allclose(np.trace(np.asarray(mutualBatA), axis1=1, axis2=2), 1.0, atol=1e-2)

    print("KERNEL_OK")
</pallas_src>

<mosaic_0001>
module attributes {stable_mosaic.version = 11 : i64} {
  func.func @_qumutual_kernel(%arg0: i32, %arg1: memref<256x16xf32, #tpu.memory_space<vmem>>, %arg2: memref<256x16xf32, #tpu.memory_space<vmem>>, %arg3: memref<256x16xf32, #tpu.memory_space<vmem>>, %arg4: memref<16x256xf32, #tpu.memory_space<vmem>>, %arg5: memref<16x512xf32, #tpu.memory_space<vmem>>, %arg6: memref<16x512xf32, #tpu.memory_space<vmem>>, %arg7: memref<16x512xf32, #tpu.memory_space<vmem>>, %arg8: memref<16x512xf32, #tpu.memory_space<vmem>>, %arg9: memref<16x512xf32, #tpu.memory_space<vmem>>, %arg10: memref<16x512xf32, #tpu.memory_space<vmem>>) attributes {dimension_semantics = [#tpu.dimension_semantics<parallel>], iteration_bounds = array<i64: 1>, scalar_prefetch = 0 : i64, scratch_operands = 0 : i64, tpu.core_type = #tpu.core_type<tc>, window_params = [{pipeline_mode = #tpu.pipeline_mode<synchronous>, transform_indices = @transform_0, window_bounds = array<i64: 256, 16>}, {pipeline_mode = #tpu.pipeline_mode<synchronous>, transform_indices = @transform_1, window_bounds = array<i64: 256, 16>}, {pipeline_mode = #tpu.pipeline_mode<synchronous>, transform_indices = @transform_2, window_bounds = array<i64: 256, 16>}, {pipeline_mode = #tpu.pipeline_mode<synchronous>, transform_indices = @transform_3, window_bounds = array<i64: 16, 256>}, {transform_indices = @transform_4, window_bounds = array<i64: 16, 512>}, {transform_indices = @transform_5, window_bounds = array<i64: 16, 512>}, {transform_indices = @transform_6, window_bounds = array<i64: 16, 512>}, {transform_indices = @transform_7, window_bounds = array<i64: 16, 512>}, {transform_indices = @transform_8, window_bounds = array<i64: 16, 512>}, {transform_indices = @transform_9, window_bounds = array<i64: 16, 512>}]} {
    %c0 = arith.constant 0 : index
    %c0_0 = arith.constant 0 : index
    %0 = vector.load %arg1[%c0, %c0_0] : memref<256x16xf32, #tpu.memory_space<vmem>>, vector<256x16xf32>
    %c0_1 = arith.constant 0 : index
    %c0_2 = arith.constant 0 : index
    %1 = vector.load %arg2[%c0_1, %c0_2] : memref<256x16xf32, #tpu.memory_space<vmem>>, vector<256x16xf32>
    %c0_3 = arith.constant 0 : index
    %c0_4 = arith.constant 0 : index
    %2 = vector.load %arg3[%c0_3, %c0_4] : memref<256x16xf32, #tpu.memory_space<vmem>>, vector<256x16xf32>
    %c0_5 = arith.constant 0 : index
    %c0_6 = arith.constant 0 : index
    %3 = vector.load %arg4[%c0_5, %c0_6] : memref<16x256xf32, #tpu.memory_space<vmem>>, vector<16x256xf32>
    %c0_7 = arith.constant 0 : index
    %c0_8 = arith.constant 0 : index
    %4 = vector.load %arg5[%c0_7, %c0_8] : memref<16x512xf32, #tpu.memory_space<vmem>>, vector<16x512xf32>
    %c0_9 = arith.constant 0 : index
    %c0_10 = arith.constant 0 : index
    %5 = vector.load %arg6[%c0_9, %c0_10] : memref<16x512xf32, #tpu.memory_space<vmem>>, vector<16x512xf32>
    %c0_11 = arith.constant 0 : index
    %c0_12 = arith.constant 0 : index
    %6 = vector.load %arg7[%c0_11, %c0_12] : memref<16x512xf32, #tpu.memory_space<vmem>>, vector<16x512xf32>
    %c0_13 = arith.constant 0 : index
    %c0_14 = arith.constant 0 : index
    %7 = vector.load %arg8[%c0_13, %c0_14] : memref<16x512xf32, #tpu.memory_space<vmem>>, vector<16x512xf32>
    %cst = arith.constant dense<0.000000e+00> : vector<256x512xf32>
    %8 = tpu.matmul %0, %6, %cst {dimension_numbers = #tpu.dot_dimension_numbers<[1], [0], [0], [1], [0, 0, 1, 1], [], []>} : vector<256x16xf32>, vector<16x512xf32>, vector<256x512xf32> -> vector<256x512xf32>
    %cst_15 = arith.constant dense<0.000000e+00> : vector<256x512xf32>
    %9 = tpu.matmul %1, %7, %cst_15 {dimension_numbers = #tpu.dot_dimension_numbers<[1], [0], [0], [1], [0, 0, 1, 1], [], []>} : vector<256x16xf32>, vector<16x512xf32>, vector<256x512xf32> -> vector<256x512xf32>
    %10 = arith.addf %6, %7 : vector<16x512xf32>
    %cst_16 = arith.constant dense<0.000000e+00> : vector<256x512xf32>
    %11 = tpu.matmul %2, %10, %cst_16 {dimension_numbers = #tpu.dot_dimension_numbers<[1], [0], [0], [1], [0, 0, 1, 1], [], []>} : vector<256x16xf32>, vector<16x512xf32>, vector<256x512xf32> -> vector<256x512xf32>
    %12 = arith.subf %8, %9 : vector<256x512xf32>
    %13 = arith.subf %11, %8 : vector<256x512xf32>
    %14 = arith.subf %13, %9 : vector<256x512xf32>
    %15 = tpu.concatenate %4, %4, %4, %4, %4, %4, %4, %4, %4, %4, %4, %4, %4, %4, %4, %4 in 0 : vector<16x512xf32>, vector<16x512xf32>, vector<16x512xf32>, vector<16x512xf32>, vector<16x512xf32>, vector<16x512xf32>, vector<16x512xf32>, vector<16x512xf32>, vector<16x512xf32>, vector<16x512xf32>, vector<16x512xf32>, vector<16x512xf32>, vector<16x512xf32>, vector<16x512xf32>, vector<16x512xf32>, vector<16x512xf32> -> vector<256x512xf32>
    %16 = tpu.concatenate %5, %5, %5, %5, %5, %5, %5, %5, %5, %5, %5, %5, %5, %5, %5, %5 in 0 : vector<16x512xf32>, vector<16x512xf32>, vector<16x512xf32>, vector<16x512xf32>, vector<16x512xf32>, vector<16x512xf32>, vector<16x512xf32>, vector<16x512xf32>, vector<16x512xf32>, vector<16x512xf32>, vector<16x512xf32>, vector<16x512xf32>, vector<16x512xf32>, vector<16x512xf32>, vector<16x512xf32>, vector<16x512xf32> -> vector<256x512xf32>
    %17 = arith.mulf %12, %15 : vector<256x512xf32>
    %18 = arith.mulf %14, %16 : vector<256x512xf32>
    %19 = arith.subf %17, %18 : vector<256x512xf32>
    %20 = arith.mulf %12, %16 : vector<256x512xf32>
    %21 = arith.mulf %14, %15 : vector<256x512xf32>
    %22 = arith.addf %20, %21 : vector<256x512xf32>
    %cst_17 = arith.constant dense<0.000000e+00> : vector<16x512xf32>
    %23 = tpu.matmul %3, %19, %cst_17 {dimension_numbers = #tpu.dot_dimension_numbers<[1], [0], [0], [1], [0, 0, 1, 1], [], []>} : vector<16x256xf32>, vector<256x512xf32>, vector<16x512xf32> -> vector<16x512xf32>
    %c0_18 = arith.constant 0 : index
    %c0_19 = arith.constant 0 : index
    %24 = vector.load %arg9[%c0_18, %c0_19] : memref<16x512xf32, #tpu.memory_space<vmem>>, vector<16x512xf32>
    tpu.vector_store %arg9[%c0_18, %c0_19], %23 {strides = array<i32>} : memref<16x512xf32, #tpu.memory_space<vmem>>, vector<16x512xf32>,
    %cst_20 = arith.constant dense<0.000000e+00> : vector<16x512xf32>
    %25 = tpu.matmul %3, %22, %cst_20 {dimension_numbers = #tpu.dot_dimension_numbers<[1], [0], [0], [1], [0, 0, 1, 1], [], []>} : vector<16x256xf32>, vector<256x512xf32>, vector<16x512xf32> -> vector<16x512xf32>
    %c0_21 = arith.constant 0 : index
    %c0_22 = arith.constant 0 : index
    %26 = vector.load %arg10[%c0_21, %c0_22] : memref<16x512xf32, #tpu.memory_space<vmem>>, vector<16x512xf32>
    tpu.vector_store %arg10[%c0_21, %c0_22], %25 {strides = array<i32>} : memref<16x512xf32, #tpu.memory_space<vmem>>, vector<16x512xf32>,
    return
  }
  func.func @transform_0(%arg0: i32) -> (i32, i32) {
    %c0_i32 = arith.constant 0 : i32
    %c0_i32_0 = arith.constant 0 : i32
    %c0_i32_1 = arith.constant 0 : i32
    return %c0_i32, %c0_i32_0 : i32, i32
  }
  func.func @transform_1(%arg0: i32) -> (i32, i32) {
    %c0_i32 = arith.constant 0 : i32
    %c0_i32_0 = arith.constant 0 : i32
    %c0_i32_1 = arith.constant 0 : i32
    return %c0_i32, %c0_i32_0 : i32, i32
  }
  func.func @transform_2(%arg0: i32) -> (i32, i32) {
    %c0_i32 = arith.constant 0 : i32
    %c0_i32_0 = arith.constant 0 : i32
    %c0_i32_1 = arith.constant 0 : i32
    return %c0_i32, %c0_i32_0 : i32, i32
  }
  func.func @transform_3(%arg0: i32) -> (i32, i32) {
    %c0_i32 = arith.constant 0 : i32
    %c0_i32_0 = arith.constant 0 : i32
    %c0_i32_1 = arith.constant 0 : i32
    return %c0_i32, %c0_i32_0 : i32, i32
  }
  func.func @transform_4(%arg0: i32) -> (i32, i32) {
    %c0_i32 = arith.constant 0 : i32
    %c0_i32_0 = arith.constant 0 : i32
    return %c0_i32, %arg0 : i32, i32
  }
  func.func @transform_5(%arg0: i32) -> (i32, i32) {
    %c0_i32 = arith.constant 0 : i32
    %c0_i32_0 = arith.constant 0 : i32
    return %c0_i32, %arg0 : i32, i32
  }
  func.func @transform_6(%arg0: i32) -> (i32, i32) {
    %c0_i32 = arith.constant 0 : i32
    %c0_i32_0 = arith.constant 0 : i32
    return %c0_i32, %arg0 : i32, i32
  }
  func.func @transform_7(%arg0: i32) -> (i32, i32) {
    %c0_i32 = arith.constant 0 : i32
    %c0_i32_0 = arith.constant 0 : i32
    return %c0_i32, %arg0 : i32, i32
  }
  func.func @transform_8(%arg0: i32) -> (i32, i32) {
    %c0_i32 = arith.constant 0 : i32
    %c0_i32_0 = arith.constant 0 : i32
    return %c0_i32, %arg0 : i32, i32
  }
  func.func @transform_9(%arg0: i32) -> (i32, i32) {
    %c0_i32 = arith.constant 0 : i32
    %c0_i32_0 = arith.constant 0 : i32
    return %c0_i32, %arg0 : i32, i32
  }
}

</mosaic_0001>

<bundles_post_ra>
// kernel: tpu_custom_call.1
= control target key start
LH: loop header
LB: loop body
LE: loop exit
PB: predicated region body
PF: predicated region fallthrough
CT: control target
= control target key end

     0   :  { %15 = vsyncpa [#allocation3], 0  ;;  %v8660_v8 = vmov 0.0   ;;  %vm165_vm0 = vcmask 130048   ;;  %s8548_s0 = inlined_call_operand.vmem [shape: f32[256,16], index: 0, kind: input, shape index: {}]   ;;  %s8549_s1 = inlined_call_operand.vmem [shape: f32[256,16], index: 1, kind: input, shape index: {}]   ;;  %s8550_s2 = inlined_call_operand.vmem [shape: f32[256,16], index: 2, kind: input, shape index: {}]   ;;  %s8551_s3 = inlined_call_operand.vmem [shape: f32[16,256], index: 3, kind: input, shape index: {}]   ;;  %s8552_s4 = inlined_call_operand.vmem [shape: f32[16,512], index: 4, kind: input, shape index: {}]   ;;  %s8553_s5 = inlined_call_operand.vmem [shape: f32[16,512], index: 5, kind: input, shape index: {}]   ;;  %s8554_s6 = inlined_call_operand.vmem [shape: f32[16,512], index: 6, kind: input, shape index: {}]   ;;  %s8555_s7 = inlined_call_operand.vmem [shape: f32[16,512], index: 7, kind: input, shape index: {}]   ;;  %s8556_s8 = inlined_call_operand.hbm [shape: f32[16,512], index: 8, kind: output, shape index: {0}]   ;;  %s8557_s9 = inlined_call_operand.hbm [shape: f32[16,512], index: 9, kind: output, shape index: {1}]  }
   0x1   :  { %v154_v0 = vld [vmem:[%s8554_s6 + $0x28] sm:$0xff]  ;;  %v156_v1 = vld [vmem:[%s8554_s6 + $0x38] sm:$0xff]  ;;  %v153_v2 = vld [vmem:[%s8554_s6 + $0x20] sm:$0xff]  ;;  %326 = vmatprep.mubr.f32.mxu0 %v8660_v8  ;;  %583 = vmatprep.mubr.f32.mxu1 %v8660_v8 }
   0x2   :  { %290 = vmatprep.subr.mxu0 %v154_v0  ;;  %547 = vmatprep.subr.mxu1 %v156_v1  ;;  %v161_v3 = vld [vmem:[%s8555_s7 + $0x20] sm:$0xff]  ;;  %v155_v5 = vld [vmem:[%s8554_s6 + $0x30] sm:$0xff]  ;;  %v150_v7 = vld [vmem:[%s8554_s6 + $0x8] sm:$0xff] }
   0x3   :  { %291 = vmatpush1.msra.mxu0 %v153_v2  ;;  %v3853_v4 = vadd.f32 %v161_v3, %v153_v2  ;;  %v163_v6 = vld [vmem:[%s8555_s7 + $0x30] sm:$0xff]  ;;  %548 = vmatpush1.msra.mxu1 %v155_v5  ;;  %v152_v10 = vld [vmem:[%s8554_s6 + $0x18] sm:$0xff]  ;;  %v149_v11 = vld [vmem:[%s8554_s6] sm:$0xff] }
   0x4   :  { %v3865_v9 = vadd.f32 %v163_v6, %v155_v5  ;;  %292 = vmatprep.subr.mxu0 %v150_v7  ;;  %v157_v12 = vld [vmem:[%s8555_s7] sm:$0xff]  ;;  %549 = vmatprep.subr.mxu1 %v152_v10  ;;  %v151_v14 = vld [vmem:[%s8554_s6 + $0x10] sm:$0xff]  ;;  %v162_v17 = vld [vmem:[%s8555_s7 + $0x28] sm:$0xff] }
   0x5   :  { %293 = vmatpush1.msra.mxu0 %v149_v11  ;;  %v3876_v13 = vadd.f32 %v157_v12, %v149_v11  ;;  %v159_v15 = vld [vmem:[%s8555_s7 + $0x10] sm:$0xff]  ;;  %v33_v16 = vld [vmem:[%s8548_s0] sm:$0xff]  ;;  %v164_v18 = vld [vmem:[%s8555_s7 + $0x38] sm:$0xff]  ;;  %550 = vmatpush1.msra.mxu1 %v151_v14  ;;  %v1391_v23 = vadd.f32 %v162_v17, %v154_v0 }
   0x6   :  { %v3893_v19 = vadd.f32 %v159_v15, %v151_v14  ;;  %3512 = vmatmul.mubr.msk.f32.vlgmr.msra.gmra.mxu0 %vm165_vm0, %v33_v16  ;;  %3544 = vmatmul.mubr.msk.f32.vlgmr.msra.gmra.mxu1 %vm165_vm0, %v33_v16  ;;  %v34_v20 = vld [vmem:[%s8548_s0 + $0x8] sm:$0xff]  ;;  %v35_v21 = vld [vmem:[%s8548_s0 + $0x10] sm:$0xff]  ;;  %v160_v25 = vld [vmem:[%s8555_s7 + $0x18] sm:$0xff]  ;;  %v1393_v28 = vadd.f32 %v164_v18, %v156_v1 }
   0x7   :  { %332 = vmatprep.mubr.f32.mxu0 %v8660_v8  ;;  %589 = vmatprep.mubr.f32.mxu1 %v8660_v8  ;;  %v158_v22 = vld [vmem:[%s8555_s7 + $0x8] sm:$0xff]  ;;  %v3920_v26 = vadd.f32 %v160_v25, %v152_v10  ;;  %v36_v27 = vld [vmem:[%s8548_s0 + $0x18] sm:$0xff] }
   0x8   :  { %900 = vmatprep.subr.mxu0 %v162_v17  ;;  %1157 = vmatprep.subr.mxu1 %v164_v18  ;;  %v3913_v24 = vadd.f32 %v158_v22, %v150_v7 }
   0x9   :  { %901 = vmatpush1.msra.mxu0 %v161_v3  ;;  %1158 = vmatpush1.msra.mxu1 %v163_v6 }
   0xa   :  { %3513 = vmatmul.mubr.msk.f32.gmra.mxu0 %vm165_vm0, %v34_v20  ;;  %3545 = vmatmul.mubr.msk.f32.gmra.mxu1 %vm165_vm0, %v34_v20 }
   0xb   :  { %338 = vmatprep.mubr.f32.mxu0 %v8660_v8  ;;  %595 = vmatprep.mubr.f32.mxu1 %v8660_v8 }
   0xc   :  { %902 = vmatprep.subr.mxu0 %v158_v22  ;;  %1159 = vmatprep.subr.mxu1 %v160_v25 }
   0xd   :  { %903 = vmatpush1.msra.mxu0 %v157_v12  ;;  %1160 = vmatpush1.msra.mxu1 %v159_v15 }
   0xe   :  { %3514 = vmatmul.mubr.msk.f32.gmra.mxu0 %vm165_vm0, %v35_v21  ;;  %3546 = vmatmul.mubr.msk.f32.gmra.mxu1 %vm165_vm0, %v35_v21 }
   0xf   :  { %344 = vmatprep.mubr.f32.mxu0 %v8660_v8  ;;  %601 = vmatprep.mubr.f32.mxu1 %v8660_v8 }
  0x10   :  { %1518 = vmatprep.subr.mxu0 %v1391_v23 }
  0x11   :  { %16 = vsyncpa [#allocation5], 0  ;;  %v37_v29 = vld [vmem:[%s8548_s0 + $0x20] sm:$0xff]  ;;  %1775 = vmatprep.subr.mxu1 %v1393_v28  ;;  %v38_v30 = vld [vmem:[%s8548_s0 + $0x28] sm:$0xff]  ;;  %s3787_s19 = smov [#allocation2]  }
  0x12   :  { %3515 = vmatmul.mubr.msk.f32.gmra.mxu0 %vm165_vm0, %v36_v27  ;;  %3547 = vmatmul.mubr.msk.f32.gmra.mxu1 %vm165_vm0, %v36_v27  ;;  %v39_v31 = vld [vmem:[%s8548_s0 + $0x30] sm:$0xff]  ;;  %v40_v32 = vld [vmem:[%s8548_s0 + $0x38] sm:$0xff]  ;;  %v41_v33 = vld [vmem:[%s8548_s0 + $0x40] sm:$0xff] }
  0x13   :  { %350 = vmatprep.mubr.f32.mxu0 %v8660_v8  ;;  %607 = vmatprep.mubr.f32.mxu1 %v8660_v8  ;;  %v42_v34 = vld [vmem:[%s8548_s0 + $0x48] sm:$0xff]  ;;  %v43_v35 = vld [vmem:[%s8548_s0 + $0x50] sm:$0xff]  ;;  %v44_v36 = vld [vmem:[%s8548_s0 + $0x58] sm:$0xff] }
  0x14   :  { %v45_v37 = vld [vmem:[%s8548_s0 + $0x60] sm:$0xff]  ;;  %v46_v38 = vld [vmem:[%s8548_s0 + $0x68] sm:$0xff]  ;;  %v47_v39 = vld [vmem:[%s8548_s0 + $0x70] sm:$0xff] }
  0x15   :  { %v48_v40 = vld [vmem:[%s8548_s0 + $0x78] sm:$0xff]  ;;  %v49_v41 = vld [vmem:[%s8548_s0 + $0x80] sm:$0xff]  ;;  %v50_v42 = vld [vmem:[%s8548_s0 + $0x88] sm:$0xff] }
  0x16   :  { %3516 = vmatmul.mubr.msk.f32.gmra.mxu0 %vm165_vm0, %v37_v29  ;;  %3548 = vmatmul.mubr.msk.f32.gmra.mxu1 %vm165_vm0, %v37_v29  ;;  %v51_v43 = vld [vmem:[%s8548_s0 + $0x90] sm:$0xff]  ;;  %v52_v44 = vld [vmem:[%s8548_s0 + $0x98] sm:$0xff]  ;;  %v53_v45 = vld [vmem:[%s8548_s0 + $0xa0] sm:$0xff] }
  0x17   :  { %356 = vmatprep.mubr.f32.mxu0 %v8660_v8  ;;  %613 = vmatprep.mubr.f32.mxu1 %v8660_v8  ;;  %v54_v46 = vld [vmem:[%s8548_s0 + $0xa8] sm:$0xff]  ;;  %v55_v47 = vld [vmem:[%s8548_s0 + $0xb0] sm:$0xff]  ;;  %v56_v48 = vld [vmem:[%s8548_s0 + $0xb8] sm:$0xff] }
  0x18   :  { %v57_v49 = vld [vmem:[%s8548_s0 + $0xc0] sm:$0xff]  ;;  %v58_v50 = vld [vmem:[%s8548_s0 + $0xc8] sm:$0xff]  ;;  %v59_v51 = vld [vmem:[%s8548_s0 + $0xd0] sm:$0xff] }
  0x19   :  { %v60_v52 = vld [vmem:[%s8548_s0 + $0xd8] sm:$0xff]  ;;  %v61_v53 = vld [vmem:[%s8548_s0 + $0xe0] sm:$0xff]  ;;  %v62_v54 = vld [vmem:[%s8548_s0 + $0xe8] sm:$0xff] }
  0x1a   :  { %3517 = vmatmul.mubr.msk.f32.gmra.mxu0 %vm165_vm0, %v38_v30  ;;  %3549 = vmatmul.mubr.msk.f32.gmra.mxu1 %vm165_vm0, %v38_v30  ;;  %v63_v55 = vld [vmem:[%s8548_s0 + $0xf0] sm:$0xff]  ;;  %v64_v56 = vld [vmem:[%s8548_s0 + $0xf8] sm:$0xff]  ;;  %v65_v57 = vld [vmem:[%s8549_s1] sm:$0xff] }
  0x1b   :  { %362 = vmatprep.mubr.f32.mxu0 %v8660_v8  ;;  %619 = vmatprep.mubr.f32.mxu1 %v8660_v8  ;;  %v66_v58 = vld [vmem:[%s8549_s1 + $0x8] sm:$0xff]  ;;  %v67_v59 = vld [vmem:[%s8549_s1 + $0x10] sm:$0xff]  ;;  %v68_v60 = vld [vmem:[%s8549_s1 + $0x18] sm:$0xff] }
  0x1c   :  { %v69_v61 = vld [vmem:[%s8549_s1 + $0x20] sm:$0xff]  ;;  %v70_v62 = vld [vmem:[%s8549_s1 + $0x28] sm:$0xff]  ;;  %v71_v63 = vld [vmem:[%s8549_s1 + $0x30] sm:$0xff] }
  0x1d   :  { %v72_v0 = vld [vmem:[%s8549_s1 + $0x38] sm:$0xff]  ;;  %v73_v1 = vld [vmem:[%s8549_s1 + $0x40] sm:$0xff]  ;;  %v74_v2 = vld [vmem:[%s8549_s1 + $0x48] sm:$0xff] }
  0x1e   :  { %3518 = vmatmul.mubr.msk.f32.gmra.mxu0 %vm165_vm0, %v39_v31  ;;  %3550 = vmatmul.mubr.msk.f32.gmra.mxu1 %vm165_vm0, %v39_v31  ;;  %v75_v3 = vld [vmem:[%s8549_s1 + $0x50] sm:$0xff]  ;;  %v77_v5 = vld [vmem:[%s8549_s1 + $0x60] sm:$0xff]  ;;  %v78_v6 = vld [vmem:[%s8549_s1 + $0x68] sm:$0xff] }
  0x1f   :  { %368 = vmatprep.mubr.f32.mxu0 %v8660_v8  ;;  %625 = vmatprep.mubr.f32.mxu1 %v8660_v8  ;;  %v79_v7 = vld [vmem:[%s8549_s1 + $0x70] sm:$0xff]  ;;  %v81_v10 = vld [vmem:[%s8549_s1 + $0x80] sm:$0xff]  ;;  %v84_v23 = vld [vmem:[%s8549_s1 + $0x98] sm:$0xff] }
  0x20   :  { %v83_v18 = vld [vmem:[%s8549_s1 + $0x90] sm:$0xff]  ;;  %v85_v28 = vld [vmem:[%s8549_s1 + $0xa0] sm:$0xff] }
  0x22   :  { %3519 = vmatmul.mubr.msk.f32.gmra.mxu0 %vm165_vm0, %v40_v32  ;;  %3551 = vmatmul.mubr.msk.f32.gmra.mxu1 %vm165_vm0, %v40_v32 }
  0x23   :  { %374 = vmatprep.mubr.f32.mxu0 %v8660_v8  ;;  %631 = vmatprep.mubr.f32.mxu1 %v8660_v8 }
  0x26   :  { %3520 = vmatmul.mubr.msk.f32.gmra.mxu0 %vm165_vm0, %v41_v33  ;;  %3552 = vmatmul.mubr.msk.f32.gmra.mxu1 %vm165_vm0, %v41_v33  ;;  %v86_v33 = vld [vmem:[%s8549_s1 + $0xa8] sm:$0xff] }
  0x27   :  { %380 = vmatprep.mubr.f32.mxu0 %v8660_v8  ;;  %637 = vmatprep.mubr.f32.mxu1 %v8660_v8 }
  0x2a   :  { %3521 = vmatmul.mubr.msk.f32.gmra.mxu0 %vm165_vm0, %v42_v34  ;;  %3553 = vmatmul.mubr.msk.f32.gmra.mxu1 %vm165_vm0, %v42_v34 }
  0x2b   :  { %386 = vmatprep.mubr.f32.mxu0 %v8660_v8  ;;  %643 = vmatprep.mubr.f32.mxu1 %v8660_v8 }
  0x2e   :  { %3522 = vmatmul.mubr.msk.f32.gmra.mxu0 %vm165_vm0, %v43_v35  ;;  %3554 = vmatmul.mubr.msk.f32.gmra.mxu1 %vm165_vm0, %v43_v35 }
  0x2f   :  { %392 = vmatprep.mubr.f32.mxu0 %v8660_v8  ;;  %649 = vmatprep.mubr.f32.mxu1 %v8660_v8 }
  0x32   :  { %3523 = vmatmul.mubr.msk.f32.gmra.mxu0 %vm165_vm0, %v44_v36  ;;  %3555 = vmatmul.mubr.msk.f32.gmra.mxu1 %vm165_vm0, %v44_v36 }
  0x33   :  { %398 = vmatprep.mubr.f32.mxu0 %v8660_v8  ;;  %655 = vmatprep.mubr.f32.mxu1 %v8660_v8 }
  0x36   :  { %3524 = vmatmul.mubr.msk.f32.gmra.mxu0 %vm165_vm0, %v45_v37  ;;  %3556 = vmatmul.mubr.msk.f32.gmra.mxu1 %vm165_vm0, %v45_v37 }
  0x37   :  { %404 = vmatprep.mubr.f32.mxu0 %v8660_v8  ;;  %661 = vmatprep.mubr.f32.mxu1 %v8660_v8 }
  0x3a   :  { %3525 = vmatmul.mubr.msk.f32.gmra.mxu0 %vm165_vm0, %v46_v38  ;;  %3557 = vmatmul.mubr.msk.f32.gmra.mxu1 %vm165_vm0, %v46_v38  ;;  %v87_v38 = vld [vmem:[%s8549_s1 + $0xb0] sm:$0xff] }
  0x3b   :  { %410 = vmatprep.mubr.f32.mxu0 %v8660_v8  ;;  %667 = vmatprep.mubr.f32.mxu1 %v8660_v8 }
  0x3e   :  { %3526 = vmatmul.mubr.msk.f32.gmra.mxu0 %vm165_vm0, %v47_v39  ;;  %3558 = vmatmul.mubr.msk.f32.gmra.mxu1 %vm165_vm0, %v47_v39 }
  0x3f   :  { %416 = vmatprep.mubr.f32.mxu0 %v8660_v8  ;;  %673 = vmatprep.mubr.f32.mxu1 %v8660_v8 }
  0x42   :  { %3527 = vmatmul.mubr.msk.f32.gmra.mxu0 %vm165_vm0, %v48_v40  ;;  %3559 = vmatmul.mubr.msk.f32.gmra.mxu1 %vm165_vm0, %v48_v40 }
  0x43   :  { %422 = vmatprep.mubr.f32.mxu0 %v8660_v8  ;;  %679 = vmatprep.mubr.f32.mxu1 %v8660_v8 }
  0x46   :  { %3528 = vmatmul.mubr.msk.f32.gmra.mxu0 %vm165_vm0, %v49_v41  ;;  %3560 = vmatmul.mubr.msk.f32.gmra.mxu1 %vm165_vm0, %v49_v41 }
  0x47   :  { %428 = vmatprep.mubr.f32.mxu0 %v8660_v8  ;;  %685 = vmatprep.mubr.f32.mxu1 %v8660_v8 }
  0x4a   :  { %3529 = vmatmul.mubr.msk.f32.gmra.mxu0 %vm165_vm0, %v50_v42  ;;  %3561 = vmatmul.mubr.msk.f32.gmra.mxu1 %vm165_vm0, %v50_v42 }
  0x4b   :  { %434 = vmatprep.mubr.f32.mxu0 %v8660_v8  ;;  %691 = vmatprep.mubr.f32.mxu1 %v8660_v8 }
  0x4e   :  { %3530 = vmatmul.mubr.msk.f32.gmra.mxu0 %vm165_vm0, %v51_v43  ;;  %3562 = vmatmul.mubr.msk.f32.gmra.mxu1 %vm165_vm0, %v51_v43  ;;  %v88_v43 = vld [vmem:[%s8549_s1 + $0xb8] sm:$0xff] }
  0x4f   :  { %440 = vmatprep.mubr.f32.mxu0 %v8660_v8  ;;  %697 = vmatprep.mubr.f32.mxu1 %v8660_v8 }
  0x52   :  { %3531 = vmatmul.mubr.msk.f32.gmra.mxu0 %vm165_vm0, %v52_v44  ;;  %3563 = vmatmul.mubr.msk.f32.gmra.mxu1 %vm165_vm0, %v52_v44 }
  0x53   :  { %446 = vmatprep.mubr.f32.mxu0 %v8660_v8  ;;  %703 = vmatprep.mubr.f32.mxu1 %v8660_v8 }
  0x56   :  { %3532 = vmatmul.mubr.msk.f32.gmra.mxu0 %vm165_vm0, %v53_v45  ;;  %3564 = vmatmul.mubr.msk.f32.gmra.mxu1 %vm165_vm0, %v53_v45 }
  0x57   :  { %452 = vmatprep.mubr.f32.mxu0 %v8660_v8  ;;  %709 = vmatprep.mubr.f32.mxu1 %v8660_v8 }
  0x5a   :  { %3533 = vmatmul.mubr.msk.f32.gmra.mxu0 %vm165_vm0, %v54_v46  ;;  %3565 = vmatmul.mubr.msk.f32.gmra.mxu1 %vm165_vm0, %v54_v46 }
  0x5b   :  { %458 = vmatprep.mubr.f32.mxu0 %v8660_v8  ;;  %715 = vmatprep.mubr.f32.mxu1 %v8660_v8 }
  0x5e   :  { %3534 = vmatmul.mubr.msk.f32.gmra.mxu0 %vm165_vm0, %v55_v47  ;;  %3566 = vmatmul.mubr.msk.f32.gmra.mxu1 %vm165_vm0, %v55_v47 }
  0x5f   :  { %464 = vmatprep.mubr.f32.mxu0 %v8660_v8  ;;  %721 = vmatprep.mubr.f32.mxu1 %v8660_v8 }
  0x62   :  { %3535 = vmatmul.mubr.msk.f32.gmra.mxu0 %vm165_vm0, %v56_v48  ;;  %3567 = vmatmul.mubr.msk.f32.gmra.mxu1 %vm165_vm0, %v56_v48  ;;  %v89_v48 = vld [vmem:[%s8549_s1 + $0xc0] sm:$0xff] }
  0x63   :  { %470 = vmatprep.mubr.f32.mxu0 %v8660_v8  ;;  %727 = vmatprep.mubr.f32.mxu1 %v8660_v8 }
  0x66   :  { %3536 = vmatmul.mubr.msk.f32.gmra.mxu0 %vm165_vm0, %v57_v49  ;;  %3568 = vmatmul.mubr.msk.f32.gmra.mxu1 %vm165_vm0, %v57_v49 }
  0x67   :  { %476 = vmatprep.mubr.f32.mxu0 %v8660_v8  ;;  %733 = vmatprep.mubr.f32.mxu1 %v8660_v8 }
  0x6a   :  { %3537 = vmatmul.mubr.msk.f32.gmra.mxu0 %vm165_vm0, %v58_v50  ;;  %3569 = vmatmul.mubr.msk.f32.gmra.mxu1 %vm165_vm0, %v58_v50 }
  0x6b   :  { %482 = vmatprep.mubr.f32.mxu0 %v8660_v8  ;;  %739 = vmatprep.mubr.f32.mxu1 %v8660_v8 }
  0x6e   :  { %3538 = vmatmul.mubr.msk.f32.gmra.mxu0 %vm165_vm0, %v59_v51  ;;  %3570 = vmatmul.mubr.msk.f32.gmra.mxu1 %vm165_vm0, %v59_v51 }
  0x6f   :  { %488 = vmatprep.mubr.f32.mxu0 %v8660_v8  ;;  %745 = vmatprep.mubr.f32.mxu1 %v8660_v8 }
  0x72   :  { %3539 = vmatmul.mubr.msk.f32.gmra.mxu0 %vm165_vm0, %v60_v52  ;;  %3571 = vmatmul.mubr.msk.f32.gmra.mxu1 %vm165_vm0, %v60_v52 }
  0x73   :  { %494 = vmatprep.mubr.f32.mxu0 %v8660_v8  ;;  %751 = vmatprep.mubr.f32.mxu1 %v8660_v8 }
  0x76   :  { %3540 = vmatmul.mubr.msk.f32.gmra.mxu0 %vm165_vm0, %v61_v53  ;;  %3572 = vmatmul.mubr.msk.f32.gmra.mxu1 %vm165_vm0, %v61_v53  ;;  %v90_v53 = vld [vmem:[%s8549_s1 + $0xc8] sm:$0xff] }
  0x77   :  { %500 = vmatprep.mubr.f32.mxu0 %v8660_v8  ;;  %757 = vmatprep.mubr.f32.mxu1 %v8660_v8 }
  0x7a   :  { %3541 = vmatmul.mubr.msk.f32.gmra.mxu0 %vm165_vm0, %v62_v54  ;;  %3573 = vmatmul.mubr.msk.f32.gmra.mxu1 %vm165_vm0, %v62_v54 }
  0x7b   :  { %506 = vmatprep.mubr.f32.mxu0 %v8660_v8  ;;  %763 = vmatprep.mubr.f32.mxu1 %v8660_v8 }
  0x7e   :  { %3542 = vmatmul.mubr.msk.f32.gmra.mxu0 %vm165_vm0, %v63_v55  ;;  %3574 = vmatmul.mubr.msk.f32.gmra.mxu1 %vm165_vm0, %v63_v55 }
  0x7f   :  { %512 = vmatprep.mubr.f32.mxu0 %v8660_v8  ;;  %769 = vmatprep.mubr.f32.mxu1 %v8660_v8 }
  0x82   :  { %3543 = vmatmul.mubr.msk.f32.gmra.mxu0 %vm165_vm0, %v64_v56  ;;  %3575 = vmatmul.mubr.msk.f32.gmra.mxu1 %vm165_vm0, %v64_v56 }
  0x83   :  { %936 = vmatprep.mubr.f32.mxu0 %v8660_v8  ;;  %1193 = vmatprep.mubr.f32.mxu1 %v8660_v8 }
  0x86   :  { %3576 = vmatmul.mubr.msk.f32.vlgmr.msra.gmra.mxu0 %vm165_vm0, %v65_v57  ;;  %3608 = vmatmul.mubr.msk.f32.vlgmr.msra.gmra.mxu1 %vm165_vm0, %v65_v57 }
  0x87   :  { %942 = vmatprep.mubr.f32.mxu0 %v8660_v8  ;;  %1199 = vmatprep.mubr.f32.mxu1 %v8660_v8 }
  0x88   :  { %1519 = vmatpush1.msra.mxu0 %v3853_v4  ;;  %1776 = vmatpush1.msra.mxu1 %v3865_v9  ;;  %v76_v4 = vld [vmem:[%s8549_s1 + $0x58] sm:$0xff] }
  0x89   :  { %1520 = vmatprep.subr.mxu0 %v3913_v24  ;;  %1777 = vmatprep.subr.mxu1 %v3920_v26  ;;  %v80_v9 = vld [vmem:[%s8549_s1 + $0x78] sm:$0xff] }
  0x8a   :  { %3577 = vmatmul.mubr.msk.f32.gmra.mxu0 %vm165_vm0, %v66_v58  ;;  %3609 = vmatmul.mubr.msk.f32.gmra.mxu1 %vm165_vm0, %v66_v58  ;;  %v91_v58 = vld [vmem:[%s8549_s1 + $0xd0] sm:$0xff] }
  0x8b   :  { %948 = vmatprep.mubr.f32.mxu0 %v8660_v8  ;;  %1205 = vmatprep.mubr.f32.mxu1 %v8660_v8 }
  0x8c   :  { %1521 = vmatpush1.msra.mxu0 %v3876_v13  ;;  %1778 = vmatpush1.msra.mxu1 %v3893_v19  ;;  %v82_v13 = vld [vmem:[%s8549_s1 + $0x88] sm:$0xff] }
  0x8e   :  { %3578 = vmatmul.mubr.msk.f32.gmra.mxu0 %vm165_vm0, %v67_v59  ;;  %3610 = vmatmul.mubr.msk.f32.gmra.mxu1 %vm165_vm0, %v67_v59 }
  0x8f   :  { %954 = vmatprep.mubr.f32.mxu0 %v8660_v8  ;;  %1211 = vmatprep.mubr.f32.mxu1 %v8660_v8 }
  0x92   :  { %3579 = vmatmul.mubr.msk.f32.gmra.mxu0 %vm165_vm0, %v68_v60  ;;  %3611 = vmatmul.mubr.msk.f32.gmra.mxu1 %vm165_vm0, %v68_v60 }
  0x93   :  { %960 = vmatprep.mubr.f32.mxu0 %v8660_v8  ;;  %1217 = vmatprep.mubr.f32.mxu1 %v8660_v8 }
  0x96   :  { %3580 = vmatmul.mubr.msk.f32.gmra.mxu0 %vm165_vm0, %v69_v61  ;;  %3612 = vmatmul.mubr.msk.f32.gmra.mxu1 %vm165_vm0, %v69_v61 }
  0x97   :  { %966 = vmatprep.mubr.f32.mxu0 %v8660_v8  ;;  %1223 = vmatprep.mubr.f32.mxu1 %v8660_v8 }
  0x9a   :  { %3581 = vmatmul.mubr.msk.f32.gmra.mxu0 %vm165_vm0, %v70_v62  ;;  %3613 = vmatmul.mubr.msk.f32.gmra.mxu1 %vm165_vm0, %v70_v62 }
  0x9b   :  { %972 = vmatprep.mubr.f32.mxu0 %v8660_v8  ;;  %1229 = vmatprep.mubr.f32.mxu1 %v8660_v8 }
  0x9e   :  { %3582 = vmatmul.mubr.msk.f32.gmra.mxu0 %vm165_vm0, %v71_v63  ;;  %3614 = vmatmul.mubr.msk.f32.gmra.mxu1 %vm165_vm0, %v71_v63  ;;  %v92_v63 = vld [vmem:[%s8549_s1 + $0xd8] sm:$0xff] }
  0x9f   :  { %978 = vmatprep.mubr.f32.mxu0 %v8660_v8  ;;  %1235 = vmatprep.mubr.f32.mxu1 %v8660_v8 }
  0xa2   :  { %3583 = vmatmul.mubr.msk.f32.gmra.mxu0 %vm165_vm0, %v72_v0  ;;  %3615 = vmatmul.mubr.msk.f32.gmra.mxu1 %vm165_vm0, %v72_v0 }
  0xa3   :  { %984 = vmatprep.mubr.f32.mxu0 %v8660_v8  ;;  %1241 = vmatprep.mubr.f32.mxu1 %v8660_v8 }
  0xa6   :  { %3584 = vmatmul.mubr.msk.f32.gmra.mxu0 %vm165_vm0, %v73_v1  ;;  %3616 = vmatmul.mubr.msk.f32.gmra.mxu1 %vm165_vm0, %v73_v1 }
  0xa7   :  { %990 = vmatprep.mubr.f32.mxu0 %v8660_v8  ;;  %1247 = vmatprep.mubr.f32.mxu1 %v8660_v8 }
  0xaa   :  { %3585 = vmatmul.mubr.msk.f32.gmra.mxu0 %vm165_vm0, %v74_v2  ;;  %3617 = vmatmul.mubr.msk.f32.gmra.mxu1 %vm165_vm0, %v74_v2 }
  0xab   :  { %996 = vmatprep.mubr.f32.mxu0 %v8660_v8  ;;  %1253 = vmatprep.mubr.f32.mxu1 %v8660_v8 }
  0xae   :  { %3586 = vmatmul.mubr.msk.f32.gmra.mxu0 %vm165_vm0, %v75_v3  ;;  %3618 = vmatmul.mubr.msk.f32.gmra.mxu1 %vm165_vm0, %v75_v3 }
  0xaf   :  { %1002 = vmatprep.mubr.f32.mxu0 %v8660_v8  ;;  %1259 = vmatprep.mubr.f32.mxu1 %v8660_v8 }
  0xb2   :  { %3587 = vmatmul.mubr.msk.f32.gmra.mxu0 %vm165_vm0, %v76_v4  ;;  %3619 = vmatmul.mubr.msk.f32.gmra.mxu1 %vm165_vm0, %v76_v4  ;;  %v93_v4 = vld [vmem:[%s8549_s1 + $0xe0] sm:$0xff] }
  0xb3   :  { %1008 = vmatprep.mubr.f32.mxu0 %v8660_v8  ;;  %1265 = vmatprep.mubr.f32.mxu1 %v8660_v8 }
  0xb6   :  { %3588 = vmatmul.mubr.msk.f32.gmra.mxu0 %vm165_vm0, %v77_v5  ;;  %3620 = vmatmul.mubr.msk.f32.gmra.mxu1 %vm165_vm0, %v77_v5 }
  0xb7   :  { %1014 = vmatprep.mubr.f32.mxu0 %v8660_v8  ;;  %1271 = vmatprep.mubr.f32.mxu1 %v8660_v8 }
  0xba   :  { %3589 = vmatmul.mubr.msk.f32.gmra.mxu0 %vm165_vm0, %v78_v6  ;;  %3621 = vmatmul.mubr.msk.f32.gmra.mxu1 %vm165_vm0, %v78_v6 }
  0xbb   :  { %1020 = vmatprep.mubr.f32.mxu0 %v8660_v8  ;;  %1277 = vmatprep.mubr.f32.mxu1 %v8660_v8 }
  0xbe   :  { %3590 = vmatmul.mubr.msk.f32.gmra.mxu0 %vm165_vm0, %v79_v7  ;;  %3622 = vmatmul.mubr.msk.f32.gmra.mxu1 %vm165_vm0, %v79_v7 }
  0xbf   :  { %1026 = vmatprep.mubr.f32.mxu0 %v8660_v8  ;;  %1283 = vmatprep.mubr.f32.mxu1 %v8660_v8 }
  0xc2   :  { %3591 = vmatmul.mubr.msk.f32.gmra.mxu0 %vm165_vm0, %v80_v9  ;;  %3623 = vmatmul.mubr.msk.f32.gmra.mxu1 %vm165_vm0, %v80_v9 }
  0xc3   :  { %1032 = vmatprep.mubr.f32.mxu0 %v8660_v8  ;;  %1289 = vmatprep.mubr.f32.mxu1 %v8660_v8 }
  0xc6   :  { %v4248_v11 = vpop.f32.mrf.mxu0  ;;  %v4250_v12 = vpop.f32.mrf.mxu1  ;;  %3592 = vmatmul.mubr.msk.f32.gmra.mxu0 %vm165_vm0, %v81_v10  ;;  %3624 = vmatmul.mubr.msk.f32.gmra.mxu1 %vm165_vm0, %v81_v10  ;;  %v94_v10 = vld [vmem:[%s8549_s1 + $0xe8] sm:$0xff] }
  0xc7   :  { %8939 = vst [vmem:[#allocation8_spill] sm:$0xff] %v4248_v11  ;;  %8940 = vst [vmem:[#allocation9_spill] sm:$0xff] %v4250_v12  ;;  %1038 = vmatprep.mubr.f32.mxu0 %v8660_v8  ;;  %1295 = vmatprep.mubr.f32.mxu1 %v8660_v8 }
  0xc8   :  { %v4259_v14 = vpop.f32.mrf.mxu0  ;;  %v4261_v15 = vpop.f32.mrf.mxu1 }
  0xc9   :  { %8941 = vst [vmem:[#allocation10_spill] sm:$0xff] %v4259_v14  ;;  %8942 = vst [vmem:[#allocation11_spill] sm:$0xff] %v4261_v15 }
  0xca   :  { %v4263_v16 = vpop.f32.mrf.mxu0  ;;  %v4265_v17 = vpop.f32.mrf.mxu1  ;;  %3593 = vmatmul.mubr.msk.f32.gmra.mxu0 %vm165_vm0, %v82_v13  ;;  %3625 = vmatmul.mubr.msk.f32.gmra.mxu1 %vm165_vm0, %v82_v13 }
  0xcb   :  { %8943 = vst [vmem:[#allocation12_spill] sm:$0xff] %v4263_v16  ;;  %8944 = vst [vmem:[#allocation13_spill] sm:$0xff] %v4265_v17  ;;  %1044 = vmatprep.mubr.f32.mxu0 %v8660_v8  ;;  %1301 = vmatprep.mubr.f32.mxu1 %v8660_v8 }
  0xcc   :  { %v4274_v19 = vpop.f32.mrf.mxu0  ;;  %v4276_v20 = vpop.f32.mrf.mxu1 }
  0xcd   :  { %8945 = vst [vmem:[#allocation14_spill] sm:$0xff] %v4274_v19  ;;  %8946 = vst [vmem:[#allocation15_spill] sm:$0xff] %v4276_v20 }
  0xce   :  { %v4278_v21 = vpop.f32.mrf.mxu0  ;;  %v4280_v22 = vpop.f32.mrf.mxu1  ;;  %3594 = vmatmul.mubr.msk.f32.gmra.mxu0 %vm165_vm0, %v83_v18  ;;  %3626 = vmatmul.mubr.msk.f32.gmra.mxu1 %vm165_vm0, %v83_v18 }
  0xcf   :  { %8947 = vst [vmem:[#allocation16_spill] sm:$0xff] %v4280_v22  ;;  %1050 = vmatprep.mubr.f32.mxu0 %v8660_v8  ;;  %1307 = vmatprep.mubr.f32.mxu1 %v8660_v8 }
  0xd0   :  { %v4289_v24 = vpop.f32.mrf.mxu0  ;;  %v4291_v25 = vpop.f32.mrf.mxu1 }
  0xd1   :  { %8948 = vst [vmem:[#allocation17_spill] sm:$0xff] %v4289_v24  ;;  %8949 = vst [vmem:[#allocation18_spill] sm:$0xff] %v4291_v25 }
  0xd2   :  { %v4293_v26 = vpop.f32.mrf.mxu0  ;;  %v4295_v27 = vpop.f32.mrf.mxu1  ;;  %3595 = vmatmul.mubr.msk.f32.gmra.mxu0 %vm165_vm0, %v84_v23  ;;  %3627 = vmatmul.mubr.msk.f32.gmra.mxu1 %vm165_vm0, %v84_v23 }
  0xd3   :  { %1056 = vmatprep.mubr.f32.mxu0 %v8660_v8  ;;  %1313 = vmatprep.mubr.f32.mxu1 %v8660_v8 }
  0xd4   :  { %v4304_v29 = vpop.f32.mrf.mxu0  ;;  %v4306_v30 = vpop.f32.mrf.mxu1 }
  0xd5   :  { %8950 = vst [vmem:[#allocation19_spill] sm:$0xff] %v4304_v29  ;;  %8951 = vst [vmem:[#allocation20_spill] sm:$0xff] %v4306_v30 }
  0xd6   :  { %v4308_v31 = vpop.f32.mrf.mxu0  ;;  %v4310_v32 = vpop.f32.mrf.mxu1  ;;  %3596 = vmatmul.mubr.msk.f32.gmra.mxu0 %vm165_vm0, %v85_v28  ;;  %3628 = vmatmul.mubr.msk.f32.gmra.mxu1 %vm165_vm0, %v85_v28 }
  0xd7   :  { %8952 = vst [vmem:[#allocation21_spill] sm:$0xff] %v4308_v31  ;;  %8953 = vst [vmem:[#allocation22_spill] sm:$0xff] %v4310_v32  ;;  %1062 = vmatprep.mubr.f32.mxu0 %v8660_v8  ;;  %1319 = vmatprep.mubr.f32.mxu1 %v8660_v8 }
  0xd8   :  { %v4319_v34 = vpop.f32.mrf.mxu0  ;;  %v4321_v35 = vpop.f32.mrf.mxu1 }
  0xd9   :  { %8954 = vst [vmem:[#allocation23_spill] sm:$0xff] %v4319_v34  ;;  %8955 = vst [vmem:[#allocation24_spill] sm:$0xff] %v4321_v35 }
  0xda   :  { %v4323_v36 = vpop.f32.mrf.mxu0  ;;  %v4325_v37 = vpop.f32.mrf.mxu1  ;;  %3597 = vmatmul.mubr.msk.f32.gmra.mxu0 %vm165_vm0, %v86_v33  ;;  %3629 = vmatmul.mubr.msk.f32.gmra.mxu1 %vm165_vm0, %v86_v33  ;;  %v95_v33 = vld [vmem:[%s8549_s1 + $0xf0] sm:$0xff] }
  0xdb   :  { %8956 = vst [vmem:[#allocation25_spill] sm:$0xff] %v4323_v36  ;;  %8957 = vst [vmem:[#allocation26_spill] sm:$0xff] %v4325_v37  ;;  %1068 = vmatprep.mubr.f32.mxu0 %v8660_v8  ;;  %1325 = vmatprep.mubr.f32.mxu1 %v8660_v8 }
  0xdc   :  { %v4334_v39 = vpop.f32.mrf.mxu0  ;;  %v4336_v40 = vpop.f32.mrf.mxu1 }
  0xdd   :  { %8958 = vst [vmem:[#allocation27_spill] sm:$0xff] %v4334_v39  ;;  %8959 = vst [vmem:[#allocation28_spill] sm:$0xff] %v4336_v40 }
  0xde   :  { %v4338_v41 = vpop.f32.mrf.mxu0  ;;  %v4340_v42 = vpop.f32.mrf.mxu1  ;;  %3598 = vmatmul.mubr.msk.f32.gmra.mxu0 %vm165_vm0, %v87_v38  ;;  %3630 = vmatmul.mubr.msk.f32.gmra.mxu1 %vm165_vm0, %v87_v38 }
  0xdf   :  { %8960 = vst [vmem:[#allocation29_spill] sm:$0xff] %v4338_v41  ;;  %8961 = vst [vmem:[#allocation30_spill] sm:$0xff] %v4340_v42  ;;  %1074 = vmatprep.mubr.f32.mxu0 %v8660_v8  ;;  %1331 = vmatprep.mubr.f32.mxu1 %v8660_v8 }
  0xe0   :  { %v4349_v44 = vpop.f32.mrf.mxu0  ;;  %v4351_v45 = vpop.f32.mrf.mxu1 }
  0xe1   :  { %8962 = vst [vmem:[#allocation31_spill] sm:$0xff] %v4349_v44  ;;  %8963 = vst [vmem:[#allocation32_spill] sm:$0xff] %v4351_v45 }
  0xe2   :  { %v4353_v46 = vpop.f32.mrf.mxu0  ;;  %v4355_v47 = vpop.f32.mrf.mxu1  ;;  %3599 = vmatmul.mubr.msk.f32.gmra.mxu0 %vm165_vm0, %v88_v43  ;;  %3631 = vmatmul.mubr.msk.f32.gmra.mxu1 %vm165_vm0, %v88_v43 }
  0xe3   :  { %8964 = vst [vmem:[#allocation33_spill] sm:$0xff] %v4353_v46  ;;  %8965 = vst [vmem:[#allocation34_spill] sm:$0xff] %v4355_v47  ;;  %1080 = vmatprep.mubr.f32.mxu0 %v8660_v8  ;;  %1337 = vmatprep.mubr.f32.mxu1 %v8660_v8 }
  0xe4   :  { %v4364_v49 = vpop.f32.mrf.mxu0  ;;  %v4366_v50 = vpop.f32.mrf.mxu1 }
  0xe5   :  { %8966 = vst [vmem:[#allocation35_spill] sm:$0xff] %v4364_v49  ;;  %8967 = vst [vmem:[#allocation36_spill] sm:$0xff] %v4366_v50 }
  0xe6   :  { %v4368_v51 = vpop.f32.mrf.mxu0  ;;  %v4370_v52 = vpop.f32.mrf.mxu1  ;;  %3600 = vmatmul.mubr.msk.f32.gmra.mxu0 %vm165_vm0, %v89_v48  ;;  %3632 = vmatmul.mubr.msk.f32.gmra.mxu1 %vm165_vm0, %v89_v48 }
  0xe7   :  { %8968 = vst [vmem:[#allocation37_spill] sm:$0xff] %v4368_v51  ;;  %8969 = vst [vmem:[#allocation38_spill] sm:$0xff] %v4370_v52  ;;  %1086 = vmatprep.mubr.f32.mxu0 %v8660_v8  ;;  %1343 = vmatprep.mubr.f32.mxu1 %v8660_v8 }
  0xe8   :  { %v4379_v54 = vpop.f32.mrf.mxu0  ;;  %v4381_v55 = vpop.f32.mrf.mxu1 }
  0xe9   :  { %8970 = vst [vmem:[#allocation39_spill] sm:$0xff] %v4379_v54  ;;  %8971 = vst [vmem:[#allocation40_spill] sm:$0xff] %v4381_v55 }
  0xea   :  { %v4383_v56 = vpop.f32.mrf.mxu0  ;;  %v4385_v57 = vpop.f32.mrf.mxu1  ;;  %3601 = vmatmul.mubr.msk.f32.gmra.mxu0 %vm165_vm0, %v90_v53  ;;  %3633 = vmatmul.mubr.msk.f32.gmra.mxu1 %vm165_vm0, %v90_v53 }
  0xeb   :  { %8972 = vst [vmem:[#allocation41_spill] sm:$0xff] %v4383_v56  ;;  %8973 = vst [vmem:[#allocation42_spill] sm:$0xff] %v4385_v57  ;;  %1092 = vmatprep.mubr.f32.mxu0 %v8660_v8  ;;  %1349 = vmatprep.mubr.f32.mxu1 %v8660_v8 }
  0xec   :  { %v4394_v59 = vpop.f32.mrf.mxu0  ;;  %v4396_v60 = vpop.f32.mrf.mxu1 }
  0xed   :  { %8974 = vst [vmem:[#allocation43_spill] sm:$0xff] %v4394_v59  ;;  %8975 = vst [vmem:[#allocation44_spill] sm:$0xff] %v4396_v60 }
  0xee   :  { %v4398_v61 = vpop.f32.mrf.mxu0  ;;  %v4400_v62 = vpop.f32.mrf.mxu1  ;;  %3602 = vmatmul.mubr.msk.f32.gmra.mxu0 %vm165_vm0, %v91_v58  ;;  %3634 = vmatmul.mubr.msk.f32.gmra.mxu1 %vm165_vm0, %v91_v58  ;;  %v96_v58 = vld [vmem:[%s8549_s1 + $0xf8] sm:$0xff] }
  0xef   :  { %8976 = vst [vmem:[#allocation45_spill] sm:$0xff] %v4398_v61  ;;  %8977 = vst [vmem:[#allocation46_spill] sm:$0xff] %v4400_v62  ;;  %1098 = vmatprep.mubr.f32.mxu0 %v8660_v8  ;;  %1355 = vmatprep.mubr.f32.mxu1 %v8660_v8 }
  0xf0   :  { %v4409_v0 = vpop.f32.mrf.mxu0  ;;  %v4411_v1 = vpop.f32.mrf.mxu1 }
  0xf1   :  { %8978 = vst [vmem:[#allocation47_spill] sm:$0xff] %v4409_v0  ;;  %8979 = vst [vmem:[#allocation48_spill] sm:$0xff] %v4411_v1 }
  0xf2   :  { %v4413_v2 = vpop.f32.mrf.mxu0  ;;  %v4415_v3 = vpop.f32.mrf.mxu1  ;;  %3603 = vmatmul.mubr.msk.f32.gmra.mxu0 %vm165_vm0, %v92_v63  ;;  %3635 = vmatmul.mubr.msk.f32.gmra.mxu1 %vm165_vm0, %v92_v63 }
  0xf3   :  { %8980 = vst [vmem:[#allocation49_spill] sm:$0xff] %v4413_v2  ;;  %8981 = vst [vmem:[#allocation50_spill] sm:$0xff] %v4415_v3  ;;  %1104 = vmatprep.mubr.f32.mxu0 %v8660_v8  ;;  %1361 = vmatprep.mubr.f32.mxu1 %v8660_v8 }
  0xf4   :  { %v4424_v5 = vpop.f32.mrf.mxu0  ;;  %v4426_v6 = vpop.f32.mrf.mxu1 }
  0xf5   :  { %8982 = vst [vmem:[#allocation51_spill] sm:$0xff] %v4424_v5  ;;  %8983 = vst [vmem:[#allocation52_spill] sm:$0xff] %v4426_v6 }
  0xf6   :  { %v4428_v7 = vpop.f32.mrf.mxu0  ;;  %v4430_v9 = vpop.f32.mrf.mxu1  ;;  %3604 = vmatmul.mubr.msk.f32.gmra.mxu0 %vm165_vm0, %v93_v4  ;;  %3636 = vmatmul.mubr.msk.f32.gmra.mxu1 %vm165_vm0, %v93_v4 }
  0xf7   :  { %8984 = vst [vmem:[#allocation53_spill] sm:$0xff] %v4428_v7  ;;  %8985 = vst [vmem:[#allocation54_spill] sm:$0xff] %v4430_v9  ;;  %1110 = vmatprep.mubr.f32.mxu0 %v8660_v8  ;;  %1367 = vmatprep.mubr.f32.mxu1 %v8660_v8 }
  0xf8   :  { %v4439_v13 = vpop.f32.mrf.mxu0  ;;  %v4441_v18 = vpop.f32.mrf.mxu1 }
  0xf9   :  { %8986 = vst [vmem:[#allocation55_spill] sm:$0xff] %v4439_v13  ;;  %8987 = vst [vmem:[#allocation56_spill] sm:$0xff] %v4441_v18 }
  0xfa   :  { %v4443_v23 = vpop.f32.mrf.mxu0  ;;  %v4445_v28 = vpop.f32.mrf.mxu1  ;;  %3605 = vmatmul.mubr.msk.f32.gmra.mxu0 %vm165_vm0, %v94_v10  ;;  %3637 = vmatmul.mubr.msk.f32.gmra.mxu1 %vm165_vm0, %v94_v10 }
  0xfb   :  { %8988 = vst [vmem:[#allocation57_spill] sm:$0xff] %v4443_v23  ;;  %8989 = vst [vmem:[#allocation58_spill] sm:$0xff] %v4445_v28  ;;  %1116 = vmatprep.mubr.f32.mxu0 %v8660_v8  ;;  %1373 = vmatprep.mubr.f32.mxu1 %v8660_v8 }
  0xfc   :  { %v4454_v38 = vpop.f32.mrf.mxu0  ;;  %v4456_v43 = vpop.f32.mrf.mxu1 }
  0xfd   :  { %8990 = vst [vmem:[#allocation59_spill] sm:$0xff] %v4454_v38  ;;  %8991 = vst [vmem:[#allocation60_spill] sm:$0xff] %v4456_v43 }
  0xfe   :  { %v4458_v48 = vpop.f32.mrf.mxu0  ;;  %v4460_v53 = vpop.f32.mrf.mxu1  ;;  %3606 = vmatmul.mubr.msk.f32.gmra.mxu0 %vm165_vm0, %v95_v33  ;;  %3638 = vmatmul.mubr.msk.f32.gmra.mxu1 %vm165_vm0, %v95_v33  ;;  %v97_v33 = vld [vmem:[%s8550_s2] sm:$0xff] }
  0xff   :  { %8992 = vst [vmem:[#allocation61_spill] sm:$0xff] %v4458_v48  ;;  %8993 = vst [vmem:[#allocation62_spill] sm:$0xff] %v4460_v53  ;;  %1122 = vmatprep.mubr.f32.mxu0 %v8660_v8  ;;  %1379 = vmatprep.mubr.f32.mxu1 %v8660_v8 }
 0x100   :  { %v4469_v63 = vpop.f32.mrf.mxu0  ;;  %v4471_v4 = vpop.f32.mrf.mxu1 }
 0x101   :  { %8994 = vst [vmem:[#allocation63_spill] sm:$0xff] %v4469_v63  ;;  %8995 = vst [vmem:[#allocation64_spill] sm:$0xff] %v4471_v4 }
 0x102   :  { %v4473_v10 = vpop.f32.mrf.mxu0  ;;  %v4475_v48 = vpop.f32.mrf.mxu1  ;;  %3607 = vmatmul.mubr.msk.f32.gmra.mxu0 %vm165_vm0, %v96_v58  ;;  %3639 = vmatmul.mubr.msk.f32.gmra.mxu1 %vm165_vm0, %v96_v58  ;;  %v98_v58 = vld [vmem:[%s8550_s2 + $0x8] sm:$0xff] }
 0x103   :  { %8996 = vst [vmem:[#allocation65_spill] sm:$0xff] %v4473_v10  ;;  %8997 = vst [vmem:[#allocation66_spill] sm:$0xff] %v4475_v48  ;;  %1554 = vmatprep.mubr.f32.mxu0 %v8660_v8  ;;  %1811 = vmatprep.mubr.f32.mxu1 %v8660_v8 }
 0x104   :  { %v4484_v53 = vpop.f32.mrf.mxu0  ;;  %v4486_v63 = vpop.f32.mrf.mxu1 }
 0x105   :  { %8998 = vst [vmem:[#allocation67_spill] sm:$0xff] %v4484_v53  ;;  %8999 = vst [vmem:[#allocation68_spill] sm:$0xff] %v4486_v63 }
 0x106   :  { %v4488_v4 = vpop.f32.mrf.mxu0  ;;  %v4490_v10 = vpop.f32.mrf.mxu1  ;;  %3640 = vmatmul.mubr.msk.f32.vlgmr.msra.gmra.mxu0 %vm165_vm0, %v97_v33  ;;  %3672 = vmatmul.mubr.msk.f32.vlgmr.msra.gmra.mxu1 %vm165_vm0, %v97_v33  ;;  %v99_v33 = vld [vmem:[%s8550_s2 + $0x10] sm:$0xff] }
 0x107   :  { %9000 = vst [vmem:[#allocation69_spill] sm:$0xff] %v4488_v4  ;;  %9001 = vst [vmem:[#allocation70_spill] sm:$0xff] %v4490_v10  ;;  %1560 = vmatprep.mubr.f32.mxu0 %v8660_v8  ;;  %1817 = vmatprep.mubr.f32.mxu1 %v8660_v8 }
 0x108   :  { %v4499_v48 = vpop.f32.mrf.mxu0  ;;  %v4501_v53 = vpop.f32.mrf.mxu1 }
 0x109   :  { %9002 = vst [vmem:[#allocation71_spill] sm:$0xff] %v4499_v48  ;;  %9003 = vst [vmem:[#allocation72_spill] sm:$0xff] %v4501_v53 }
 0x10a   :  { %v4503_v63 = vpop.f32.mrf.mxu0  ;;  %v4505_v4 = vpop.f32.mrf.mxu1  ;;  %3641 = vmatmul.mubr.msk.f32.gmra.mxu0 %vm165_vm0, %v98_v58  ;;  %3673 = vmatmul.mubr.msk.f32.gmra.mxu1 %vm165_vm0, %v98_v58  ;;  %v100_v58 = vld [vmem:[%s8550_s2 + $0x18] sm:$0xff] }
 0x10b   :  { %9004 = vst [vmem:[#allocation73_spill] sm:$0xff] %v4503_v63  ;;  %9005 = vst [vmem:[#allocation74_spill] sm:$0xff] %v4505_v4  ;;  %1566 = vmatprep.mubr.f32.mxu0 %v8660_v8  ;;  %1823 = vmatprep.mubr.f32.mxu1 %v8660_v8 }
 0x10c   :  { %v4514_v10 = vpop.f32.mrf.mxu0  ;;  %v4516_v48 = vpop.f32.mrf.mxu1 }
 0x10d   :  { %9006 = vst [vmem:[#allocation75_spill] sm:$0xff] %v4514_v10  ;;  %9007 = vst [vmem:[#allocation76_spill] sm:$0xff] %v4516_v48 }
 0x10e   :  { %v4518_v53 = vpop.f32.mrf.mxu0  ;;  %v4520_v63 = vpop.f32.mrf.mxu1  ;;  %3642 = vmatmul.mubr.msk.f32.gmra.mxu0 %vm165_vm0, %v99_v33  ;;  %3674 = vmatmul.mubr.msk.f32.gmra.mxu1 %vm165_vm0, %v99_v33  ;;  %v101_v33 = vld [vmem:[%s8550_s2 + $0x20] sm:$0xff] }
 0x10f   :  { %9008 = vst [vmem:[#allocation77_spill] sm:$0xff] %v4518_v53  ;;  %9009 = vst [vmem:[#allocation78_spill] sm:$0xff] %v4520_v63  ;;  %1572 = vmatprep.mubr.f32.mxu0 %v8660_v8  ;;  %1829 = vmatprep.mubr.f32.mxu1 %v8660_v8 }
 0x110   :  { %v4529_v4 = vpop.f32.mrf.mxu0  ;;  %v4531_v10 = vpop.f32.mrf.mxu1 }
 0x111   :  { %9010 = vst [vmem:[#allocation79_spill] sm:$0xff] %v4529_v4  ;;  %9011 = vst [vmem:[#allocation80_spill] sm:$0xff] %v4531_v10 }
 0x112   :  { %v4533_v48 = vpop.f32.mrf.mxu0  ;;  %v4535_v53 = vpop.f32.mrf.mxu1  ;;  %3643 = vmatmul.mubr.msk.f32.gmra.mxu0 %vm165_vm0, %v100_v58  ;;  %3675 = vmatmul.mubr.msk.f32.gmra.mxu1 %vm165_vm0, %v100_v58  ;;  %v102_v58 = vld [vmem:[%s8550_s2 + $0x28] sm:$0xff] }
 0x113   :  { %9012 = vst [vmem:[#allocation81_spill] sm:$0xff] %v4533_v48  ;;  %9013 = vst [vmem:[#allocation82_spill] sm:$0xff] %v4535_v53  ;;  %1578 = vmatprep.mubr.f32.mxu0 %v8660_v8  ;;  %1835 = vmatprep.mubr.f32.mxu1 %v8660_v8 }
 0x114   :  { %v4544_v63 = vpop.f32.mrf.mxu0  ;;  %v4546_v4 = vpop.f32.mrf.mxu1 }
 0x115   :  { %9014 = vst [vmem:[#allocation83_spill] sm:$0xff] %v4544_v63  ;;  %9015 = vst [vmem:[#allocation84_spill] sm:$0xff] %v4546_v4 }
 0x116   :  { %v4548_v10 = vpop.f32.mrf.mxu0  ;;  %v4550_v48 = vpop.f32.mrf.mxu1  ;;  %3644 = vmatmul.mubr.msk.f32.gmra.mxu0 %vm165_vm0, %v101_v33  ;;  %3676 = vmatmul.mubr.msk.f32.gmra.mxu1 %vm165_vm0, %v101_v33  ;;  %v103_v33 = vld [vmem:[%s8550_s2 + $0x30] sm:$0xff] }
 0x117   :  { %9016 = vst [vmem:[#allocation85_spill] sm:$0xff] %v4548_v10  ;;  %9017 = vst [vmem:[#allocation86_spill] sm:$0xff] %v4550_v48  ;;  %1584 = vmatprep.mubr.f32.mxu0 %v8660_v8  ;;  %1841 = vmatprep.mubr.f32.mxu1 %v8660_v8 }
 0x118   :  { %v4559_v53 = vpop.f32.mrf.mxu0  ;;  %v4561_v63 = vpop.f32.mrf.mxu1 }
 0x119   :  { %9018 = vst [vmem:[#allocation87_spill] sm:$0xff] %v4559_v53  ;;  %9019 = vst [vmem:[#allocation88_spill] sm:$0xff] %v4561_v63 }
 0x11a   :  { %v4563_v4 = vpop.f32.mrf.mxu0  ;;  %v4565_v10 = vpop.f32.mrf.mxu1  ;;  %3645 = vmatmul.mubr.msk.f32.gmra.mxu0 %vm165_vm0, %v102_v58  ;;  %3677 = vmatmul.mubr.msk.f32.gmra.mxu1 %vm165_vm0, %v102_v58  ;;  %v104_v58 = vld [vmem:[%s8550_s2 + $0x38] sm:$0xff] }
 0x11b   :  { %9020 = vst [vmem:[#allocation89_spill] sm:$0xff] %v4563_v4  ;;  %9021 = vst [vmem:[#allocation90_spill] sm:$0xff] %v4565_v10  ;;  %1590 = vmatprep.mubr.f32.mxu0 %v8660_v8  ;;  %1847 = vmatprep.mubr.f32.mxu1 %v8660_v8 }
 0x11c   :  { %v4574_v48 = vpop.f32.mrf.mxu0  ;;  %v4576_v53 = vpop.f32.mrf.mxu1 }
 0x11d   :  { %9022 = vst [vmem:[#allocation91_spill] sm:$0xff] %v4574_v48  ;;  %9023 = vst [vmem:[#allocation92_spill] sm:$0xff] %v4576_v53 }
 0x11e   :  { %v4578_v63 = vpop.f32.mrf.mxu0  ;;  %v4580_v4 = vpop.f32.mrf.mxu1  ;;  %3646 = vmatmul.mubr.msk.f32.gmra.mxu0 %vm165_vm0, %v103_v33  ;;  %3678 = vmatmul.mubr.msk.f32.gmra.mxu1 %vm165_vm0, %v103_v33  ;;  %v105_v33 = vld [vmem:[%s8550_s2 + $0x40] sm:$0xff] }
 0x11f   :  { %9024 = vst [vmem:[#allocation93_spill] sm:$0xff] %v4578_v63  ;;  %9025 = vst [vmem:[#allocation94_spill] sm:$0xff] %v4580_v4  ;;  %1596 = vmatprep.mubr.f32.mxu0 %v8660_v8  ;;  %1853 = vmatprep.mubr.f32.mxu1 %v8660_v8 }
 0x120   :  { %v4589_v10 = vpop.f32.mrf.mxu0  ;;  %v4591_v48 = vpop.f32.mrf.mxu1 }
 0x121   :  { %9026 = vst [vmem:[#allocation95_spill] sm:$0xff] %v4589_v10  ;;  %9027 = vst [vmem:[#allocation96_spill] sm:$0xff] %v4591_v48 }
 0x122   :  { %v4593_v53 = vpop.f32.mrf.mxu0  ;;  %v4595_v63 = vpop.f32.mrf.mxu1  ;;  %3647 = vmatmul.mubr.msk.f32.gmra.mxu0 %vm165_vm0, %v104_v58  ;;  %3679 = vmatmul.mubr.msk.f32.gmra.mxu1 %vm165_vm0, %v104_v58  ;;  %v106_v58 = vld [vmem:[%s8550_s2 + $0x48] sm:$0xff] }
 0x123   :  { %9028 = vst [vmem:[#allocation97_spill] sm:$0xff] %v4593_v53  ;;  %9029 = vst [vmem:[#allocation98_spill] sm:$0xff] %v4595_v63  ;;  %1602 = vmatprep.mubr.f32.mxu0 %v8660_v8  ;;  %1859 = vmatprep.mubr.f32.mxu1 %v8660_v8 }
 0x124   :  { %v4604_v4 = vpop.f32.mrf.mxu0  ;;  %v4606_v10 = vpop.f32.mrf.mxu1 }
 0x125   :  { %9030 = vst [vmem:[#allocation99_spill] sm:$0xff] %v4604_v4  ;;  %9031 = vst [vmem:[#allocation100_spill] sm:$0xff] %v4606_v10 }
 0x126   :  { %v4608_v48 = vpop.f32.mrf.mxu0  ;;  %v4610_v53 = vpop.f32.mrf.mxu1  ;;  %3648 = vmatmul.mubr.msk.f32.gmra.mxu0 %vm165_vm0, %v105_v33  ;;  %3680 = vmatmul.mubr.msk.f32.gmra.mxu1 %vm165_vm0, %v105_v33  ;;  %v107_v33 = vld [vmem:[%s8550_s2 + $0x50] sm:$0xff] }
 0x127   :  { %9032 = vst [vmem:[#allocation101_spill] sm:$0xff] %v4608_v48  ;;  %9033 = vst [vmem:[#allocation102_spill] sm:$0xff] %v4610_v53  ;;  %1608 = vmatprep.mubr.f32.mxu0 %v8660_v8  ;;  %1865 = vmatprep.mubr.f32.mxu1 %v8660_v8 }
 0x128   :  { %v4619_v63 = vpop.f32.mrf.mxu0  ;;  %v4621_v4 = vpop.f32.mrf.mxu1 }
 0x129   :  { %9034 = vst [vmem:[#allocation103_spill] sm:$0xff] %v4619_v63  ;;  %9035 = vst [vmem:[#allocation104_spill] sm:$0xff] %v4621_v4 }
 0x12a   :  { %v4623_v10 = vpop.f32.mrf.mxu0  ;;  %v4625_v48 = vpop.f32.mrf.mxu1  ;;  %3649 = vmatmul.mubr.msk.f32.gmra.mxu0 %vm165_vm0, %v106_v58  ;;  %3681 = vmatmul.mubr.msk.f32.gmra.mxu1 %vm165_vm0, %v106_v58  ;;  %v108_v58 = vld [vmem:[%s8550_s2 + $0x58] sm:$0xff] }
 0x12b   :  { %9036 = vst [vmem:[#allocation105_spill] sm:$0xff] %v4623_v10  ;;  %9037 = vst [vmem:[#allocation106_spill] sm:$0xff] %v4625_v48  ;;  %1614 = vmatprep.mubr.f32.mxu0 %v8660_v8  ;;  %1871 = vmatprep.mubr.f32.mxu1 %v8660_v8 }
 0x12c   :  { %v4634_v53 = vpop.f32.mrf.mxu0  ;;  %v4636_v63 = vpop.f32.mrf.mxu1 }
 0x12d   :  { %9038 = vst [vmem:[#allocation107_spill] sm:$0xff] %v4634_v53  ;;  %9039 = vst [vmem:[#allocation108_spill] sm:$0xff] %v4636_v63 }
 0x12e   :  { %v4638_v4 = vpop.f32.mrf.mxu0  ;;  %v4640_v10 = vpop.f32.mrf.mxu1  ;;  %3650 = vmatmul.mubr.msk.f32.gmra.mxu0 %vm165_vm0, %v107_v33  ;;  %3682 = vmatmul.mubr.msk.f32.gmra.mxu1 %vm165_vm0, %v107_v33  ;;  %v109_v33 = vld [vmem:[%s8550_s2 + $0x60] sm:$0xff] }
 0x12f   :  { %9040 = vst [vmem:[#allocation109_spill] sm:$0xff] %v4638_v4  ;;  %9041 = vst [vmem:[#allocation110_spill] sm:$0xff] %v4640_v10  ;;  %1620 = vmatprep.mubr.f32.mxu0 %v8660_v8  ;;  %1877 = vmatprep.mubr.f32.mxu1 %v8660_v8 }
 0x130   :  { %v4649_v48 = vpop.f32.mrf.mxu0  ;;  %v4651_v53 = vpop.f32.mrf.mxu1 }
 0x131   :  { %9042 = vst [vmem:[#allocation111_spill] sm:$0xff] %v4649_v48  ;;  %9043 = vst [vmem:[#allocation112_spill] sm:$0xff] %v4651_v53 }
 0x132   :  { %v4653_v63 = vpop.f32.mrf.mxu0  ;;  %v4655_v4 = vpop.f32.mrf.mxu1  ;;  %3651 = vmatmul.mubr.msk.f32.gmra.mxu0 %vm165_vm0, %v108_v58  ;;  %3683 = vmatmul.mubr.msk.f32.gmra.mxu1 %vm165_vm0, %v108_v58  ;;  %v110_v58 = vld [vmem:[%s8550_s2 + $0x68] sm:$0xff] }
 0x133   :  { %9044 = vst [vmem:[#allocation113_spill] sm:$0xff] %v4653_v63  ;;  %9045 = vst [vmem:[#allocation114_spill] sm:$0xff] %v4655_v4  ;;  %1626 = vmatprep.mubr.f32.mxu0 %v8660_v8  ;;  %1883 = vmatprep.mubr.f32.mxu1 %v8660_v8 }
 0x134   :  { %v4664_v10 = vpop.f32.mrf.mxu0  ;;  %v4666_v48 = vpop.f32.mrf.mxu1 }
 0x135   :  { %9046 = vst [vmem:[#allocation115_spill] sm:$0xff] %v4664_v10  ;;  %9047 = vst [vmem:[#allocation116_spill] sm:$0xff] %v4666_v48 }
 0x136   :  { %v4668_v53 = vpop.f32.mrf.mxu0  ;;  %v4670_v63 = vpop.f32.mrf.mxu1  ;;  %3652 = vmatmul.mubr.msk.f32.gmra.mxu0 %vm165_vm0, %v109_v33  ;;  %3684 = vmatmul.mubr.msk.f32.gmra.mxu1 %vm165_vm0, %v109_v33  ;;  %v111_v33 = vld [vmem:[%s8550_s2 + $0x70] sm:$0xff] }
 0x137   :  { %9048 = vst [vmem:[#allocation117_spill] sm:$0xff] %v4668_v53  ;;  %9049 = vst [vmem:[#allocation118_spill] sm:$0xff] %v4670_v63  ;;  %1632 = vmatprep.mubr.f32.mxu0 %v8660_v8  ;;  %1889 = vmatprep.mubr.f32.mxu1 %v8660_v8 }
 0x138   :  { %v4679_v4 = vpop.f32.mrf.mxu0  ;;  %v4681_v10 = vpop.f32.mrf.mxu1 }
 0x139   :  { %9050 = vst [vmem:[#allocation119_spill] sm:$0xff] %v4679_v4  ;;  %9051 = vst [vmem:[#allocation120_spill] sm:$0xff] %v4681_v10 }
 0x13a   :  { %v4683_v48 = vpop.f32.mrf.mxu0  ;;  %v4685_v53 = vpop.f32.mrf.mxu1  ;;  %3653 = vmatmul.mubr.msk.f32.gmra.mxu0 %vm165_vm0, %v110_v58  ;;  %3685 = vmatmul.mubr.msk.f32.gmra.mxu1 %vm165_vm0, %v110_v58  ;;  %v112_v58 = vld [vmem:[%s8550_s2 + $0x78] sm:$0xff] }
 0x13b   :  { %9052 = vst [vmem:[#allocation121_spill] sm:$0xff] %v4683_v48  ;;  %9053 = vst [vmem:[#allocation122_spill] sm:$0xff] %v4685_v53  ;;  %1638 = vmatprep.mubr.f32.mxu0 %v8660_v8  ;;  %1895 = vmatprep.mubr.f32.mxu1 %v8660_v8 }
 0x13c   :  { %v4694_v63 = vpop.f32.mrf.mxu0  ;;  %v4696_v4 = vpop.f32.mrf.mxu1 }
 0x13d   :  { %9054 = vst [vmem:[#allocation123_spill] sm:$0xff] %v4694_v63  ;;  %9055 = vst [vmem:[#allocation124_spill] sm:$0xff] %v4696_v4 }
 0x13e   :  { %v4698_v10 = vpop.f32.mrf.mxu0  ;;  %v4700_v48 = vpop.f32.mrf.mxu1  ;;  %3654 = vmatmul.mubr.msk.f32.gmra.mxu0 %vm165_vm0, %v111_v33  ;;  %3686 = vmatmul.mubr.msk.f32.gmra.mxu1 %vm165_vm0, %v111_v33  ;;  %v113_v33 = vld [vmem:[%s8550_s2 + $0x80] sm:$0xff] }
 0x13f   :  { %9056 = vst [vmem:[#allocation125_spill] sm:$0xff] %v4698_v10  ;;  %9057 = vst [vmem:[#allocation126_spill] sm:$0xff] %v4700_v48  ;;  %1644 = vmatprep.mubr.f32.mxu0 %v8660_v8  ;;  %1901 = vmatprep.mubr.f32.mxu1 %v8660_v8 }
 0x140   :  { %v4709_v53 = vpop.f32.mrf.mxu0  ;;  %v4711_v63 = vpop.f32.mrf.mxu1 }
 0x141   :  { %9058 = vst [vmem:[#allocation127_spill] sm:$0xff] %v4709_v53  ;;  %9059 = vst [vmem:[#allocation128_spill] sm:$0xff] %v4711_v63 }
 0x142   :  { %v4713_v4 = vpop.f32.mrf.mxu0  ;;  %v4715_v10 = vpop.f32.mrf.mxu1  ;;  %3655 = vmatmul.mubr.msk.f32.gmra.mxu0 %vm165_vm0, %v112_v58  ;;  %3687 = vmatmul.mubr.msk.f32.gmra.mxu1 %vm165_vm0, %v112_v58  ;;  %v114_v58 = vld [vmem:[%s8550_s2 + $0x88] sm:$0xff] }
 0x143   :  { %9060 = vst [vmem:[#allocation129_spill] sm:$0xff] %v4713_v4  ;;  %9061 = vst [vmem:[#allocation130_spill] sm:$0xff] %v4715_v10  ;;  %1650 = vmatprep.mubr.f32.mxu0 %v8660_v8  ;;  %1907 = vmatprep.mubr.f32.mxu1 %v8660_v8 }
 0x144   :  { %v4724_v48 = vpop.f32.mrf.mxu0  ;;  %v4726_v53 = vpop.f32.mrf.mxu1 }
 0x145   :  { %9062 = vst [vmem:[#allocation131_spill] sm:$0xff] %v4724_v48  ;;  %9063 = vst [vmem:[#allocation132_spill] sm:$0xff] %v4726_v53 }
 0x146   :  { %v4728_v63 = vpop.f32.mrf.mxu0  ;;  %v4730_v4 = vpop.f32.mrf.mxu1  ;;  %3656 = vmatmul.mubr.msk.f32.gmra.mxu0 %vm165_vm0, %v113_v33  ;;  %3688 = vmatmul.mubr.msk.f32.gmra.mxu1 %vm165_vm0, %v113_v33  ;;  %v115_v33 = vld [vmem:[%s8550_s2 + $0x90] sm:$0xff] }
 0x147   :  { %9064 = vst [vmem:[#allocation133_spill] sm:$0xff] %v4728_v63  ;;  %9065 = vst [vmem:[#allocation134_spill] sm:$0xff] %v4730_v4  ;;  %1656 = vmatprep.mubr.f32.mxu0 %v8660_v8  ;;  %1913 = vmatprep.mubr.f32.mxu1 %v8660_v8  ;;  %v2004_v46 = vsub.f32 %v4248_v11, %v4728_v63  ;;  %v122_v63 = vld [vmem:[%s8550_s2 + $0xc8] sm:$0xff]  ;;  %v4876_v11 = vld [vmem:[%s8552_s4 + $0x10] sm:$0xff] }
 0x148   :  { %v4739_v10 = vpop.f32.mrf.mxu0  ;;  %v4741_v48 = vpop.f32.mrf.mxu1 }
 0x149   :  { %9066 = vst [vmem:[#allocation135_spill] sm:$0xff] %v4739_v10  ;;  %9067 = vst [vmem:[#allocation136_spill] sm:$0xff] %v4741_v48  ;;  %v2007_v45 = vsub.f32 %v4261_v15, %v4741_v48 }
 0x14a   :  { %v4743_v53 = vpop.f32.mrf.mxu0  ;;  %v4745_v43 = vpop.f32.mrf.mxu1  ;;  %3657 = vmatmul.mubr.msk.f32.gmra.mxu0 %vm165_vm0, %v114_v58  ;;  %3689 = vmatmul.mubr.msk.f32.gmra.mxu1 %vm165_vm0, %v114_v58  ;;  %v116_v58 = vld [vmem:[%s8550_s2 + $0x98] sm:$0xff] }
 0x14b   :  { %9068 = vst [vmem:[#allocation137_spill] sm:$0xff] %v4743_v53  ;;  %9069 = vst [vmem:[#allocation138_spill] sm:$0xff] %v4745_v43  ;;  %1662 = vmatprep.mubr.f32.mxu0 %v8660_v8  ;;  %1919 = vmatprep.mubr.f32.mxu1 %v8660_v8  ;;  %v2008_v48 = vsub.f32 %v4263_v16, %v4743_v53  ;;  %v4936_v53 = vld [vmem:[%s8553_s5 + $0x20] sm:$0xff]  ;;  %v2010_v16 = vsub.f32 %v4265_v17, %v4745_v43  ;;  %v4959_v43 = vld [vmem:[%s8553_s5 + $0x30] sm:$0xff] }
 0x14c   :  { %v4754_v38 = vpop.f32.mrf.mxu0  ;;  %v4756_v28 = vpop.f32.mrf.mxu1 }
 0x14d   :  { %9070 = vst [vmem:[#allocation139_spill] sm:$0xff] %v4754_v38  ;;  %9071 = vst [vmem:[#allocation140_spill] sm:$0xff] %v4756_v28  ;;  %v2009_v17 = vsub.f32 %v4274_v19, %v4754_v38  ;;  %v4981_v38 = vld [vmem:[%s8552_s4 + $0x28] sm:$0xff] }
 0x14e   :  { %v4758_v23 = vpop.f32.mrf.mxu0  ;;  %v4760_v18 = vpop.f32.mrf.mxu1  ;;  %3658 = vmatmul.mubr.msk.f32.gmra.mxu0 %vm165_vm0, %v115_v33  ;;  %3690 = vmatmul.mubr.msk.f32.gmra.mxu1 %vm165_vm0, %v115_v33  ;;  %v117_v33 = vld [vmem:[%s8550_s2 + $0xa0] sm:$0xff] }
 0x14f   :  { %9072 = vst [vmem:[#allocation141_spill] sm:$0xff] %v4758_v23  ;;  %9073 = vst [vmem:[#allocation142_spill] sm:$0xff] %v4760_v18  ;;  %1668 = vmatprep.mubr.f32.mxu0 %v8660_v8  ;;  %1925 = vmatprep.mubr.f32.mxu1 %v8660_v8 }
 0x150   :  { %v4769_v13 = vpop.f32.mrf.mxu0  ;;  %v4771_v9 = vpop.f32.mrf.mxu1 }
 0x151   :  { %9074 = vst [vmem:[#allocation143_spill] sm:$0xff] %v4769_v13  ;;  %9075 = vst [vmem:[#allocation144_spill] sm:$0xff] %v4771_v9 }
 0x152   :  { %v4773_v7 = vpop.f32.mrf.mxu0  ;;  %v4775_v6 = vpop.f32.mrf.mxu1  ;;  %3659 = vmatmul.mubr.msk.f32.gmra.mxu0 %vm165_vm0, %v116_v58  ;;  %3691 = vmatmul.mubr.msk.f32.gmra.mxu1 %vm165_vm0, %v116_v58  ;;  %v118_v58 = vld [vmem:[%s8550_s2 + $0xa8] sm:$0xff] }
 0x153   :  { %9076 = vst [vmem:[#allocation145_spill] sm:$0xff] %v4773_v7  ;;  %9077 = vst [vmem:[#allocation146_spill] sm:$0xff] %v4775_v6  ;;  %1674 = vmatprep.mubr.f32.mxu0 %v8660_v8  ;;  %1931 = vmatprep.mubr.f32.mxu1 %v8660_v8 }
 0x154   :  { %v4784_v5 = vpop.f32.mrf.mxu0  ;;  %v4786_v3 = vpop.f32.mrf.mxu1 }
 0x155   :  { %9078 = vst [vmem:[#allocation147_spill] sm:$0xff] %v4784_v5  ;;  %9079 = vst [vmem:[#allocation148_spill] sm:$0xff] %v4786_v3 }
 0x156   :  { %v4788_v2 = vpop.f32.mrf.mxu0  ;;  %v4790_v1 = vpop.f32.mrf.mxu1  ;;  %3660 = vmatmul.mubr.msk.f32.gmra.mxu0 %vm165_vm0, %v117_v33  ;;  %3692 = vmatmul.mubr.msk.f32.gmra.mxu1 %vm165_vm0, %v117_v33  ;;  %v119_v33 = vld [vmem:[%s8550_s2 + $0xb0] sm:$0xff] }
 0x157   :  { %9080 = vst [vmem:[#allocation149_spill] sm:$0xff] %v4788_v2  ;;  %9081 = vst [vmem:[#allocation150_spill] sm:$0xff] %v4790_v1  ;;  %1680 = vmatprep.mubr.f32.mxu0 %v8660_v8  ;;  %1937 = vmatprep.mubr.f32.mxu1 %v8660_v8 }
 0x158   :  { %v4799_v0 = vpop.f32.mrf.mxu0  ;;  %v4801_v62 = vpop.f32.mrf.mxu1 }
 0x159   :  { %9082 = vst [vmem:[#allocation151_spill] sm:$0xff] %v4799_v0  ;;  %9083 = vst [vmem:[#allocation152_spill] sm:$0xff] %v4801_v62 }
 0x15a   :  { %v4803_v61 = vpop.f32.mrf.mxu0  ;;  %v4805_v60 = vpop.f32.mrf.mxu1  ;;  %3661 = vmatmul.mubr.msk.f32.gmra.mxu0 %vm165_vm0, %v118_v58  ;;  %3693 = vmatmul.mubr.msk.f32.gmra.mxu1 %vm165_vm0, %v118_v58  ;;  %v120_v58 = vld [vmem:[%s8550_s2 + $0xb8] sm:$0xff] }
 0x15b   :  { %9084 = vst [vmem:[#allocation153_spill] sm:$0xff] %v4803_v61  ;;  %9085 = vst [vmem:[#allocation154_spill] sm:$0xff] %v4805_v60  ;;  %1686 = vmatprep.mubr.f32.mxu0 %v8660_v8  ;;  %1943 = vmatprep.mubr.f32.mxu1 %v8660_v8 }
 0x15c   :  { %v4814_v59 = vpop.f32.mrf.mxu0  ;;  %v4816_v57 = vpop.f32.mrf.mxu1 }
 0x15d   :  { %9086 = vst [vmem:[#allocation155_spill] sm:$0xff] %v4814_v59  ;;  %9087 = vst [vmem:[#allocation156_spill] sm:$0xff] %v4816_v57 }
 0x15e   :  { %v4818_v56 = vpop.f32.mrf.mxu0  ;;  %v4820_v55 = vpop.f32.mrf.mxu1  ;;  %3662 = vmatmul.mubr.msk.f32.gmra.mxu0 %vm165_vm0, %v119_v33  ;;  %3694 = vmatmul.mubr.msk.f32.gmra.mxu1 %vm165_vm0, %v119_v33  ;;  %v121_v33 = vld [vmem:[%s8550_s2 + $0xc0] sm:$0xff] }
 0x15f   :  { %9088 = vst [vmem:[#allocation157_spill] sm:$0xff] %v4818_v56  ;;  %9089 = vst [vmem:[#allocation158_spill] sm:$0xff] %v4820_v55  ;;  %1692 = vmatprep.mubr.f32.mxu0 %v8660_v8  ;;  %1949 = vmatprep.mubr.f32.mxu1 %v8660_v8 }
 0x160   :  { %v4829_v54 = vpop.f32.mrf.mxu0  ;;  %v4831_v52 = vpop.f32.mrf.mxu1 }
 0x161   :  { %9090 = vst [vmem:[#allocation159_spill] sm:$0xff] %v4829_v54  ;;  %9091 = vst [vmem:[#allocation160_spill] sm:$0xff] %v4831_v52  ;;  %v4931_v54 = vld [vmem:[%s8552_s4 + $0x20] sm:$0xff] }
 0x162   :  { %v4833_v51 = vpop.f32.mrf.mxu0  ;;  %v4835_v50 = vpop.f32.mrf.mxu1  ;;  %3663 = vmatmul.mubr.msk.f32.gmra.mxu0 %vm165_vm0, %v120_v58  ;;  %3695 = vmatmul.mubr.msk.f32.gmra.mxu1 %vm165_vm0, %v120_v58  ;;  %v4859_v58 = vld [vmem:[%s8552_s4] sm:$0xff] }
 0x163   :  { %9092 = vst [vmem:[#allocation161_spill] sm:$0xff] %v4833_v51  ;;  %9093 = vst [vmem:[#allocation162_spill] sm:$0xff] %v4835_v50  ;;  %1698 = vmatprep.mubr.f32.mxu0 %v8660_v8  ;;  %1955 = vmatprep.mubr.f32.mxu1 %v8660_v8  ;;  %v2006_v8 = vsub.f32 %v4250_v12, %v4730_v4  ;;  %v2005_v4 = vsub.f32 %v4259_v14, %v4739_v10  ;;  %v4902_v10 = vld [vmem:[%s8553_s5 + $0x8] sm:$0xff]  ;;  %v4907_v14 = vld [vmem:[%s8552_s4 + $0x18] sm:$0xff] }
 0x164   :  { %v4844_v49 = vpop.f32.mrf.mxu0  ;;  %v4846_v47 = vpop.f32.mrf.mxu1  ;;  %v4897_v52 = vmul.f32 %v2004_v46, %v4859_v58 }
 0x165   :  { %9094 = vst [vmem:[#allocation163_spill] sm:$0xff] %v4844_v49  ;;  %9095 = vst [vmem:[#allocation164_spill] sm:$0xff] %v4846_v47  ;;  %v9098_v47 = vmov 0.0   ;;  %v4892_v49 = vld [vmem:[%s8552_s4 + $0x8] sm:$0xff]  ;;  %v4926_v44 = vmul.f32 %v2006_v8, %v4876_v11 }
 0x166   :  { %v4850_v50 = vpop.f32.mrf.mxu0  ;;  %v4852_v51 = vpop.f32.mrf.mxu1  ;;  %3664 = vmatmul.mubr.msk.f32.gmra.mxu0 %vm165_vm0, %v121_v33  ;;  %3696 = vmatmul.mubr.msk.f32.gmra.mxu1 %vm165_vm0, %v121_v33  ;;  %v4871_v33 = vld [vmem:[%s8553_s5] sm:$0xff]  ;;  %9101 = vst [vmem:[#allocation169_spill] sm:$0xff] %v4897_v52 }
 0x167   :  { %9096 = vst [vmem:[#allocation165_spill] sm:$0xff] %v4850_v50  ;;  %9097 = vst [vmem:[#allocation166_spill] sm:$0xff] %v4852_v51  ;;  %1704 = vmatprep.mubr.f32.mxu0 %v9098_v47  ;;  %1961 = vmatprep.mubr.f32.mxu1 %v9098_v47  ;;  %v4887_v50 = vld [vmem:[%s8553_s5 + $0x10] sm:$0xff] }
 0x168   :  { %v4880_v12 = vpop.f32.mrf.mxu0  ;;  %v4882_v51 = vpop.f32.mrf.mxu1  ;;  %9105 = vst [vmem:[#allocation173_spill] sm:$0xff] %v4926_v44  ;;  %v4949_v44 = vmul.f32 %v2005_v4, %v4892_v49 }
 0x169   :  { %9099 = vst [vmem:[#allocation167_spill] sm:$0xff] %v4880_v12  ;;  %9100 = vst [vmem:[#allocation168_spill] sm:$0xff] %v4882_v51  ;;  %v4912_v51 = vld [vmem:[%s8553_s5 + $0x18] sm:$0xff]  ;;  %v4923_v12 = vmul.f32 %v2004_v46, %v4871_v33  ;;  %v123_v46 = vld [vmem:[%s8550_s2 + $0xd0] sm:$0xff] }
 0x16a   :  { %v4916_v15 = vpop.f32.mrf.mxu0  ;;  %v4918_v52 = vpop.f32.mrf.mxu1  ;;  %3665 = vmatmul.mubr.msk.f32.gmra.mxu0 %vm165_vm0, %v122_v63  ;;  %3697 = vmatmul.mubr.msk.f32.gmra.mxu1 %vm165_vm0, %v122_v63  ;;  %v4946_v63 = vmul.f32 %v2006_v8, %v4887_v50  ;;  %9107 = vst [vmem:[#allocation175_spill] sm:$0xff] %v4949_v44  ;;  %v2011_v8 = vsub.f32 %v4276_v20, %v4756_v28  ;;  %v4986_v28 = vld [vmem:[%s8553_s5 + $0x28] sm:$0xff] }
 0x16b   :  { %9102 = vst [vmem:[#allocation170_spill] sm:$0xff] %v4916_v15  ;;  %9103 = vst [vmem:[#allocation171_spill] sm:$0xff] %v4918_v52  ;;  %1710 = vmatprep.mubr.f32.mxu0 %v9098_v47  ;;  %1967 = vmatprep.mubr.f32.mxu1 %v9098_v47  ;;  %v4970_v44 = vmul.f32 %v2005_v4, %v4902_v10  ;;  %v4973_v15 = vmul.f32 %v2007_v45, %v4907_v14  ;;  %v4991_v4 = vld [vmem:[%s8552_s4 + $0x38] sm:$0xff] }
 0x16c   :  { %9104 = vst [vmem:[#allocation172_spill] sm:$0xff] %v4923_v12  ;;  %9106 = vst [vmem:[#allocation174_spill] sm:$0xff] %v4946_v63  ;;  %v4954_v12 = vld [vmem:[%s8552_s4 + $0x30] sm:$0xff]  ;;  %v4965_v63 = vpop.f32.mrf.mxu0  ;;  %v4967_v52 = vpop.f32.mrf.mxu1  ;;  %v4976_v42 = vmul.f32 %v2007_v45, %v4912_v51  ;;  %v4996_v45 = vmul.f32 %v2008_v48, %v4931_v54  ;;  %v2014_v20 = vsub.f32 %v4280_v22, %v4760_v18  ;;  %v124_v18 = vld [vmem:[%s8550_s2 + $0xd8] sm:$0xff] }
 0x16d   :  { %9108 = vst [vmem:[#allocation176_spill] sm:$0xff] %v4965_v63  ;;  %9109 = vst [vmem:[#allocation177_spill] sm:$0xff] %v4967_v52 }
 0x16e   :  { %9110 = vst [vmem:[#allocation178_spill] sm:$0xff] %v4970_v44  ;;  %9111 = vst [vmem:[#allocation179_spill] sm:$0xff] %v4973_v15  ;;  %v2012_v44 = vsub.f32 %v4278_v21, %v4758_v23  ;;  %v5004_v15 = vld [vmem:[%s8553_s5 + $0x38] sm:$0xff]  ;;  %v5008_v19 = vpop.f32.mrf.mxu0  ;;  %v5010_v52 = vpop.f32.mrf.mxu1  ;;  %3666 = vmatmul.mubr.msk.f32.gmra.mxu0 %vm165_vm0, %v123_v46  ;;  %3698 = vmatmul.mubr.msk.f32.gmra.mxu1 %vm165_vm0, %v123_v46  ;;  %v5028_v23 = vmul.f32 %v2009_v17, %v4981_v38 }
 0x16f   :  { %9112 = vst [vmem:[#allocation180_spill] sm:$0xff] %v4976_v42  ;;  %9113 = vst [vmem:[#allocation181_spill] sm:$0xff] %v4996_v45  ;;  %v4999_v42 = vmul.f32 %v2008_v48, %v4936_v53  ;;  %v5015_v45 = vmul.f32 %v2010_v16, %v4954_v12  ;;  %v5018_v48 = vmul.f32 %v2010_v16, %v4959_v43  ;;  %1716 = vmatprep.mubr.f32.mxu0 %v9098_v47 }
 0x170   :  { %9115 = vst [vmem:[#allocation183_spill] sm:$0xff] %v5008_v19  ;;  %9116 = vst [vmem:[#allocation184_spill] sm:$0xff] %v5010_v52  ;;  %1973 = vmatprep.mubr.f32.mxu1 %v9098_v47  ;;  %v5031_v46 = vmul.f32 %v2009_v17, %v4986_v28  ;;  %v5034_v16 = vmul.f32 %v2011_v8, %v4991_v4  ;;  %v5046_v22 = vmul.f32 %v2012_v44, %v4859_v58 }
 0x171   :  { %9114 = vst [vmem:[#allocation182_spill] sm:$0xff] %v4999_v42  ;;  %9117 = vst [vmem:[#allocation185_spill] sm:$0xff] %v5015_v45  ;;  %v2013_v42 = vsub.f32 %v4289_v24, %v4769_v13  ;;  %v2015_v13 = vsub.f32 %v4291_v25, %v4771_v9  ;;  %v5038_v45 = vpop.f32.mrf.mxu0  ;;  %v5040_v24 = vpop.f32.mrf.mxu1  ;;  %v2016_v17 = vsub.f32 %v4293_v26, %v4773_v7 }
 0x172   :  { %9118 = vst [vmem:[#allocation186_spill] sm:$0xff] %v5018_v48  ;;  %9119 = vst [vmem:[#allocation187_spill] sm:$0xff] %v5028_v23  ;;  %v5043_v48 = vmul.f32 %v2011_v8, %v5004_v15  ;;  %v5056_v23 = vmul.f32 %v2014_v20, %v4876_v11  ;;  %v2017_v9 = vsub.f32 %v4304_v29, %v4784_v5  ;;  %3667 = vmatmul.mubr.msk.f32.gmra.mxu0 %vm165_vm0, %v124_v18  ;;  %v125_v5 = vld [vmem:[%s8550_s2 + $0xe0] sm:$0xff] }
 0x173   :  { %9120 = vst [vmem:[#allocation188_spill] sm:$0xff] %v5031_v46  ;;  %9121 = vst [vmem:[#allocation189_spill] sm:$0xff] %v5034_v16  ;;  %v2018_v46 = vsub.f32 %v4295_v27, %v4775_v6  ;;  %v5053_v16 = vmul.f32 %v2012_v44, %v4871_v33  ;;  %v5060_v8 = vpop.f32.mrf.mxu0  ;;  %3699 = vmatmul.mubr.msk.f32.gmra.mxu1 %vm165_vm0, %v124_v18  ;;  %v5070_v44 = vmul.f32 %v2013_v42, %v4892_v49 }
 0x174   :  { %9122 = vst [vmem:[#allocation190_spill] sm:$0xff] %v5038_v45  ;;  %9123 = vst [vmem:[#allocation191_spill] sm:$0xff] %v5040_v24  ;;  %1722 = vmatprep.mubr.f32.mxu0 %v9098_v47  ;;  %1979 = vmatprep.mubr.f32.mxu1 %v9098_v47  ;;  %v5080_v29 = vmul.f32 %v2013_v42, %v4902_v10  ;;  %v5086_v18 = vmul.f32 %v2015_v13, %v4912_v51 }
 0x175   :  { %9124 = vst [vmem:[#allocation192_spill] sm:$0xff] %v5043_v48  ;;  %9125 = vst [vmem:[#allocation193_spill] sm:$0xff] %v5046_v22  ;;  %v5062_v48 = vpop.f32.mrf.mxu1  ;;  %v5067_v22 = vmul.f32 %v2014_v20, %v4887_v50  ;;  %v5083_v20 = vmul.f32 %v2015_v13, %v4907_v14  ;;  %v5095_v6 = vmul.f32 %v2016_v17, %v4931_v54 }
 0x176   :  { %9126 = vst [vmem:[#allocation194_spill] sm:$0xff] %v5056_v23  ;;  %9127 = vst [vmem:[#allocation195_spill] sm:$0xff] %v5060_v8  ;;  %v2019_v23 = vsub.f32 %v4306_v30, %v4786_v3  ;;  %v5090_v3 = vpop.f32.mrf.mxu0  ;;  %v5098_v7 = vmul.f32 %v2016_v17, %v4936_v53  ;;  %v5101_v42 = vmul.f32 %v2018_v46, %v4954_v12  ;;  %3668 = vmatmul.mubr.msk.f32.gmra.mxu0 %vm165_vm0, %v125_v5 }
 0x177   :  { %9128 = vst [vmem:[#allocation196_spill] sm:$0xff] %v5062_v48  ;;  %9129 = vst [vmem:[#allocation197_spill] sm:$0xff] %v5070_v44  ;;  %v2020_v44 = vsub.f32 %v4308_v31, %v4788_v2  ;;  %v5092_v30 = vpop.f32.mrf.mxu1  ;;  %v2022_v13 = vsub.f32 %v4310_v32, %v4790_v1  ;;  %3700 = vmatmul.mubr.msk.f32.gmra.mxu1 %vm165_vm0, %v125_v5  ;;  %v5120_v17 = vmul.f32 %v2017_v9, %v4986_v28 }
 0x178   :  { %9130 = vst [vmem:[#allocation198_spill] sm:$0xff] %v5080_v29  ;;  %9131 = vst [vmem:[#allocation199_spill] sm:$0xff] %v5083_v20  ;;  %v5109_v29 = vmul.f32 %v2017_v9, %v4981_v38  ;;  %v2021_v20 = vsub.f32 %v4319_v34, %v4799_v0  ;;  %v5113_v2 = vpop.f32.mrf.mxu0  ;;  %1728 = vmatprep.mubr.f32.mxu0 %v9098_v47  ;;  %1985 = vmatprep.mubr.f32.mxu1 %v9098_v47  ;;  %v126_v0 = vld [vmem:[%s8550_s2 + $0xe8] sm:$0xff] }
 0x179   :  { %9132 = vst [vmem:[#allocation200_spill] sm:$0xff] %v5086_v18  ;;  %9133 = vst [vmem:[#allocation201_spill] sm:$0xff] %v5090_v3  ;;  %v5106_v18 = vmul.f32 %v2018_v46, %v4959_v43  ;;  %v5123_v46 = vmul.f32 %v2019_v23, %v4991_v4  ;;  %v5136_v5 = vmul.f32 %v2020_v44, %v4859_v58 }
 0x17a   :  { %9134 = vst [vmem:[#allocation202_spill] sm:$0xff] %v5092_v30  ;;  %9135 = vst [vmem:[#allocation203_spill] sm:$0xff] %v5095_v6  ;;  %v5115_v6 = vpop.f32.mrf.mxu1  ;;  %v2024_v9 = vsub.f32 %v4323_v36, %v4803_v61  ;;  %v5150_v34 = vmul.f32 %v2022_v13, %v4876_v11  ;;  %v2027_v61 = vsub.f32 %v4336_v40, %v4816_v57  ;;  %3669 = vmatmul.mubr.msk.f32.gmra.mxu0 %vm165_vm0, %v126_v0 }
 0x17b   :  { %9136 = vst [vmem:[#allocation204_spill] sm:$0xff] %v5098_v7  ;;  %9137 = vst [vmem:[#allocation205_spill] sm:$0xff] %v5101_v42  ;;  %v5133_v42 = vmul.f32 %v2019_v23, %v5004_v15  ;;  %v5153_v23 = vmul.f32 %v2022_v13, %v4887_v50  ;;  %3701 = vmatmul.mubr.msk.f32.gmra.mxu1 %vm165_vm0, %v126_v0  ;;  %1734 = vmatprep.mubr.f32.mxu0 %v9098_v47  ;;  %v9195_v7 = vld [vmem:[#allocation38_spill] sm:$0xff] }
 0x17c   :  { %9138 = vst [vmem:[#allocation206_spill] sm:$0xff] %v5106_v18  ;;  %9139 = vst [vmem:[#allocation207_spill] sm:$0xff] %v5109_v29  ;;  %v2023_v29 = vsub.f32 %v4321_v35, %v4801_v62  ;;  %v5144_v62 = vpop.f32.mrf.mxu1  ;;  %v5147_v35 = vmul.f32 %v2020_v44, %v4871_v33  ;;  %1991 = vmatprep.mubr.f32.mxu1 %v9098_v47  ;;  %v5188_v0 = vmul.f32 %v2024_v9, %v4936_v53  ;;  %v9194_v18 = vld [vmem:[#allocation166_spill] sm:$0xff] }
 0x17d   :  { %9140 = vst [vmem:[#allocation208_spill] sm:$0xff] %v5113_v2  ;;  %9141 = vst [vmem:[#allocation209_spill] sm:$0xff] %v5115_v6  ;;  %v2038_v1 = vsub.f32 %v9195_v7, %v9194_v18 }
 0x17e   :  { %9142 = vst [vmem:[#allocation210_spill] sm:$0xff] %v5120_v17  ;;  %9143 = vst [vmem:[#allocation211_spill] sm:$0xff] %v5123_v46  ;;  %v2026_v17 = vsub.f32 %v4325_v37, %v4805_v60  ;;  %v5142_v46 = vpop.f32.mrf.mxu0  ;;  %v5161_v60 = vmul.f32 %v2021_v20, %v4902_v10  ;;  %v5172_v13 = vmul.f32 %v2023_v29, %v4907_v14 }
 0x17f   :  { %9144 = vst [vmem:[#allocation212_spill] sm:$0xff] %v5133_v42  ;;  %9145 = vst [vmem:[#allocation213_spill] sm:$0xff] %v5136_v5  ;;  %v2025_v42 = vsub.f32 %v4334_v39, %v4814_v59  ;;  %v5158_v5 = vmul.f32 %v2021_v20, %v4892_v49  ;;  %v5175_v59 = vmul.f32 %v2023_v29, %v4912_v51  ;;  %v9166_v39 = vld [vmem:[#allocation31_spill] sm:$0xff] }
 0x180   :  { %9146 = vst [vmem:[#allocation214_spill] sm:$0xff] %v5142_v46  ;;  %9147 = vst [vmem:[#allocation215_spill] sm:$0xff] %v5144_v62  ;;  %v5165_v44 = vpop.f32.mrf.mxu0  ;;  %v2028_v20 = vsub.f32 %v4338_v41, %v4818_v56  ;;  %v5191_v29 = vmul.f32 %v2026_v17, %v4954_v12  ;;  %v5200_v56 = vmul.f32 %v2026_v17, %v4959_v43  ;;  %v9168_v41 = vld [vmem:[#allocation32_spill] sm:$0xff] }
 0x181   :  { %9148 = vst [vmem:[#allocation216_spill] sm:$0xff] %v5147_v35  ;;  %9149 = vst [vmem:[#allocation217_spill] sm:$0xff] %v5150_v34  ;;  %v5167_v35 = vpop.f32.mrf.mxu1  ;;  %v5203_v40 = vmul.f32 %v2025_v42, %v4981_v38 }
 0x182   :  { %9150 = vst [vmem:[#allocation218_spill] sm:$0xff] %v5153_v23  ;;  %9151 = vst [vmem:[#allocation219_spill] sm:$0xff] %v5158_v5  ;;  %v5185_v5 = vmul.f32 %v2024_v9, %v4931_v54  ;;  %v5195_v57 = vpop.f32.mrf.mxu0 }
 0x183   :  { %9152 = vst [vmem:[#allocation220_spill] sm:$0xff] %v5161_v60  ;;  %9153 = vst [vmem:[#allocation221_spill] sm:$0xff] %v5165_v44  ;;  %v127_v60 = vld [vmem:[%s8550_s2 + $0xf0] sm:$0xff]  ;;  %v5197_v34 = vpop.f32.mrf.mxu1 }
 0x184   :  { %9154 = vst [vmem:[#allocation222_spill] sm:$0xff] %v5167_v35  ;;  %9155 = vst [vmem:[#allocation223_spill] sm:$0xff] %v5172_v13  ;;  %v5218_v17 = vpop.f32.mrf.mxu0  ;;  %3670 = vmatmul.mubr.msk.f32.gmra.mxu0 %vm165_vm0, %v127_v60  ;;  %3702 = vmatmul.mubr.msk.f32.gmra.mxu1 %vm165_vm0, %v127_v60 }
 0x185   :  { %9156 = vst [vmem:[#allocation224_spill] sm:$0xff] %v5175_v59  ;;  %9157 = vst [vmem:[#allocation225_spill] sm:$0xff] %v5185_v5  ;;  %v9160_v59 = vld [vmem:[#allocation30_spill] sm:$0xff]  ;;  %v9165_v5 = vld [vmem:[#allocation159_spill] sm:$0xff]  ;;  %1740 = vmatprep.mubr.f32.mxu0 %v9098_v47  ;;  %1997 = vmatprep.mubr.f32.mxu1 %v9098_v47 }
 0x186   :  { %9158 = vst [vmem:[#allocation226_spill] sm:$0xff] %v5188_v0  ;;  %9159 = vst [vmem:[#allocation227_spill] sm:$0xff] %v5191_v29  ;;  %v2030_v13 = vsub.f32 %v9160_v59, %v4820_v55  ;;  %v2029_v9 = vsub.f32 %v9166_v39, %v9165_v5  ;;  %v9167_v0 = vld [vmem:[#allocation160_spill] sm:$0xff]  ;;  %v5210_v29 = vmul.f32 %v2025_v42, %v4986_v28  ;;  %v9176_v42 = vld [vmem:[#allocation33_spill] sm:$0xff] }
 0x187   :  { %9161 = vst [vmem:[#allocation228_spill] sm:$0xff] %v5195_v57  ;;  %9162 = vst [vmem:[#allocation229_spill] sm:$0xff] %v5197_v34  ;;  %v2031_v23 = vsub.f32 %v9168_v41, %v9167_v0  ;;  %v5213_v55 = vmul.f32 %v2027_v61, %v4991_v4  ;;  %v5216_v59 = vmul.f32 %v2027_v61, %v5004_v15  ;;  %v9175_v0 = vld [vmem:[#allocation161_spill] sm:$0xff]  ;;  %v9177_v5 = vld [vmem:[#allocation162_spill] sm:$0xff] }
 0x188   :  { %9163 = vst [vmem:[#allocation230_spill] sm:$0xff] %v5200_v56  ;;  %9164 = vst [vmem:[#allocation231_spill] sm:$0xff] %v5203_v40  ;;  %v5220_v56 = vpop.f32.mrf.mxu1  ;;  %v5225_v40 = vmul.f32 %v2028_v20, %v4859_v58  ;;  %v9178_v41 = vld [vmem:[#allocation34_spill] sm:$0xff]  ;;  %v128_v61 = vld [vmem:[%s8550_s2 + $0xf8] sm:$0xff]  ;;  %v5240_v60 = vmul.f32 %v2030_v13, %v4876_v11  ;;  %v5252_v47 = vmul.f32 %v2029_v9, %v4892_v49 }
 0x189   :  { %9169 = vst [vmem:[#allocation232_spill] sm:$0xff] %v5210_v29  ;;  %9170 = vst [vmem:[#allocation233_spill] sm:$0xff] %v5213_v55  ;;  %v2032_v29 = vsub.f32 %v9176_v42, %v9175_v0  ;;  %v2034_v55 = vsub.f32 %v9178_v41, %v9177_v5  ;;  %v9182_v0 = vld [vmem:[#allocation163_spill] sm:$0xff]  ;;  %v5247_v41 = vpop.f32.mrf.mxu0  ;;  %v5255_v37 = vmul.f32 %v2029_v9, %v4902_v10  ;;  %3671 = vmatmul.mubr.msk.f32.gmra.mxu0 %vm165_vm0, %v128_v61 }
 0x18a   :  { %9171 = vst [vmem:[#allocation234_spill] sm:$0xff] %v5216_v59  ;;  %9172 = vst [vmem:[#allocation235_spill] sm:$0xff] %v5218_v17  ;;  %v5237_v59 = vmul.f32 %v2028_v20, %v4871_v33  ;;  %v9183_v42 = vld [vmem:[#allocation35_spill] sm:$0xff]  ;;  %v5249_v39 = vpop.f32.mrf.mxu1  ;;  %v5258_v20 = vmul.f32 %v2031_v23, %v4907_v14  ;;  %3703 = vmatmul.mubr.msk.f32.gmra.mxu1 %vm165_vm0, %v128_v61 }
 0x18b   :  { %9173 = vst [vmem:[#allocation236_spill] sm:$0xff] %v5220_v56  ;;  %9174 = vst [vmem:[#allocation237_spill] sm:$0xff] %v5225_v40  ;;  %v5243_v40 = vmul.f32 %v2030_v13, %v4887_v50  ;;  %v2033_v5 = vsub.f32 %v9183_v42, %v9182_v0  ;;  %v9192_v0 = vld [vmem:[#allocation165_spill] sm:$0xff]  ;;  %v5269_v32 = vpop.f32.mrf.mxu0  ;;  %v5276_v9 = vmul.f32 %v2032_v29, %v4931_v54 }
 0x18c   :  { %9179 = vst [vmem:[#allocation238_spill] sm:$0xff] %v5237_v59  ;;  %9180 = vst [vmem:[#allocation239_spill] sm:$0xff] %v5240_v60  ;;  %v9189_v60 = vld [vmem:[#allocation164_spill] sm:$0xff]  ;;  %v9193_v42 = vld [vmem:[#allocation37_spill] sm:$0xff]  ;;  %v5287_v18 = vmul.f32 %v2034_v55, %v4959_v43 }
 0x18d   :  { %9181 = vst [vmem:[#allocation240_spill] sm:$0xff] %v5243_v40  ;;  %9184 = vst [vmem:[#allocation241_spill] sm:$0xff] %v5247_v41  ;;  %v9190_v59 = vld [vmem:[#allocation36_spill] sm:$0xff]  ;;  %v5263_v40 = vmul.f32 %v2031_v23, %v4912_v51  ;;  %v2036_v36 = vsub.f32 %v9193_v42, %v9192_v0  ;;  %v5279_v23 = vmul.f32 %v2032_v29, %v4936_v53  ;;  %v5297_v29 = vpop.f32.mrf.mxu0  ;;  %v9215_v42 = vld [vmem:[#allocation42_spill] sm:$0xff] }
 0x18e   :  { %9185 = vst [vmem:[#allocation242_spill] sm:$0xff] %v5249_v39  ;;  %9186 = vst [vmem:[#allocation243_spill] sm:$0xff] %v5252_v47  ;;  %v2035_v13 = vsub.f32 %v9190_v59, %v9189_v60  ;;  %v5271_v47 = vpop.f32.mrf.mxu1  ;;  %v5290_v0 = vmul.f32 %v2033_v5, %v4981_v38  ;;  %v5293_v61 = vmul.f32 %v2033_v5, %v4986_v28  ;;  %v9206_v59 = vld [vmem:[#allocation168_spill] sm:$0xff] }
 0x18f   :  { %9187 = vst [vmem:[#allocation244_spill] sm:$0xff] %v5255_v37  ;;  %9188 = vst [vmem:[#allocation245_spill] sm:$0xff] %v5258_v20  ;;  %v9201_v37 = vld [vmem:[#allocation167_spill] sm:$0xff] }
 0x190   :  { %9191 = vst [vmem:[#allocation246_spill] sm:$0xff] %v5263_v40  ;;  %9196 = vst [vmem:[#allocation247_spill] sm:$0xff] %v5269_v32  ;;  %v5282_v40 = vmul.f32 %v2034_v55, %v4954_v12  ;;  %v9202_v20 = vld [vmem:[#allocation39_spill] sm:$0xff]  ;;  %v9212_v55 = vld [vmem:[#allocation170_spill] sm:$0xff] }
 0x191   :  { %9197 = vst [vmem:[#allocation248_spill] sm:$0xff] %v5271_v47  ;;  %9198 = vst [vmem:[#allocation249_spill] sm:$0xff] %v5276_v9  ;;  %v2037_v60 = vsub.f32 %v9202_v20, %v9201_v37  ;;  %v9207_v9 = vld [vmem:[#allocation40_spill] sm:$0xff]  ;;  %v5305_v37 = vmul.f32 %v2035_v13, %v5004_v15  ;;  %v9213_v20 = vld [vmem:[#allocation41_spill] sm:$0xff] }
 0x192   :  { %9199 = vst [vmem:[#allocation250_spill] sm:$0xff] %v5279_v23  ;;  %9200 = vst [vmem:[#allocation251_spill] sm:$0xff] %v5282_v40  ;;  %v2039_v7 = vsub.f32 %v9207_v9, %v9206_v59  ;;  %v5299_v23 = vpop.f32.mrf.mxu1  ;;  %v5302_v40 = vmul.f32 %v2035_v13, %v4991_v4  ;;  %v5315_v59 = vmul.f32 %v2036_v36, %v4871_v33  ;;  %v5322_v13 = vpop.f32.mrf.mxu0 }
 0x193   :  { %9203 = vst [vmem:[#allocation252_spill] sm:$0xff] %v5287_v18  ;;  %9204 = vst [vmem:[#allocation253_spill] sm:$0xff] %v5290_v0  ;;  %v2040_v18 = vsub.f32 %v9213_v20, %v9212_v55  ;;  %v9214_v0 = vld [vmem:[#allocation171_spill] sm:$0xff]  ;;  %v5318_v9 = vmul.f32 %v2038_v1, %v4876_v11  ;;  %v5327_v55 = vmul.f32 %v2038_v1, %v4887_v50  ;;  %v9230_v1 = vld [vmem:[#allocation46_spill] sm:$0xff] }
 0x194   :  { %9205 = vst [vmem:[#allocation254_spill] sm:$0xff] %v5293_v61  ;;  %9208 = vst [vmem:[#allocation255_spill] sm:$0xff] %v5297_v29  ;;  %v2042_v5 = vsub.f32 %v9215_v42, %v9214_v0  ;;  %v5312_v61 = vmul.f32 %v2036_v36, %v4859_v58  ;;  %v5330_v0 = vmul.f32 %v2037_v60, %v4892_v49  ;;  %v9225_v36 = vld [vmem:[#allocation177_spill] sm:$0xff]  ;;  %v5347_v25 = vpop.f32.mrf.mxu0 }
 0x195   :  { %9209 = vst [vmem:[#allocation256_spill] sm:$0xff] %v5299_v23  ;;  %9210 = vst [vmem:[#allocation257_spill] sm:$0xff] %v5302_v40  ;;  %v9219_v40 = vld [vmem:[#allocation43_spill] sm:$0xff] }
 0x196   :  { %9211 = vst [vmem:[#allocation258_spill] sm:$0xff] %v5305_v37  ;;  %9216 = vst [vmem:[#allocation259_spill] sm:$0xff] %v5312_v61  ;;  %v2041_v31 = vsub.f32 %v9219_v40, %v4965_v63  ;;  %v5324_v37 = vpop.f32.mrf.mxu1  ;;  %v5333_v61 = vmul.f32 %v2037_v60, %v4902_v10  ;;  %v5341_v63 = vmul.f32 %v2039_v7, %v4912_v51  ;;  %v9229_v40 = vld [vmem:[#allocation45_spill] sm:$0xff] }
 0x197   :  { %9217 = vst [vmem:[#allocation260_spill] sm:$0xff] %v5315_v59  ;;  %9218 = vst [vmem:[#allocation261_spill] sm:$0xff] %v5318_v9  ;;  %v9226_v59 = vld [vmem:[#allocation44_spill] sm:$0xff]  ;;  %v5338_v9 = vmul.f32 %v2039_v7, %v4907_v14  ;;  %v2044_v20 = vsub.f32 %v9229_v40, %v5008_v19  ;;  %v5352_v60 = vmul.f32 %v2040_v18, %v4931_v54  ;;  %v9236_v7 = vld [vmem:[#allocation47_spill] sm:$0xff] }
 0x198   :  { %9220 = vst [vmem:[#allocation262_spill] sm:$0xff] %v5322_v13  ;;  %9221 = vst [vmem:[#allocation263_spill] sm:$0xff] %v5324_v37  ;;  %v2043_v42 = vsub.f32 %v9226_v59, %v9225_v36  ;;  %v5363_v36 = vmul.f32 %v2042_v5, %v4959_v43  ;;  %v5369_v19 = vmul.f32 %v2041_v31, %v4986_v28 }
 0x199   :  { %9222 = vst [vmem:[#allocation264_spill] sm:$0xff] %v5327_v55  ;;  %9223 = vst [vmem:[#allocation265_spill] sm:$0xff] %v5330_v0  ;;  %v2046_v55 = vsub.f32 %v9230_v1, %v5010_v52  ;;  %v5349_v0 = vpop.f32.mrf.mxu1  ;;  %v5366_v52 = vmul.f32 %v2041_v31, %v4981_v38 }
 0x19a   :  { %9224 = vst [vmem:[#allocation266_spill] sm:$0xff] %v5333_v61  ;;  %9227 = vst [vmem:[#allocation267_spill] sm:$0xff] %v5338_v9  ;;  %v5355_v61 = vmul.f32 %v2040_v18, %v4936_v53  ;;  %v5358_v9 = vmul.f32 %v2042_v5, %v4954_v12  ;;  %v5373_v18 = vpop.f32.mrf.mxu0  ;;  %v9245_v5 = vld [vmem:[#allocation49_spill] sm:$0xff] }
 0x19b   :  { %9228 = vst [vmem:[#allocation268_spill] sm:$0xff] %v5341_v63  ;;  %9231 = vst [vmem:[#allocation45_spill] sm:$0xff] %v5347_v25  ;;  %v2045_v63 = vsub.f32 %v9236_v7, %v5038_v45  ;;  %v5381_v45 = vmul.f32 %v2043_v42, %v5004_v15  ;;  %v2048_v7 = vsub.f32 %v9245_v5, %v5060_v8 }
 0x19c   :  { %9232 = vst [vmem:[#allocation46_spill] sm:$0xff] %v5349_v0  ;;  %9233 = vst [vmem:[#allocation269_spill] sm:$0xff] %v5352_v60  ;;  %v9240_v60 = vld [vmem:[#allocation48_spill] sm:$0xff]  ;;  %v5403_v8 = vmul.f32 %v2046_v55, %v4887_v50 }
 0x19d   :  { %9234 = vst [vmem:[#allocation270_spill] sm:$0xff] %v5355_v61  ;;  %9235 = vst [vmem:[#allocation271_spill] sm:$0xff] %v5358_v9  ;;  %v2047_v59 = vsub.f32 %v9240_v60, %v5040_v24  ;;  %v5375_v61 = vpop.f32.mrf.mxu1  ;;  %v5378_v9 = vmul.f32 %v2043_v42, %v4991_v4  ;;  %v5391_v24 = vmul.f32 %v2044_v20, %v4871_v33  ;;  %v5398_v42 = vpop.f32.mrf.mxu0 }
 0x19e   :  { %9237 = vst [vmem:[#allocation272_spill] sm:$0xff] %v5363_v36  ;;  %9238 = vst [vmem:[#allocation273_spill] sm:$0xff] %v5366_v52  ;;  %v9246_v52 = vld [vmem:[#allocation50_spill] sm:$0xff]  ;;  %v5394_v60 = vmul.f32 %v2046_v55, %v4876_v11 }
 0x19f   :  { %9239 = vst [vmem:[#allocation274_spill] sm:$0xff] %v5369_v19  ;;  %9241 = vst [vmem:[#allocation275_spill] sm:$0xff] %v5373_v18  ;;  %v2050_v31 = vsub.f32 %v9246_v52, %v5062_v48  ;;  %v5388_v19 = vmul.f32 %v2044_v20, %v4859_v58  ;;  %v5406_v48 = vmul.f32 %v2045_v63, %v4892_v49  ;;  %v9256_v20 = vld [vmem:[#allocation52_spill] sm:$0xff]  ;;  %v9260_v55 = vld [vmem:[#allocation54_spill] sm:$0xff]  ;;  %v5423_v5 = vpop.f32.mrf.mxu0 }
 0x1a0   :  { %9242 = vst [vmem:[#allocation276_spill] sm:$0xff] %v5375_v61  ;;  %9243 = vst [vmem:[#allocation277_spill] sm:$0xff] %v5378_v9  ;;  %v9250_v9 = vld [vmem:[#allocation51_spill] sm:$0xff] }
 0x1a1   :  { %9244 = vst [vmem:[#allocation278_spill] sm:$0xff] %v5381_v45  ;;  %9247 = vst [vmem:[#allocation279_spill] sm:$0xff] %v5388_v19  ;;  %v2049_v36 = vsub.f32 %v9250_v9, %v5090_v3  ;;  %v5400_v45 = vpop.f32.mrf.mxu1  ;;  %v5409_v19 = vmul.f32 %v2045_v63, %v4902_v10  ;;  %v5417_v3 = vmul.f32 %v2047_v59, %v4912_v51  ;;  %v9259_v9 = vld [vmem:[#allocation53_spill] sm:$0xff] }
 0x1a2   :  { %9248 = vst [vmem:[#allocation280_spill] sm:$0xff] %v5391_v24  ;;  %9249 = vst [vmem:[#allocation281_spill] sm:$0xff] %v5394_v60  ;;  %v2051_v24 = vsub.f32 %v9256_v20, %v5092_v30  ;;  %v5414_v60 = vmul.f32 %v2047_v59, %v4907_v14  ;;  %v2052_v52 = vsub.f32 %v9259_v9, %v5113_v2  ;;  %v9266_v59 = vld [vmem:[#allocation55_spill] sm:$0xff] }
 0x1a3   :  { %9251 = vst [vmem:[#allocation282_spill] sm:$0xff] %v5398_v42  ;;  %9252 = vst [vmem:[#allocation283_spill] sm:$0xff] %v5400_v45  ;;  %v5428_v63 = vmul.f32 %v2048_v7, %v4931_v54  ;;  %v5439_v30 = vmul.f32 %v2050_v31, %v4959_v43  ;;  %v5445_v2 = vmul.f32 %v2049_v36, %v4986_v28 }
 0x1a4   :  { %9253 = vst [vmem:[#allocation284_spill] sm:$0xff] %v5403_v8  ;;  %9254 = vst [vmem:[#allocation285_spill] sm:$0xff] %v5406_v48  ;;  %v2054_v8 = vsub.f32 %v9260_v55, %v5115_v6  ;;  %v5425_v48 = vpop.f32.mrf.mxu1  ;;  %v5442_v6 = vmul.f32 %v2049_v36, %v4981_v38 }
 0x1a5   :  { %9255 = vst [vmem:[#allocation286_spill] sm:$0xff] %v5409_v19  ;;  %9257 = vst [vmem:[#allocation287_spill] sm:$0xff] %v5414_v60  ;;  %v5431_v19 = vmul.f32 %v2048_v7, %v4936_v53  ;;  %v5434_v60 = vmul.f32 %v2050_v31, %v4954_v12  ;;  %v5449_v7 = vpop.f32.mrf.mxu0  ;;  %v9275_v31 = vld [vmem:[#allocation57_spill] sm:$0xff] }
 0x1a6   :  { %9258 = vst [vmem:[#allocation288_spill] sm:$0xff] %v5417_v3  ;;  %9261 = vst [vmem:[#allocation53_spill] sm:$0xff] %v5423_v5  ;;  %v2053_v3 = vsub.f32 %v9266_v59, %v5142_v46  ;;  %v5457_v46 = vmul.f32 %v2051_v24, %v5004_v15  ;;  %v2056_v59 = vsub.f32 %v9275_v31, %v5165_v44 }
 0x1a7   :  { %9262 = vst [vmem:[#allocation54_spill] sm:$0xff] %v5425_v48  ;;  %9263 = vst [vmem:[#allocation289_spill] sm:$0xff] %v5428_v63  ;;  %v9270_v63 = vld [vmem:[#allocation56_spill] sm:$0xff]  ;;  %v5479_v44 = vmul.f32 %v2054_v8, %v4887_v50 }
 0x1a8   :  { %9264 = vst [vmem:[#allocation290_spill] sm:$0xff] %v5431_v19  ;;  %9265 = vst [vmem:[#allocation291_spill] sm:$0xff] %v5434_v60  ;;  %v2055_v20 = vsub.f32 %v9270_v63, %v5144_v62  ;;  %v5451_v19 = vpop.f32.mrf.mxu1  ;;  %v5454_v60 = vmul.f32 %v2051_v24, %v4991_v4  ;;  %v5467_v62 = vmul.f32 %v2052_v52, %v4871_v33  ;;  %v5474_v24 = vpop.f32.mrf.mxu0 }
 0x1a9   :  { %9267 = vst [vmem:[#allocation292_spill] sm:$0xff] %v5439_v30  ;;  %9268 = vst [vmem:[#allocation293_spill] sm:$0xff] %v5442_v6  ;;  %v9276_v6 = vld [vmem:[#allocation58_spill] sm:$0xff]  ;;  %v5470_v63 = vmul.f32 %v2054_v8, %v4876_v11 }
 0x1aa   :  { %9269 = vst [vmem:[#allocation294_spill] sm:$0xff] %v5445_v2  ;;  %9271 = vst [vmem:[#allocation295_spill] sm:$0xff] %v5449_v7  ;;  %v2058_v36 = vsub.f32 %v9276_v6, %v5167_v35  ;;  %v5464_v2 = vmul.f32 %v2052_v52, %v4859_v58  ;;  %v5482_v35 = vmul.f32 %v2053_v3, %v4892_v49  ;;  %v9286_v52 = vld [vmem:[#allocation60_spill] sm:$0xff]  ;;  %v9290_v8 = vld [vmem:[#allocation62_spill] sm:$0xff]  ;;  %v5499_v31 = vpop.f32.mrf.mxu0 }
 0x1ab   :  { %9272 = vst [vmem:[#allocation296_spill] sm:$0xff] %v5451_v19  ;;  %9273 = vst [vmem:[#allocation297_spill] sm:$0xff] %v5454_v60  ;;  %v9280_v60 = vld [vmem:[#allocation59_spill] sm:$0xff] }
 0x1ac   :  { %9274 = vst [vmem:[#allocation298_spill] sm:$0xff] %v5457_v46  ;;  %9277 = vst [vmem:[#allocation299_spill] sm:$0xff] %v5464_v2  ;;  %v2057_v30 = vsub.f32 %v9280_v60, %v5195_v57  ;;  %v5476_v46 = vpop.f32.mrf.mxu1  ;;  %v5485_v2 = vmul.f32 %v2053_v3, %v4902_v10  ;;  %v5493_v57 = vmul.f32 %v2055_v20, %v4912_v51  ;;  %v9289_v60 = vld [vmem:[#allocation61_spill] sm:$0xff] }
 0x1ad   :  { %9278 = vst [vmem:[#allocation300_spill] sm:$0xff] %v5467_v62  ;;  %9279 = vst [vmem:[#allocation301_spill] sm:$0xff] %v5470_v63  ;;  %v2059_v62 = vsub.f32 %v9286_v52, %v5197_v34  ;;  %v5490_v63 = vmul.f32 %v2055_v20, %v4907_v14  ;;  %v2060_v6 = vsub.f32 %v9289_v60, %v5218_v17  ;;  %v9296_v20 = vld [vmem:[#allocation63_spill] sm:$0xff]  ;;  %v9298_v17 = vld [vmem:[#allocation64_spill] sm:$0xff] }
 0x1ae   :  { %9281 = vst [vmem:[#allocation302_spill] sm:$0xff] %v5474_v24  ;;  %9282 = vst [vmem:[#allocation303_spill] sm:$0xff] %v5476_v46  ;;  %v5504_v3 = vmul.f32 %v2056_v59, %v4931_v54  ;;  %v5515_v34 = vmul.f32 %v2058_v36, %v4959_v43  ;;  %v2063_v52 = vsub.f32 %v9298_v17, %v5249_v39 }
 0x1af   :  { %9283 = vst [vmem:[#allocation304_spill] sm:$0xff] %v5479_v44  ;;  %9284 = vst [vmem:[#allocation305_spill] sm:$0xff] %v5482_v35  ;;  %v2062_v44 = vsub.f32 %v9290_v8, %v5220_v56  ;;  %v5501_v35 = vpop.f32.mrf.mxu1  ;;  %v5518_v56 = vmul.f32 %v2057_v30, %v4981_v38  ;;  %v5540_v39 = vmul.f32 %v2060_v6, %v4859_v58 }
 0x1b0   :  { %9285 = vst [vmem:[#allocation306_spill] sm:$0xff] %v5485_v2  ;;  %9287 = vst [vmem:[#allocation307_spill] sm:$0xff] %v5490_v63  ;;  %v5507_v2 = vmul.f32 %v2056_v59, %v4936_v53  ;;  %v5510_v63 = vmul.f32 %v2058_v36, %v4954_v12  ;;  %v5524_v59 = vpop.f32.mrf.mxu0  ;;  %v5535_v36 = vmul.f32 %v2059_v62, %v5004_v15 }
 0x1b1   :  { %9288 = vst [vmem:[#allocation308_spill] sm:$0xff] %v5493_v57  ;;  %9291 = vst [vmem:[#allocation61_spill] sm:$0xff] %v5499_v31  ;;  %v2061_v57 = vsub.f32 %v9296_v20, %v5247_v41  ;;  %v5532_v41 = vmul.f32 %v2059_v62, %v4991_v4  ;;  %v5543_v17 = vmul.f32 %v2060_v6, %v4871_v33  ;;  %v9315_v6 = vld [vmem:[#allocation68_spill] sm:$0xff] }
 0x1b2   :  { %9292 = vst [vmem:[#allocation309_spill] sm:$0xff] %v5501_v35  ;;  %9293 = vst [vmem:[#allocation310_spill] sm:$0xff] %v5504_v3  ;;  %v9299_v3 = vld [vmem:[#allocation65_spill] sm:$0xff]  ;;  %v5555_v62 = vmul.f32 %v2062_v44, %v4887_v50 }
 0x1b3   :  { %9294 = vst [vmem:[#allocation311_spill] sm:$0xff] %v5507_v2  ;;  %9295 = vst [vmem:[#allocation312_spill] sm:$0xff] %v5510_v63  ;;  %v2064_v8 = vsub.f32 %v9299_v3, %v5269_v32  ;;  %v5526_v2 = vpop.f32.mrf.mxu1  ;;  %v5529_v63 = vmul.f32 %v2057_v30, %v4986_v28  ;;  %v5546_v32 = vmul.f32 %v2062_v44, %v4876_v11  ;;  %v9309_v30 = vld [vmem:[#allocation67_spill] sm:$0xff]  ;;  %v5550_v3 = vpop.f32.mrf.mxu0  ;;  %v9319_v44 = vld [vmem:[#allocation69_spill] sm:$0xff] }
 0x1b4   :  { %9297 = vst [vmem:[#allocation313_spill] sm:$0xff] %v5518_v56  ;;  %9300 = vst [vmem:[#allocation314_spill] sm:$0xff] %v5524_v59  ;;  %v9305_v56 = vld [vmem:[#allocation66_spill] sm:$0xff] }
 0x1b5   :  { %9301 = vst [vmem:[#allocation315_spill] sm:$0xff] %v5526_v2  ;;  %9302 = vst [vmem:[#allocation316_spill] sm:$0xff] %v5529_v63  ;;  %v2066_v20 = vsub.f32 %v9305_v56, %v5271_v47  ;;  %v2065_v63 = vsub.f32 %v9309_v30, %v5297_v29  ;;  %v2067_v47 = vsub.f32 %v9315_v6, %v5299_v23 }
 0x1b6   :  { %9303 = vst [vmem:[#allocation317_spill] sm:$0xff] %v5532_v41  ;;  %9304 = vst [vmem:[#allocation318_spill] sm:$0xff] %v5535_v36  ;;  %v5552_v41 = vpop.f32.mrf.mxu1  ;;  %v5558_v36 = vmul.f32 %v2061_v57, %v4892_v49  ;;  %v5569_v29 = vmul.f32 %v2063_v52, %v4912_v51  ;;  %v5572_v30 = vmul.f32 %v2064_v8, %v4931_v54 }
 0x1b7   :  { %9306 = vst [vmem:[#allocation66_spill] sm:$0xff] %v5540_v39  ;;  %9307 = vst [vmem:[#allocation319_spill] sm:$0xff] %v5543_v17  ;;  %v5561_v39 = vmul.f32 %v2061_v57, %v4902_v10  ;;  %v5576_v17 = vpop.f32.mrf.mxu0  ;;  %v5581_v57 = vmul.f32 %v2064_v8, %v4936_v53  ;;  %v5593_v23 = vmul.f32 %v2066_v20, %v4959_v43 }
 0x1b8   :  { %9308 = vst [vmem:[#allocation320_spill] sm:$0xff] %v5546_v32  ;;  %9310 = vst [vmem:[#allocation321_spill] sm:$0xff] %v5550_v3  ;;  %v5566_v32 = vmul.f32 %v2063_v52, %v4907_v14 }
 0x1b9   :  { %9311 = vst [vmem:[#allocation322_spill] sm:$0xff] %v5552_v41  ;;  %9312 = vst [vmem:[#allocation323_spill] sm:$0xff] %v5555_v62  ;;  %v2068_v62 = vsub.f32 %v9319_v44, %v5322_v13  ;;  %v5596_v13 = vmul.f32 %v2065_v63, %v4981_v38  ;;  %v9329_v44 = vld [vmem:[#allocation72_spill] sm:$0xff]  ;;  %v5604_v6 = vpop.f32.mrf.mxu0 }
 0x1ba   :  { %9313 = vst [vmem:[#allocation324_spill] sm:$0xff] %v5558_v36  ;;  %9314 = vst [vmem:[#allocation325_spill] sm:$0xff] %v5561_v39  ;;  %v5578_v36 = vpop.f32.mrf.mxu1  ;;  %v5584_v39 = vmul.f32 %v2066_v20, %v4954_v12  ;;  %v5600_v8 = vsub.f32 %v9329_v44, %v5349_v0  ;;  %v5612_v20 = vmul.f32 %v2067_v47, %v4991_v4 }
 0x1bb   :  { %9316 = vst [vmem:[#allocation326_spill] sm:$0xff] %v5566_v32  ;;  %9317 = vst [vmem:[#allocation327_spill] sm:$0xff] %v5569_v29  ;;  %v9324_v32 = vld [vmem:[#allocation70_spill] sm:$0xff]  ;;  %v9326_v29 = vld [vmem:[#allocation71_spill] sm:$0xff]  ;;  %v5620_v44 = vmul.f32 %v2068_v62, %v4859_v58 }
 0x1bc   :  { %9318 = vst [vmem:[#allocation328_spill] sm:$0xff] %v5572_v30  ;;  %9320 = vst [vmem:[#allocation329_spill] sm:$0xff] %v5576_v17  ;;  %v5588_v52 = vsub.f32 %v9324_v32, %v5324_v37  ;;  %v2069_v30 = vsub.f32 %v9326_v29, %v5347_v25  ;;  %v5606_v37 = vpop.f32.mrf.mxu1  ;;  %v5609_v32 = vmul.f32 %v2065_v63, %v4986_v28  ;;  %v9340_v63 = vld [vmem:[#allocation76_spill] sm:$0xff] }
 0x1bd   :  { %9321 = vst [vmem:[#allocation330_spill] sm:$0xff] %v5578_v36  ;;  %9322 = vst [vmem:[#allocation331_spill] sm:$0xff] %v5581_v57  ;;  %v9331_v57 = vld [vmem:[#allocation73_spill] sm:$0xff]  ;;  %v5615_v25 = vmul.f32 %v2067_v47, %v5004_v15 }
 0x1be   :  { %9323 = vst [vmem:[#allocation332_spill] sm:$0xff] %v5584_v39  ;;  %9325 = vst [vmem:[#allocation333_spill] sm:$0xff] %v5588_v52  ;;  %v2072_v39 = vsub.f32 %v9331_v57, %v5373_v18  ;;  %v5623_v18 = vmul.f32 %v2068_v62, %v4871_v33  ;;  %v9339_v57 = vld [vmem:[#allocation75_spill] sm:$0xff]  ;;  %v5635_v47 = vmul.f32 %v5588_v52, %v4887_v50  ;;  %v9349_v52 = vld [vmem:[#allocation78_spill] sm:$0xff] }
 0x1bf   :  { %9327 = vst [vmem:[#allocation334_spill] sm:$0xff] %v5593_v23  ;;  %9328 = vst [vmem:[#allocation335_spill] sm:$0xff] %v5596_v13  ;;  %v9337_v13 = vld [vmem:[#allocation74_spill] sm:$0xff]  ;;  %v2073_v29 = vsub.f32 %v9339_v57, %v5398_v42  ;;  %v5629_v23 = vpop.f32.mrf.mxu0  ;;  %v5641_v62 = vmul.f32 %v2069_v30, %v4902_v10 }
 0x1c0   :  { %9330 = vst [vmem:[#allocation336_spill] sm:$0xff] %v5600_v8  ;;  %9332 = vst [vmem:[#allocation337_spill] sm:$0xff] %v5604_v6  ;;  %v2074_v0 = vsub.f32 %v9337_v13, %v5375_v61  ;;  %v5653_v57 = vmul.f32 %v2072_v39, %v4936_v53  ;;  %v2078_v61 = vsub.f32 %v9349_v52, %v5425_v48 }
 0x1c1   :  { %9333 = vst [vmem:[#allocation338_spill] sm:$0xff] %v5606_v37  ;;  %9334 = vst [vmem:[#allocation339_spill] sm:$0xff] %v5609_v32  ;;  %v2075_v32 = vsub.f32 %v9340_v63, %v5400_v45  ;;  %v5647_v45 = vmul.f32 %v5600_v8, %v4912_v51  ;;  %v5650_v63 = vmul.f32 %v2072_v39, %v4931_v54  ;;  %v9354_v8 = vld [vmem:[#allocation79_spill] sm:$0xff] }
 0x1c2   :  { %9335 = vst [vmem:[#allocation340_spill] sm:$0xff] %v5612_v20  ;;  %9336 = vst [vmem:[#allocation341_spill] sm:$0xff] %v5615_v25  ;;  %v5631_v20 = vpop.f32.mrf.mxu1  ;;  %v5638_v25 = vmul.f32 %v2069_v30, %v4892_v49  ;;  %v5675_v48 = vmul.f32 %v2073_v29, %v4986_v28 }
 0x1c3   :  { %9338 = vst [vmem:[#allocation74_spill] sm:$0xff] %v5620_v44  ;;  %9341 = vst [vmem:[#allocation342_spill] sm:$0xff] %v5629_v23  ;;  %v9345_v44 = vld [vmem:[#allocation77_spill] sm:$0xff]  ;;  %v5678_v52 = vmul.f32 %v2075_v32, %v4991_v4 }
 0x1c4   :  { %9342 = vst [vmem:[#allocation343_spill] sm:$0xff] %v5631_v20  ;;  %9343 = vst [vmem:[#allocation344_spill] sm:$0xff] %v5638_v25  ;;  %v2076_v42 = vsub.f32 %v9345_v44, %v5423_v5  ;;  %v5657_v25 = vpop.f32.mrf.mxu0  ;;  %v5659_v30 = vpop.f32.mrf.mxu1  ;;  %v5665_v5 = vmul.f32 %v2074_v0, %v4959_v43 }
 0x1c5   :  { %9344 = vst [vmem:[#allocation345_spill] sm:$0xff] %v5641_v62  ;;  %9346 = vst [vmem:[#allocation346_spill] sm:$0xff] %v5647_v45  ;;  %v5662_v62 = vmul.f32 %v2074_v0, %v4954_v12  ;;  %v2077_v45 = vsub.f32 %v9354_v8, %v5449_v7  ;;  %v5687_v7 = vmul.f32 %v2075_v32, %v5004_v15  ;;  %v9368_v32 = vld [vmem:[#allocation84_spill] sm:$0xff] }
 0x1c6   :  { %9347 = vst [vmem:[#allocation347_spill] sm:$0xff] %v5650_v63  ;;  %9348 = vst [vmem:[#allocation348_spill] sm:$0xff] %v5653_v57  ;;  %v9355_v63 = vld [vmem:[#allocation80_spill] sm:$0xff]  ;;  %v5672_v57 = vmul.f32 %v2073_v29, %v4981_v38  ;;  %v5682_v0 = vpop.f32.mrf.mxu0  ;;  %v9364_v29 = vld [vmem:[#allocation82_spill] sm:$0xff] }
 0x1c7   :  { %9350 = vst [vmem:[#allocation349_spill] sm:$0xff] %v5657_v25  ;;  %9351 = vst [vmem:[#allocation350_spill] sm:$0xff] %v5659_v30  ;;  %v2079_v39 = vsub.f32 %v9355_v63, %v5451_v19  ;;  %v5690_v19 = vmul.f32 %v2076_v42, %v4859_v58 }
 0x1c8   :  { %9352 = vst [vmem:[#allocation351_spill] sm:$0xff] %v5662_v62  ;;  %9353 = vst [vmem:[#allocation352_spill] sm:$0xff] %v5665_v5  ;;  %v9359_v62 = vld [vmem:[#allocation81_spill] sm:$0xff]  ;;  %v5684_v5 = vpop.f32.mrf.mxu1  ;;  %v5707_v8 = vpop.f32.mrf.mxu0 }
 0x1c9   :  { %9356 = vst [vmem:[#allocation353_spill] sm:$0xff] %v5672_v57  ;;  %9357 = vst [vmem:[#allocation354_spill] sm:$0xff] %v5675_v48  ;;  %v2080_v44 = vsub.f32 %v9359_v62, %v5474_v24  ;;  %v5693_v57 = vmul.f32 %v2076_v42, %v4871_v33  ;;  %v2082_v48 = vsub.f32 %v9364_v29, %v5476_v46  ;;  %v9367_v62 = vld [vmem:[#allocation83_spill] sm:$0xff] }
 0x1ca   :  { %9358 = vst [vmem:[#allocation355_spill] sm:$0xff] %v5678_v52  ;;  %9360 = vst [vmem:[#allocation356_spill] sm:$0xff] %v5682_v0  ;;  %v5698_v52 = vmul.f32 %v2078_v61, %v4876_v11  ;;  %v5701_v24 = vmul.f32 %v2078_v61, %v4887_v50  ;;  %v2081_v63 = vsub.f32 %v9367_v62, %v5499_v31  ;;  %v9374_v61 = vld [vmem:[#allocation85_spill] sm:$0xff] }
 0x1cb   :  { %9361 = vst [vmem:[#allocation357_spill] sm:$0xff] %v5684_v5  ;;  %9362 = vst [vmem:[#allocation358_spill] sm:$0xff] %v5687_v7  ;;  %v2083_v7 = vsub.f32 %v9368_v32, %v5501_v35  ;;  %v5712_v42 = vmul.f32 %v2077_v45, %v4892_v49  ;;  %v5715_v46 = vmul.f32 %v2077_v45, %v4902_v10  ;;  %v5733_v45 = vpop.f32.mrf.mxu0 }
 0x1cc   :  { %9363 = vst [vmem:[#allocation359_spill] sm:$0xff] %v5690_v19  ;;  %9365 = vst [vmem:[#allocation360_spill] sm:$0xff] %v5698_v52  ;;  %v5709_v19 = vpop.f32.mrf.mxu1  ;;  %v5718_v52 = vmul.f32 %v2079_v39, %v4907_v14  ;;  %v2084_v29 = vsub.f32 %v9374_v61, %v5524_v59  ;;  %v5723_v31 = vmul.f32 %v2079_v39, %v4912_v51  ;;  %v9383_v39 = vld [vmem:[#allocation87_spill] sm:$0xff] }
 0x1cd   :  { %9366 = vst [vmem:[#allocation361_spill] sm:$0xff] %v5701_v24  ;;  %9369 = vst [vmem:[#allocation362_spill] sm:$0xff] %v5707_v8  ;;  %v5726_v35 = vmul.f32 %v2080_v44, %v4931_v54  ;;  %v5729_v32 = vmul.f32 %v2080_v44, %v4936_v53  ;;  %v5741_v59 = vmul.f32 %v2082_v48, %v4959_v43  ;;  %v9725_v24 = vld [vmem:[#allocation171_spill] sm:$0xff] }
 0x1ce   :  { %9370 = vst [vmem:[#allocation363_spill] sm:$0xff] %v5709_v19  ;;  %9371 = vst [vmem:[#allocation364_spill] sm:$0xff] %v5712_v42  ;;  %v9378_v42 = vld [vmem:[#allocation86_spill] sm:$0xff] }
 0x1cf   :  { %9372 = vst [vmem:[#allocation365_spill] sm:$0xff] %v5715_v46  ;;  %9373 = vst [vmem:[#allocation366_spill] sm:$0xff] %v5718_v52  ;;  %v2086_v62 = vsub.f32 %v9378_v42, %v5526_v2  ;;  %v5735_v46 = vpop.f32.mrf.mxu1  ;;  %v5738_v52 = vmul.f32 %v2082_v48, %v4954_v12  ;;  %v5751_v2 = vmul.f32 %v2081_v63, %v4986_v28  ;;  %v5758_v48 = vpop.f32.mrf.mxu0 }
 0x1d0   :  { %9375 = vst [vmem:[#allocation367_spill] sm:$0xff] %v5723_v31  ;;  %9376 = vst [vmem:[#allocation368_spill] sm:$0xff] %v5726_v35  ;;  %v2085_v31 = vsub.f32 %v9383_v39, %v5550_v3  ;;  %v9384_v35 = vld [vmem:[#allocation88_spill] sm:$0xff]  ;;  %v5754_v42 = vmul.f32 %v2083_v7, %v4991_v4  ;;  %v5763_v3 = vmul.f32 %v2083_v7, %v5004_v15 }
 0x1d1   :  { %9377 = vst [vmem:[#allocation369_spill] sm:$0xff] %v5729_v32  ;;  %9379 = vst [vmem:[#allocation370_spill] sm:$0xff] %v5733_v45  ;;  %v2087_v44 = vsub.f32 %v9384_v35, %v5552_v41  ;;  %v5748_v32 = vmul.f32 %v2081_v63, %v4981_v38  ;;  %v5766_v41 = vmul.f32 %v2084_v29, %v4859_v58  ;;  %v9394_v63 = vld [vmem:[#allocation90_spill] sm:$0xff]  ;;  %v9398_v7 = vld [vmem:[#allocation92_spill] sm:$0xff]  ;;  %v5783_v39 = vpop.f32.mrf.mxu0 }
 0x1d2   :  { %9380 = vst [vmem:[#allocation371_spill] sm:$0xff] %v5735_v46  ;;  %9381 = vst [vmem:[#allocation372_spill] sm:$0xff] %v5738_v52  ;;  %v9388_v52 = vld [vmem:[#allocation89_spill] sm:$0xff] }
 0x1d3   :  { %9382 = vst [vmem:[#allocation373_spill] sm:$0xff] %v5741_v59  ;;  %9385 = vst [vmem:[#allocation374_spill] sm:$0xff] %v5748_v32  ;;  %v2088_v61 = vsub.f32 %v9388_v52, %v5576_v17  ;;  %v5760_v59 = vpop.f32.mrf.mxu1  ;;  %v5769_v32 = vmul.f32 %v2084_v29, %v4871_v33  ;;  %v5777_v17 = vmul.f32 %v2086_v62, %v4887_v50  ;;  %v9397_v52 = vld [vmem:[#allocation91_spill] sm:$0xff] }
 0x1d4   :  { %9386 = vst [vmem:[#allocation375_spill] sm:$0xff] %v5751_v2  ;;  %9387 = vst [vmem:[#allocation376_spill] sm:$0xff] %v5754_v42  ;;  %v2090_v2 = vsub.f32 %v9394_v63, %v5578_v36  ;;  %v5774_v42 = vmul.f32 %v2086_v62, %v4876_v11  ;;  %v2089_v35 = vsub.f32 %v9397_v52, %v5604_v6  ;;  %v9404_v62 = vld [vmem:[#allocation93_spill] sm:$0xff] }
 0x1d5   :  { %9389 = vst [vmem:[#allocation377_spill] sm:$0xff] %v5758_v48  ;;  %9390 = vst [vmem:[#allocation378_spill] sm:$0xff] %v5760_v59  ;;  %v5788_v29 = vmul.f32 %v2085_v31, %v4892_v49  ;;  %v5791_v36 = vmul.f32 %v2085_v31, %v4902_v10  ;;  %v2092_v63 = vsub.f32 %v9404_v62, %v5629_v23  ;;  %v5809_v31 = vpop.f32.mrf.mxu0 }
 0x1d6   :  { %9391 = vst [vmem:[#allocation379_spill] sm:$0xff] %v5763_v3  ;;  %9392 = vst [vmem:[#allocation380_spill] sm:$0xff] %v5766_v41  ;;  %v2091_v3 = vsub.f32 %v9398_v7, %v5606_v37  ;;  %v5785_v41 = vpop.f32.mrf.mxu1  ;;  %v5799_v6 = vmul.f32 %v2087_v44, %v4912_v51  ;;  %v5802_v37 = vmul.f32 %v2088_v61, %v4931_v54 }
 0x1d7   :  { %9393 = vst [vmem:[#allocation381_spill] sm:$0xff] %v5769_v32  ;;  %9395 = vst [vmem:[#allocation382_spill] sm:$0xff] %v5774_v42  ;;  %v5794_v42 = vmul.f32 %v2087_v44, %v4907_v14  ;;  %v5805_v7 = vmul.f32 %v2088_v61, %v4936_v53  ;;  %v5817_v23 = vmul.f32 %v2090_v2, %v4959_v43  ;;  %v9413_v44 = vld [vmem:[#allocation95_spill] sm:$0xff] }
 0x1d8   :  { %9396 = vst [vmem:[#allocation383_spill] sm:$0xff] %v5777_v17  ;;  %9399 = vst [vmem:[#allocation384_spill] sm:$0xff] %v5783_v39  ;;  %v9662_v17 = vld [vmem:[#allocation226_spill] sm:$0xff] }
 0x1d9   :  { %9400 = vst [vmem:[#allocation385_spill] sm:$0xff] %v5785_v41  ;;  %9401 = vst [vmem:[#allocation386_spill] sm:$0xff] %v5788_v29  ;;  %v9408_v29 = vld [vmem:[#allocation94_spill] sm:$0xff] }
 0x1da   :  { %9402 = vst [vmem:[#allocation387_spill] sm:$0xff] %v5791_v36  ;;  %9403 = vst [vmem:[#allocation388_spill] sm:$0xff] %v5794_v42  ;;  %v2094_v52 = vsub.f32 %v9408_v29, %v5631_v20  ;;  %v5811_v36 = vpop.f32.mrf.mxu1  ;;  %v5814_v42 = vmul.f32 %v2090_v2, %v4954_v12  ;;  %v5827_v20 = vmul.f32 %v2089_v35, %v4986_v28  ;;  %v5834_v2 = vpop.f32.mrf.mxu0 }
 0x1db   :  { %9405 = vst [vmem:[#allocation389_spill] sm:$0xff] %v5799_v6  ;;  %9406 = vst [vmem:[#allocation390_spill] sm:$0xff] %v5802_v37  ;;  %v2093_v6 = vsub.f32 %v9413_v44, %v5657_v25  ;;  %v9414_v37 = vld [vmem:[#allocation96_spill] sm:$0xff]  ;;  %v5830_v29 = vmul.f32 %v2091_v3, %v4991_v4  ;;  %v5839_v25 = vmul.f32 %v2091_v3, %v5004_v15 }
 0x1dc   :  { %9407 = vst [vmem:[#allocation391_spill] sm:$0xff] %v5805_v7  ;;  %9409 = vst [vmem:[#allocation392_spill] sm:$0xff] %v5809_v31  ;;  %v2095_v61 = vsub.f32 %v9414_v37, %v5659_v30  ;;  %v5824_v7 = vmul.f32 %v2089_v35, %v4981_v38  ;;  %v5842_v30 = vmul.f32 %v2092_v63, %v4859_v58  ;;  %v9424_v35 = vld [vmem:[#allocation98_spill] sm:$0xff]  ;;  %v9428_v3 = vld [vmem:[#allocation100_spill] sm:$0xff]  ;;  %v5859_v44 = vpop.f32.mrf.mxu0 }
 0x1dd   :  { %9410 = vst [vmem:[#allocation393_spill] sm:$0xff] %v5811_v36  ;;  %9411 = vst [vmem:[#allocation394_spill] sm:$0xff] %v5814_v42  ;;  %v9418_v42 = vld [vmem:[#allocation97_spill] sm:$0xff] }
 0x1de   :  { %9412 = vst [vmem:[#allocation395_spill] sm:$0xff] %v5817_v23  ;;  %9415 = vst [vmem:[#allocation396_spill] sm:$0xff] %v5824_v7  ;;  %v2096_v62 = vsub.f32 %v9418_v42, %v5682_v0  ;;  %v5836_v23 = vpop.f32.mrf.mxu1  ;;  %v5845_v7 = vmul.f32 %v2092_v63, %v4871_v33  ;;  %v5853_v0 = vmul.f32 %v2094_v52, %v4887_v50  ;;  %v9427_v42 = vld [vmem:[#allocation99_spill] sm:$0xff] }
 0x1df   :  { %9416 = vst [vmem:[#allocation397_spill] sm:$0xff] %v5827_v20  ;;  %9417 = vst [vmem:[#allocation398_spill] sm:$0xff] %v5830_v29  ;;  %v2098_v20 = vsub.f32 %v9424_v35, %v5684_v5  ;;  %v5850_v29 = vmul.f32 %v2094_v52, %v4876_v11  ;;  %v2097_v37 = vsub.f32 %v9427_v42, %v5707_v8  ;;  %v9434_v52 = vld [vmem:[#allocation101_spill] sm:$0xff] }
 0x1e0   :  { %9419 = vst [vmem:[#allocation399_spill] sm:$0xff] %v5834_v2  ;;  %9420 = vst [vmem:[#allocation400_spill] sm:$0xff] %v5836_v23  ;;  %v5864_v63 = vmul.f32 %v2093_v6, %v4892_v49  ;;  %v5867_v5 = vmul.f32 %v2093_v6, %v4902_v10  ;;  %v2100_v35 = vsub.f32 %v9434_v52, %v5733_v45  ;;  %v5885_v6 = vpop.f32.mrf.mxu0  ;;  %v9444_v52 = vld [vmem:[#allocation104_spill] sm:$0xff] }
 0x1e1   :  { %9421 = vst [vmem:[#allocation401_spill] sm:$0xff] %v5839_v25  ;;  %9422 = vst [vmem:[#allocation402_spill] sm:$0xff] %v5842_v30  ;;  %v2099_v25 = vsub.f32 %v9428_v3, %v5709_v19  ;;  %v5861_v30 = vpop.f32.mrf.mxu1  ;;  %v5875_v8 = vmul.f32 %v2095_v61, %v4912_v51  ;;  %v5878_v19 = vmul.f32 %v2096_v62, %v4931_v54 }
 0x1e2   :  { %9423 = vst [vmem:[#allocation403_spill] sm:$0xff] %v5845_v7  ;;  %9425 = vst [vmem:[#allocation404_spill] sm:$0xff] %v5850_v29  ;;  %v5870_v29 = vmul.f32 %v2095_v61, %v4907_v14  ;;  %v5881_v3 = vmul.f32 %v2096_v62, %v4936_v53  ;;  %v5893_v45 = vmul.f32 %v2098_v20, %v4959_v43  ;;  %v9443_v61 = vld [vmem:[#allocation103_spill] sm:$0xff] }
 0x1e3   :  { %9426 = vst [vmem:[#allocation405_spill] sm:$0xff] %v5853_v0  ;;  %9429 = vst [vmem:[#allocation406_spill] sm:$0xff] %v5859_v44  ;;  %v2103_v62 = vsub.f32 %v9444_v52, %v5760_v59  ;;  %v5918_v59 = vmul.f32 %v2100_v35, %v4859_v58  ;;  %v9645_v0 = vld [vmem:[#allocation154_spill] sm:$0xff] }
 0x1e4   :  { %9430 = vst [vmem:[#allocation407_spill] sm:$0xff] %v5861_v30  ;;  %9431 = vst [vmem:[#allocation408_spill] sm:$0xff] %v5864_v63  ;;  %v9438_v63 = vld [vmem:[#allocation102_spill] sm:$0xff] }
 0x1e5   :  { %9432 = vst [vmem:[#allocation409_spill] sm:$0xff] %v5867_v5  ;;  %9433 = vst [vmem:[#allocation410_spill] sm:$0xff] %v5870_v29  ;;  %v2102_v42 = vsub.f32 %v9438_v63, %v5735_v46  ;;  %v5887_v5 = vpop.f32.mrf.mxu1  ;;  %v5890_v29 = vmul.f32 %v2098_v20, %v4954_v12  ;;  %v5903_v46 = vmul.f32 %v2097_v37, %v4986_v28  ;;  %v5910_v20 = vpop.f32.mrf.mxu0 }
 0x1e6   :  { %9435 = vst [vmem:[#allocation411_spill] sm:$0xff] %v5875_v8  ;;  %9436 = vst [vmem:[#allocation412_spill] sm:$0xff] %v5878_v19  ;;  %v2101_v8 = vsub.f32 %v9443_v61, %v5758_v48  ;;  %v5900_v19 = vmul.f32 %v2097_v37, %v4981_v38  ;;  %v5906_v63 = vmul.f32 %v2099_v25, %v4991_v4  ;;  %v9454_v37 = vld [vmem:[#allocation106_spill] sm:$0xff] }
 0x1e7   :  { %9437 = vst [vmem:[#allocation413_spill] sm:$0xff] %v5881_v3  ;;  %9439 = vst [vmem:[#allocation414_spill] sm:$0xff] %v5885_v6  ;;  %v5915_v48 = vmul.f32 %v2099_v25, %v5004_v15  ;;  %v9458_v25 = vld [vmem:[#allocation108_spill] sm:$0xff]  ;;  %v5935_v61 = vpop.f32.mrf.mxu0 }
 0x1e8   :  { %9440 = vst [vmem:[#allocation415_spill] sm:$0xff] %v5887_v5  ;;  %9441 = vst [vmem:[#allocation416_spill] sm:$0xff] %v5890_v29  ;;  %v9448_v29 = vld [vmem:[#allocation105_spill] sm:$0xff] }
 0x1e9   :  { %9442 = vst [vmem:[#allocation417_spill] sm:$0xff] %v5893_v45  ;;  %9445 = vst [vmem:[#allocation418_spill] sm:$0xff] %v5900_v19  ;;  %v2104_v3 = vsub.f32 %v9448_v29, %v5783_v39  ;;  %v5912_v45 = vpop.f32.mrf.mxu1  ;;  %v5921_v19 = vmul.f32 %v2100_v35, %v4871_v33  ;;  %v5929_v39 = vmul.f32 %v2102_v42, %v4887_v50  ;;  %v9457_v29 = vld [vmem:[#allocation107_spill] sm:$0xff] }
 0x1ea   :  { %9446 = vst [vmem:[#allocation419_spill] sm:$0xff] %v5903_v46  ;;  %9447 = vst [vmem:[#allocation420_spill] sm:$0xff] %v5906_v63  ;;  %v2106_v46 = vsub.f32 %v9454_v37, %v5785_v41  ;;  %v5926_v63 = vmul.f32 %v2102_v42, %v4876_v11  ;;  %v2105_v52 = vsub.f32 %v9457_v29, %v5809_v31  ;;  %v9464_v42 = vld [vmem:[#allocation109_spill] sm:$0xff] }
 0x1eb   :  { %9449 = vst [vmem:[#allocation421_spill] sm:$0xff] %v5910_v20  ;;  %9450 = vst [vmem:[#allocation422_spill] sm:$0xff] %v5912_v45  ;;  %v5940_v35 = vmul.f32 %v2101_v8, %v4892_v49  ;;  %v5943_v41 = vmul.f32 %v2101_v8, %v4902_v10  ;;  %v5946_v37 = vmul.f32 %v2103_v62, %v4907_v14  ;;  %v5961_v8 = vpop.f32.mrf.mxu0 }
 0x1ec   :  { %9451 = vst [vmem:[#allocation423_spill] sm:$0xff] %v5915_v48  ;;  %9452 = vst [vmem:[#allocation424_spill] sm:$0xff] %v5918_v59  ;;  %v2107_v48 = vsub.f32 %v9458_v25, %v5811_v36  ;;  %v5937_v59 = vpop.f32.mrf.mxu1  ;;  %v5951_v31 = vmul.f32 %v2103_v62, %v4912_v51  ;;  %v5954_v36 = vmul.f32 %v2104_v3, %v4931_v54  ;;  %v9473_v62 = vld [vmem:[#allocation111_spill] sm:$0xff] }
 0x1ed   :  { %9453 = vst [vmem:[#allocation425_spill] sm:$0xff] %v5921_v19  ;;  %9455 = vst [vmem:[#allocation426_spill] sm:$0xff] %v5926_v63  ;;  %v2108_v63 = vsub.f32 %v9464_v42, %v5834_v2  ;;  %v5957_v25 = vmul.f32 %v2104_v3, %v4936_v53  ;;  %v5969_v2 = vmul.f32 %v2106_v46, %v4959_v43 }
 0x1ee   :  { %9456 = vst [vmem:[#allocation427_spill] sm:$0xff] %v5929_v39  ;;  %9459 = vst [vmem:[#allocation428_spill] sm:$0xff] %v5935_v61 }
 0x1ef   :  { %9460 = vst [vmem:[#allocation429_spill] sm:$0xff] %v5937_v59  ;;  %9461 = vst [vmem:[#allocation430_spill] sm:$0xff] %v5940_v35  ;;  %v9468_v35 = vld [vmem:[#allocation110_spill] sm:$0xff] }
 0x1f0   :  { %9462 = vst [vmem:[#allocation431_spill] sm:$0xff] %v5943_v41  ;;  %9463 = vst [vmem:[#allocation432_spill] sm:$0xff] %v5946_v37  ;;  %v2110_v29 = vsub.f32 %v9468_v35, %v5836_v23  ;;  %v5963_v41 = vpop.f32.mrf.mxu1  ;;  %v5966_v37 = vmul.f32 %v2106_v46, %v4954_v12  ;;  %v5979_v23 = vmul.f32 %v2105_v52, %v4986_v28  ;;  %v5986_v46 = vpop.f32.mrf.mxu0 }
 0x1f1   :  { %9465 = vst [vmem:[#allocation433_spill] sm:$0xff] %v5951_v31  ;;  %9466 = vst [vmem:[#allocation434_spill] sm:$0xff] %v5954_v36  ;;  %v2109_v31 = vsub.f32 %v9473_v62, %v5859_v44  ;;  %v9474_v36 = vld [vmem:[#allocation112_spill] sm:$0xff]  ;;  %v5982_v35 = vmul.f32 %v2107_v48, %v4991_v4  ;;  %v5991_v44 = vmul.f32 %v2107_v48, %v5004_v15 }
 0x1f2   :  { %9467 = vst [vmem:[#allocation435_spill] sm:$0xff] %v5957_v25  ;;  %9469 = vst [vmem:[#allocation436_spill] sm:$0xff] %v5961_v8  ;;  %v2111_v3 = vsub.f32 %v9474_v36, %v5861_v30  ;;  %v5976_v25 = vmul.f32 %v2105_v52, %v4981_v38  ;;  %v5994_v30 = vmul.f32 %v2108_v63, %v4859_v58  ;;  %v9484_v52 = vld [vmem:[#allocation114_spill] sm:$0xff]  ;;  %v9488_v48 = vld [vmem:[#allocation116_spill] sm:$0xff]  ;;  %v6011_v62 = vpop.f32.mrf.mxu0 }
 0x1f3   :  { %9470 = vst [vmem:[#allocation437_spill] sm:$0xff] %v5963_v41  ;;  %9471 = vst [vmem:[#allocation438_spill] sm:$0xff] %v5966_v37  ;;  %v9478_v37 = vld [vmem:[#allocation113_spill] sm:$0xff] }
 0x1f4   :  { %9472 = vst [vmem:[#allocation439_spill] sm:$0xff] %v5969_v2  ;;  %9475 = vst [vmem:[#allocation440_spill] sm:$0xff] %v5976_v25  ;;  %v2112_v42 = vsub.f32 %v9478_v37, %v5885_v6  ;;  %v5988_v2 = vpop.f32.mrf.mxu1  ;;  %v5997_v25 = vmul.f32 %v2108_v63, %v4871_v33  ;;  %v6005_v6 = vmul.f32 %v2110_v29, %v4887_v50  ;;  %v9487_v37 = vld [vmem:[#allocation115_spill] sm:$0xff] }
 0x1f5   :  { %9476 = vst [vmem:[#allocation441_spill] sm:$0xff] %v5979_v23  ;;  %9477 = vst [vmem:[#allocation442_spill] sm:$0xff] %v5982_v35  ;;  %v2114_v23 = vsub.f32 %v9484_v52, %v5887_v5  ;;  %v6002_v35 = vmul.f32 %v2110_v29, %v4876_v11  ;;  %v2113_v36 = vsub.f32 %v9487_v37, %v5910_v20  ;;  %v9494_v29 = vld [vmem:[#allocation117_spill] sm:$0xff] }
 0x1f6   :  { %9479 = vst [vmem:[#allocation443_spill] sm:$0xff] %v5986_v46  ;;  %9480 = vst [vmem:[#allocation444_spill] sm:$0xff] %v5988_v2  ;;  %v6016_v63 = vmul.f32 %v2109_v31, %v4892_v49  ;;  %v6019_v5 = vmul.f32 %v2109_v31, %v4902_v10  ;;  %v6027_v20 = vmul.f32 %v2111_v3, %v4912_v51  ;;  %v6037_v31 = vpop.f32.mrf.mxu0 }
 0x1f7   :  { %9481 = vst [vmem:[#allocation445_spill] sm:$0xff] %v5991_v44  ;;  %9482 = vst [vmem:[#allocation446_spill] sm:$0xff] %v5994_v30  ;;  %v2115_v44 = vsub.f32 %v9488_v48, %v5912_v45  ;;  %v6013_v30 = vpop.f32.mrf.mxu1  ;;  %v6030_v45 = vmul.f32 %v2112_v42, %v4931_v54  ;;  %v6033_v48 = vmul.f32 %v2112_v42, %v4936_v53 }
 0x1f8   :  { %9483 = vst [vmem:[#allocation447_spill] sm:$0xff] %v5997_v25  ;;  %9485 = vst [vmem:[#allocation448_spill] sm:$0xff] %v6002_v35  ;;  %v6022_v35 = vmul.f32 %v2111_v3, %v4907_v14  ;;  %v9503_v3 = vld [vmem:[#allocation119_spill] sm:$0xff] }
 0x1f9   :  { %9486 = vst [vmem:[#allocation449_spill] sm:$0xff] %v6005_v6  ;;  %9489 = vst [vmem:[#allocation450_spill] sm:$0xff] %v6011_v62  ;;  %v2116_v6 = vsub.f32 %v9494_v29, %v5935_v61  ;;  %v6045_v61 = vmul.f32 %v2114_v23, %v4959_v43 }
 0x1fa   :  { %9490 = vst [vmem:[#allocation451_spill] sm:$0xff] %v6013_v30  ;;  %9491 = vst [vmem:[#allocation452_spill] sm:$0xff] %v6016_v63  ;;  %v9498_v63 = vld [vmem:[#allocation118_spill] sm:$0xff] }
 0x1fb   :  { %9492 = vst [vmem:[#allocation453_spill] sm:$0xff] %v6019_v5  ;;  %9493 = vst [vmem:[#allocation454_spill] sm:$0xff] %v6022_v35  ;;  %v2118_v37 = vsub.f32 %v9498_v63, %v5937_v59  ;;  %v6039_v5 = vpop.f32.mrf.mxu1  ;;  %v6042_v35 = vmul.f32 %v2114_v23, %v4954_v12  ;;  %v6055_v59 = vmul.f32 %v2113_v36, %v4986_v28  ;;  %v6062_v23 = vpop.f32.mrf.mxu0 }
 0x1fc   :  { %9495 = vst [vmem:[#allocation455_spill] sm:$0xff] %v6027_v20  ;;  %9496 = vst [vmem:[#allocation456_spill] sm:$0xff] %v6030_v45  ;;  %v2117_v20 = vsub.f32 %v9503_v3, %v5961_v8  ;;  %v9504_v45 = vld [vmem:[#allocation120_spill] sm:$0xff]  ;;  %v6058_v63 = vmul.f32 %v2115_v44, %v4991_v4  ;;  %v6067_v8 = vmul.f32 %v2115_v44, %v5004_v15 }
 0x1fd   :  { %9497 = vst [vmem:[#allocation457_spill] sm:$0xff] %v6033_v48  ;;  %9499 = vst [vmem:[#allocation458_spill] sm:$0xff] %v6037_v31  ;;  %v2119_v42 = vsub.f32 %v9504_v45, %v5963_v41  ;;  %v6052_v48 = vmul.f32 %v2113_v36, %v4981_v38  ;;  %v6070_v41 = vmul.f32 %v2116_v6, %v4859_v58  ;;  %v9518_v44 = vld [vmem:[#allocation124_spill] sm:$0xff]  ;;  %v6087_v3 = vpop.f32.mrf.mxu0 }
 0x1fe   :  { %9500 = vst [vmem:[#allocation459_spill] sm:$0xff] %v6039_v5  ;;  %9501 = vst [vmem:[#allocation460_spill] sm:$0xff] %v6042_v35  ;;  %v9508_v35 = vld [vmem:[#allocation121_spill] sm:$0xff] }
 0x1ff   :  { %9502 = vst [vmem:[#allocation461_spill] sm:$0xff] %v6045_v61  ;;  %9505 = vst [vmem:[#allocation462_spill] sm:$0xff] %v6052_v48  ;;  %v2120_v29 = vsub.f32 %v9508_v35, %v5986_v46  ;;  %v6064_v61 = vpop.f32.mrf.mxu1  ;;  %v9513_v48 = vld [vmem:[#allocation122_spill] sm:$0xff]  ;;  %v6080_v46 = vmul.f32 %v2118_v37, %v4876_v11  ;;  %v6083_v35 = vmul.f32 %v2118_v37, %v4887_v50 }
 0x200   :  { %9506 = vst [vmem:[#allocation463_spill] sm:$0xff] %v6055_v59  ;;  %9507 = vst [vmem:[#allocation464_spill] sm:$0xff] %v6058_v63  ;;  %v2122_v36 = vsub.f32 %v9513_v48, %v5988_v2  ;;  %v9514_v59 = vld [vmem:[#allocation123_spill] sm:$0xff]  ;;  %v6077_v63 = vmul.f32 %v2116_v6, %v4871_v33  ;;  %v6092_v2 = vmul.f32 %v2117_v20, %v4892_v49  ;;  %v9597_v48 = vld [vmem:[#allocation17_spill] sm:$0xff] }
 0x201   :  { %9509 = vst [vmem:[#allocation465_spill] sm:$0xff] %v6062_v23  ;;  %9510 = vst [vmem:[#allocation466_spill] sm:$0xff] %v6064_v61  ;;  %v2121_v45 = vsub.f32 %v9514_v59, %v6011_v62  ;;  %v6095_v62 = vmul.f32 %v2117_v20, %v4902_v10  ;;  %v6098_v6 = vmul.f32 %v2119_v42, %v4907_v14  ;;  %v6113_v20 = vpop.f32.mrf.mxu0 }
 0x202   :  { %9511 = vst [vmem:[#allocation467_spill] sm:$0xff] %v6067_v8  ;;  %9512 = vst [vmem:[#allocation468_spill] sm:$0xff] %v6070_v41  ;;  %v2123_v8 = vsub.f32 %v9518_v44, %v6013_v30  ;;  %v6089_v41 = vpop.f32.mrf.mxu1  ;;  %v6106_v30 = vmul.f32 %v2120_v29, %v4931_v54  ;;  %v6109_v44 = vmul.f32 %v2120_v29, %v4936_v53 }
 0x203   :  { %9515 = vst [vmem:[#allocation469_spill] sm:$0xff] %v6077_v63  ;;  %9516 = vst [vmem:[#allocation470_spill] sm:$0xff] %v6080_v46  ;;  %v9524_v46 = vld [vmem:[#allocation125_spill] sm:$0xff] }
 0x204   :  { %9517 = vst [vmem:[#allocation471_spill] sm:$0xff] %v6083_v35  ;;  %9519 = vst [vmem:[#allocation472_spill] sm:$0xff] %v6087_v3  ;;  %v2124_v37 = vsub.f32 %v9524_v46, %v6037_v31  ;;  %v6103_v35 = vmul.f32 %v2119_v42, %v4912_v51  ;;  %v6121_v31 = vmul.f32 %v2122_v36, %v4959_v43 }
 0x205   :  { %9520 = vst [vmem:[#allocation473_spill] sm:$0xff] %v6089_v41  ;;  %9521 = vst [vmem:[#allocation474_spill] sm:$0xff] %v6092_v2  ;;  %v9528_v2 = vld [vmem:[#allocation126_spill] sm:$0xff]  ;;  %v6124_v42 = vmul.f32 %v2121_v45, %v4981_v38 }
 0x206   :  { %9522 = vst [vmem:[#allocation475_spill] sm:$0xff] %v6095_v62  ;;  %9523 = vst [vmem:[#allocation476_spill] sm:$0xff] %v6098_v6  ;;  %v2126_v59 = vsub.f32 %v9528_v2, %v6039_v5  ;;  %v6115_v62 = vpop.f32.mrf.mxu1  ;;  %v6118_v6 = vmul.f32 %v2122_v36, %v4954_v12  ;;  %v6132_v5 = vmul.f32 %v2123_v8, %v4991_v4  ;;  %v1556_v36 = vpop.f32.mrf.mxu0 }
 0x207   :  { %9525 = vst [vmem:[#allocation477_spill] sm:$0xff] %v6103_v35  ;;  %9526 = vst [vmem:[#allocation478_spill] sm:$0xff] %v6106_v30  ;;  %v9534_v35 = vld [vmem:[#allocation127_spill] sm:$0xff]  ;;  %v6129_v30 = vmul.f32 %v2121_v45, %v4986_v28  ;;  %v6135_v2 = vmul.f32 %v2123_v8, %v5004_v15 }
 0x208   :  { %9527 = vst [vmem:[#allocation479_spill] sm:$0xff] %v6109_v44  ;;  %9529 = vst [vmem:[#allocation480_spill] sm:$0xff] %v6113_v20  ;;  %v2125_v29 = vsub.f32 %v9534_v35, %v6062_v23  ;;  %v6140_v44 = vmul.f32 %v2124_v37, %v4859_v58  ;;  %v9541_v35 = vld [vmem:[#allocation8_spill] sm:$0xff]  ;;  %v6150_v8 = vmul.f32 %v2126_v59, %v4876_v11 }
 0x209   :  { %9530 = vst [vmem:[#allocation481_spill] sm:$0xff] %v6115_v62  ;;  %9531 = vst [vmem:[#allocation482_spill] sm:$0xff] %v6118_v6  ;;  %v9538_v6 = vld [vmem:[#allocation128_spill] sm:$0xff]  ;;  %v2132_v45 = vsub.f32 %v1556_v36, %v9541_v35  ;;  %v9548_v35 = vld [vmem:[#allocation133_spill] sm:$0xff] }
 0x20a   :  { %9532 = vst [vmem:[#allocation483_spill] sm:$0xff] %v6121_v31  ;;  %9533 = vst [vmem:[#allocation484_spill] sm:$0xff] %v6124_v42  ;;  %v2127_v46 = vsub.f32 %v9538_v6, %v6064_v61  ;;  %v1813_v31 = vpop.f32.mrf.mxu1  ;;  %v9540_v42 = vld [vmem:[#allocation129_spill] sm:$0xff]  ;;  %v9546_v61 = vld [vmem:[#allocation130_spill] sm:$0xff]  ;;  %v6164_v11 = vmul.f32 %v2125_v29, %v4902_v10 }
 0x20b   :  { %9535 = vst [vmem:[#allocation485_spill] sm:$0xff] %v6129_v30  ;;  %9536 = vst [vmem:[#allocation486_spill] sm:$0xff] %v6132_v5  ;;  %v2128_v23 = vsub.f32 %v9540_v42, %v6087_v3  ;;  %v9542_v30 = vld [vmem:[#allocation9_spill] sm:$0xff]  ;;  %v6147_v5 = vmul.f32 %v2124_v37, %v4871_v33  ;;  %v2130_v58 = vsub.f32 %v9546_v61, %v6089_v41  ;;  %v9550_v33 = vld [vmem:[#allocation10_spill] sm:$0xff] }
 0x20c   :  { %9537 = vst [vmem:[#allocation487_spill] sm:$0xff] %v6135_v2  ;;  %9539 = vst [vmem:[#allocation488_spill] sm:$0xff] %v6140_v44  ;;  %v2134_v63 = vsub.f32 %v1813_v31, %v9542_v30  ;;  %v6153_v2 = vmul.f32 %v2126_v59, %v4887_v50  ;;  %v1558_v44 = vpop.f32.mrf.mxu0  ;;  %v1815_v6 = vpop.f32.mrf.mxu1  ;;  %v6158_v3 = vmul.f32 %v2125_v29, %v4892_v49  ;;  %v9549_v30 = vld [vmem:[#allocation134_spill] sm:$0xff]  ;;  %v9562_v41 = vld [vmem:[#allocation172_spill] sm:$0xff] }
 0x20d   :  { %9543 = vst [vmem:[#allocation8_spill] sm:$0xff] %v6147_v5  ;;  %9544 = vst [vmem:[#allocation9_spill] sm:$0xff] %v6150_v8  ;;  %v2260_v36 = vsub.f32 %v2132_v45, %v9548_v35  ;;  %v2133_v37 = vsub.f32 %v1558_v44, %v9550_v33  ;;  %v6167_v50 = vmul.f32 %v2127_v46, %v4907_v14  ;;  %v9554_v8 = vld [vmem:[#allocation131_spill] sm:$0xff]  ;;  %v6186_v14 = vld [vmem:[%s8552_s4 + $0x10] sm:$0xff] }
 0x20e   :  { %9545 = vst [vmem:[#allocation489_spill] sm:$0xff] %v6153_v2  ;;  %9547 = vst [vmem:[#allocation490_spill] sm:$0xff] %v6158_v3  ;;  %v2262_v31 = vsub.f32 %v2134_v63, %v9549_v30  ;;  %v6170_v59 = vmul.f32 %v2127_v46, %v4912_v51  ;;  %v2129_v2 = vsub.f32 %v9554_v8, %v6113_v20  ;;  %v1562_v49 = vpop.f32.mrf.mxu0  ;;  %v1819_v3 = vpop.f32.mrf.mxu1  ;;  %v6180_v63 = vld [vmem:[%s8552_s4] sm:$0xff]  ;;  %v9556_v46 = vld [vmem:[#allocation11_spill] sm:$0xff] }
 0x20f   :  { %9551 = vst [vmem:[#allocation133_spill] sm:$0xff] %v6164_v11  ;;  %9552 = vst [vmem:[#allocation134_spill] sm:$0xff] %v6167_v50  ;;  %v6175_v45 = vmul.f32 %v2128_v23, %v4931_v54  ;;  %v2900_v10 = vmul.f32 %v6180_v63, %v2260_v36  ;;  %v2135_v44 = vsub.f32 %v1815_v6, %v9556_v46  ;;  %v9558_v54 = vld [vmem:[#allocation132_spill] sm:$0xff]  ;;  %v9564_v8 = vld [vmem:[#allocation174_spill] sm:$0xff] }
 0x210   :  { %9553 = vst [vmem:[#allocation10_spill] sm:$0xff] %v6170_v59  ;;  %v2902_v51 = vmul.f32 %v6186_v14, %v2262_v31  ;;  %v6191_v29 = vmul.f32 %v2128_v23, %v4936_v53  ;;  %v2131_v35 = vsub.f32 %v9558_v54, %v6115_v62  ;;  %v9559_v30 = vld [vmem:[#allocation12_spill] sm:$0xff]  ;;  %v9560_v59 = vld [vmem:[#allocation13_spill] sm:$0xff]  ;;  %v1564_v50 = vpop.f32.mrf.mxu0  ;;  %v6198_v20 = vmul.f32 %v2130_v58, %v4954_v12  ;;  %v9566_v53 = vld [vmem:[#allocation135_spill] sm:$0xff] }
 0x211   :  { %9555 = vst [vmem:[#allocation491_spill] sm:$0xff] %v6175_v45  ;;  %v2136_v33 = vsub.f32 %v1562_v49, %v9559_v30  ;;  %v2138_v11 = vsub.f32 %v1819_v3, %v9560_v59  ;;  %v1821_v45 = vpop.f32.mrf.mxu1  ;;  %v6201_v5 = vadd.f32 %v2900_v10, %v9562_v41  ;;  %v2261_v23 = vsub.f32 %v2133_v37, %v9566_v53  ;;  %v6219_v12 = vld [vmem:[%s8553_s5] sm:$0xff]  ;;  %v9574_v10 = vld [vmem:[#allocation138_spill] sm:$0xff]  ;;  %v6276_v54 = vld [vmem:[%s8553_s5 + $0x18] sm:$0xff] }
 0x212   :  { %9557 = vst [vmem:[#allocation11_spill] sm:$0xff] %v6191_v29  ;;  %9561 = vst [vmem:[#allocation12_spill] sm:$0xff] %v6198_v20  ;;  %v6204_v6 = vadd.f32 %v2902_v51, %v9564_v8  ;;  %v6208_v46 = vmul.f32 %v2130_v58, %v4959_v43  ;;  %v6211_v49 = vmul.f32 %v2129_v2, %v4981_v38  ;;  %v1568_v8 = vpop.f32.mrf.mxu0  ;;  %v6227_v43 = vld [vmem:[%s8553_s5 + $0x10] sm:$0xff]  ;;  %v9573_v58 = vld [vmem:[#allocation137_spill] sm:$0xff] }
 0x213   :  { %9563 = vst [vmem:[#allocation13_spill] sm:$0xff] %v6201_v5  ;;  %v6214_v3 = vmul.f32 %v2129_v2, %v4986_v28  ;;  %v6222_v41 = vmul.f32 %v6219_v12, %v2260_v36  ;;  %v1825_v59 = vpop.f32.mrf.mxu1  ;;  %v6230_v38 = vmul.f32 %v6227_v43, %v2262_v31  ;;  %v9572_v28 = vld [vmem:[#allocation136_spill] sm:$0xff]  ;;  %v2264_v37 = vsub.f32 %v2136_v33, %v9573_v58  ;;  %v6248_v31 = vld [vmem:[%s8553_s5 + $0x8] sm:$0xff] }
 0x214   :  { %9565 = vst [vmem:[#allocation172_spill] sm:$0xff] %v6204_v6  ;;  %9567 = vst [vmem:[#allocation174_spill] sm:$0xff] %v6208_v46  ;;  %v2263_v2 = vsub.f32 %v2135_v44, %v9572_v28  ;;  %v2266_v51 = vsub.f32 %v2138_v11, %v9574_v10  ;;  %v6236_v30 = vmul.f32 %v2131_v35, %v4991_v4  ;;  %v9577_v6 = vld [vmem:[#allocation16_spill] sm:$0xff]  ;;  %v6262_v4 = vld [vmem:[%s8552_s4 + $0x30] sm:$0xff] }
 0x215   :  { %9568 = vst [vmem:[#allocation135_spill] sm:$0xff] %v6211_v49  ;;  %9569 = vst [vmem:[#allocation492_spill] sm:$0xff] %v6214_v3  ;;  %v6239_v36 = vmul.f32 %v2131_v35, %v5004_v15  ;;  %v2140_v53 = vsub.f32 %v1568_v8, %v4278_v21  ;;  %v2142_v5 = vsub.f32 %v1825_v59, %v9577_v6  ;;  %v1570_v3 = vpop.f32.mrf.mxu0  ;;  %v6243_v49 = vpop.f32.mrf.mxu1  ;;  %v6256_v15 = vld [vmem:[%s8552_s4 + $0x20] sm:$0xff]  ;;  %v9579_v35 = vld [vmem:[#allocation14_spill] sm:$0xff] }
 0x216   :  { %9570 = vst [vmem:[#allocation493_spill] sm:$0xff] %v6222_v41  ;;  %9571 = vst [vmem:[#allocation494_spill] sm:$0xff] %v6230_v38  ;;  %v6251_v11 = vmul.f32 %v6248_v31, %v2261_v23  ;;  %v2904_v21 = vmul.f32 %v6256_v15, %v2264_v37  ;;  %v2906_v44 = vmul.f32 %v6262_v4, %v2266_v51  ;;  %v9581_v59 = vld [vmem:[#allocation15_spill] sm:$0xff]  ;;  %v9582_v58 = vld [vmem:[#allocation141_spill] sm:$0xff] }
 0x217   :  { %9575 = vst [vmem:[#allocation136_spill] sm:$0xff] %v6236_v30  ;;  %9576 = vst [vmem:[#allocation137_spill] sm:$0xff] %v6239_v36  ;;  %v2137_v33 = vsub.f32 %v1564_v50, %v9579_v35  ;;  %v2139_v28 = vsub.f32 %v1821_v45, %v9581_v59  ;;  %v2268_v10 = vsub.f32 %v2140_v53, %v9582_v58  ;;  %v9583_v36 = vld [vmem:[#allocation142_spill] sm:$0xff]  ;;  %v1574_v62 = vpop.f32.mrf.mxu0  ;;  %v1831_v20 = vpop.f32.mrf.mxu1  ;;  %v6298_v59 = vld [vmem:[%s8552_s4 + $0x18] sm:$0xff] }
 0x218   :  { %9578 = vst [vmem:[#allocation138_spill] sm:$0xff] %v6251_v11  ;;  %v2270_v30 = vsub.f32 %v2142_v5, %v9583_v36  ;;  %v6279_v50 = vmul.f32 %v6276_v54, %v2263_v2  ;;  %v9586_v35 = vld [vmem:[#allocation182_spill] sm:$0xff]  ;;  %v6290_v5 = vld [vmem:[%s8552_s4 + $0x8] sm:$0xff]  ;;  %v6301_v58 = vmul.f32 %v6298_v59, %v2263_v2  ;;  %v9594_v2 = vld [vmem:[#allocation139_spill] sm:$0xff]  ;;  %v2141_v52 = vsub.f32 %v1570_v3, %v9597_v48 }
 0x219   :  { %v6282_v8 = vadd.f32 %v2904_v21, %v9586_v35  ;;  %v9588_v45 = vld [vmem:[#allocation186_spill] sm:$0xff]  ;;  %v6293_v36 = vmul.f32 %v6290_v5, %v2261_v23  ;;  %v6306_v21 = vld [vmem:[%s8553_s5 + $0x20] sm:$0xff]  ;;  %v1833_v29 = vpop.f32.mrf.mxu1  ;;  %v2144_v25 = vsub.f32 %v1574_v62, %v4293_v26  ;;  %v9604_v62 = vld [vmem:[#allocation145_spill] sm:$0xff] }
 0x21a   :  { %9585 = vst [vmem:[#allocation16_spill] sm:$0xff] %v6279_v50  ;;  %v6285_v53 = vadd.f32 %v2906_v44, %v9588_v45  ;;  %9591 = vst [vmem:[#allocation142_spill] sm:$0xff] %v6301_v58  ;;  %v6309_v44 = vmul.f32 %v6306_v21, %v2264_v37  ;;  %v6314_v23 = vld [vmem:[%s8553_s5 + $0x30] sm:$0xff]  ;;  %v1576_v45 = vpop.f32.mrf.mxu0  ;;  %v2910_v58 = vmul.f32 %v6186_v14, %v2270_v30  ;;  %v9596_v61 = vld [vmem:[#allocation140_spill] sm:$0xff] }
 0x21b   :  { %9587 = vst [vmem:[#allocation14_spill] sm:$0xff] %v6282_v8  ;;  %9590 = vst [vmem:[#allocation141_spill] sm:$0xff] %v6293_v36  ;;  %v6317_v35 = vmul.f32 %v6314_v23, %v2266_v51  ;;  %v2908_v8 = vmul.f32 %v6180_v63, %v2268_v10  ;;  %v2267_v42 = vsub.f32 %v2139_v28, %v9596_v61  ;;  %v1837_v46 = vpop.f32.mrf.mxu1  ;;  %v9605_v28 = vld [vmem:[#allocation146_spill] sm:$0xff]  ;;  %v6388_v11 = vld [vmem:[%s8552_s4 + $0x38] sm:$0xff] }
 0x21c   :  { %9589 = vst [vmem:[#allocation15_spill] sm:$0xff] %v6285_v53  ;;  %9592 = vst [vmem:[#allocation182_spill] sm:$0xff] %v6309_v44  ;;  %v2265_v53 = vsub.f32 %v2137_v33, %v9594_v2  ;;  %v2146_v51 = vsub.f32 %v1831_v20, %v4295_v27  ;;  %v1580_v38 = vpop.f32.mrf.mxu0  ;;  %v6332_v33 = vadd.f32 %v2910_v58, %v5067_v22  ;;  %v9600_v2 = vld [vmem:[#allocation18_spill] sm:$0xff]  ;;  %v9614_v27 = vld [vmem:[#allocation144_spill] sm:$0xff] }
 0x21d   :  { %9593 = vst [vmem:[#allocation186_spill] sm:$0xff] %v6317_v35  ;;  %v6329_v41 = vadd.f32 %v2908_v8, %v5053_v16  ;;  %v2143_v6 = vsub.f32 %v6243_v49, %v9600_v2  ;;  %v2272_v20 = vsub.f32 %v2144_v25, %v9604_v62  ;;  %v6346_v22 = vpop.f32.mrf.mxu1  ;;  %v6349_v58 = vmul.f32 %v6219_v12, %v2268_v10  ;;  %v9608_v2 = vld [vmem:[#allocation21_spill] sm:$0xff]  ;;  %v9609_v3 = vld [vmem:[#allocation22_spill] sm:$0xff]  ;;  %v9617_v35 = vld [vmem:[#allocation20_spill] sm:$0xff] }
 0x21e   :  { %9599 = vst [vmem:[#allocation140_spill] sm:$0xff] %v6332_v33  ;;  %v2274_v16 = vsub.f32 %v2146_v51, %v9605_v28  ;;  %v6344_v8 = vpop.f32.mrf.mxu0  ;;  %v6352_v49 = vmul.f32 %v6227_v43, %v2270_v30  ;;  %v2148_v61 = vsub.f32 %v1580_v38, %v9608_v2  ;;  %v2150_v33 = vsub.f32 %v1837_v46, %v9609_v3  ;;  %v6359_v25 = vld [vmem:[%s8553_s5 + $0x28] sm:$0xff]  ;;  %v6375_v46 = vld [vmem:[%s8553_s5 + $0x38] sm:$0xff]  ;;  %v9619_v44 = vld [vmem:[#allocation150_spill] sm:$0xff] }
 0x21f   :  { %9598 = vst [vmem:[#allocation139_spill] sm:$0xff] %v6329_v41  ;;  %9606 = vst [vmem:[#allocation17_spill] sm:$0xff] %v6349_v58  ;;  %v6362_v51 = vmul.f32 %v6359_v25, %v2265_v53  ;;  %v6367_v10 = vld [vmem:[%s8552_s4 + $0x28] sm:$0xff]  ;;  %v6378_v38 = vmul.f32 %v6375_v46, %v2267_v42  ;;  %v9613_v3 = vld [vmem:[#allocation143_spill] sm:$0xff]  ;;  %v1843_v2 = vpop.f32.mrf.mxu1  ;;  %v2271_v41 = vsub.f32 %v2143_v6, %v9614_v27 }
 0x220   :  { %9607 = vst [vmem:[#allocation18_spill] sm:$0xff] %v6352_v49  ;;  %v6370_v30 = vmul.f32 %v6367_v10, %v2265_v53  ;;  %v2269_v62 = vsub.f32 %v2141_v52, %v9613_v3  ;;  %v1586_v28 = vpop.f32.mrf.mxu0  ;;  %v2912_v50 = vmul.f32 %v6256_v15, %v2272_v20  ;;  %v2914_v37 = vmul.f32 %v6262_v4, %v2274_v16  ;;  %v9615_v53 = vld [vmem:[#allocation19_spill] sm:$0xff]  ;;  %v9618_v3 = vld [vmem:[#allocation149_spill] sm:$0xff] }
 0x221   :  { %9610 = vst [vmem:[#allocation145_spill] sm:$0xff] %v6362_v51  ;;  %9612 = vst [vmem:[#allocation21_spill] sm:$0xff] %v6378_v38  ;;  %v6391_v36 = vmul.f32 %v6388_v11, %v2267_v42  ;;  %v2147_v52 = vsub.f32 %v1833_v29, %v9617_v35  ;;  %v2276_v26 = vsub.f32 %v2148_v61, %v9618_v3  ;;  %v6398_v48 = vpop.f32.mrf.mxu1  ;;  %v9622_v38 = vld [vmem:[#allocation204_spill] sm:$0xff]  ;;  %v9624_v42 = vld [vmem:[#allocation206_spill] sm:$0xff] }
 0x222   :  { %9611 = vst [vmem:[#allocation146_spill] sm:$0xff] %v6370_v30  ;;  %v2145_v30 = vsub.f32 %v1576_v45, %v9615_v53  ;;  %v2278_v6 = vsub.f32 %v2150_v33, %v9619_v44  ;;  %v6396_v27 = vpop.f32.mrf.mxu0  ;;  %v6405_v51 = vadd.f32 %v2912_v50, %v9622_v38  ;;  %v6411_v29 = vmul.f32 %v6248_v31, %v2269_v62  ;;  %v9631_v38 = vld [vmem:[#allocation147_spill] sm:$0xff]  ;;  %v9632_v53 = vld [vmem:[#allocation148_spill] sm:$0xff] }
 0x223   :  { %9616 = vst [vmem:[#allocation22_spill] sm:$0xff] %v6391_v36  ;;  %v6408_v36 = vadd.f32 %v2914_v37, %v9624_v42  ;;  %v6414_v44 = vmul.f32 %v6290_v5, %v2269_v62  ;;  %v6417_v35 = vmul.f32 %v6306_v21, %v2272_v20  ;;  %v6420_v33 = vmul.f32 %v6314_v23, %v2274_v16  ;;  %v1849_v3 = vpop.f32.mrf.mxu1  ;;  %v9635_v16 = vld [vmem:[#allocation26_spill] sm:$0xff] }
 0x224   :  { %9623 = vst [vmem:[#allocation143_spill] sm:$0xff] %v6405_v51  ;;  %9626 = vst [vmem:[#allocation19_spill] sm:$0xff] %v6411_v29  ;;  %v1592_v61 = vpop.f32.mrf.mxu0  ;;  %v6423_v50 = vmul.f32 %v6276_v54, %v2271_v41  ;;  %v2273_v37 = vsub.f32 %v2145_v30, %v9631_v38  ;;  %v2916_v42 = vmul.f32 %v6180_v63, %v2276_v26  ;;  %v9634_v51 = vld [vmem:[#allocation25_spill] sm:$0xff]  ;;  %v9637_v30 = vld [vmem:[#allocation216_spill] sm:$0xff] }
 0x225   :  { %9625 = vst [vmem:[#allocation144_spill] sm:$0xff] %v6408_v36  ;;  %9627 = vst [vmem:[#allocation20_spill] sm:$0xff] %v6414_v44  ;;  %v2918_v19 = vmul.f32 %v6186_v14, %v2278_v6  ;;  %v2275_v62 = vsub.f32 %v2147_v52, %v9632_v53  ;;  %v9633_v36 = vld [vmem:[#allocation23_spill] sm:$0xff]  ;;  %v2152_v44 = vsub.f32 %v1586_v28, %v9634_v51  ;;  %v6435_v58 = vpop.f32.mrf.mxu1  ;;  %v9641_v52 = vld [vmem:[#allocation24_spill] sm:$0xff] }
 0x226   :  { %9628 = vst [vmem:[#allocation149_spill] sm:$0xff] %v6417_v35  ;;  %9629 = vst [vmem:[#allocation150_spill] sm:$0xff] %v6420_v33  ;;  %v2149_v20 = vsub.f32 %v6344_v8, %v9633_v36  ;;  %v2154_v49 = vsub.f32 %v1843_v2, %v9635_v16  ;;  %v6433_v39 = vpop.f32.mrf.mxu0  ;;  %v6438_v45 = vmul.f32 %v6298_v59, %v2271_v41  ;;  %v9644_v53 = vld [vmem:[#allocation153_spill] sm:$0xff]  ;;  %v9659_v33 = vld [vmem:[#allocation158_spill] sm:$0xff] }
 0x227   :  { %9630 = vst [vmem:[#allocation204_spill] sm:$0xff] %v6423_v50  ;;  %v6441_v38 = vadd.f32 %v2916_v42, %v9637_v30  ;;  %v9639_v50 = vld [vmem:[#allocation218_spill] sm:$0xff]  ;;  %v2151_v36 = vsub.f32 %v6346_v22, %v9641_v52  ;;  %v2280_v16 = vsub.f32 %v2152_v44, %v9644_v53  ;;  %v1855_v7 = vpop.f32.mrf.mxu1  ;;  %v6455_v42 = vmul.f32 %v6219_v12, %v2276_v26 }
 0x228   :  { %9636 = vst [vmem:[#allocation206_spill] sm:$0xff] %v6438_v45  ;;  %v6444_v29 = vadd.f32 %v2918_v19, %v9639_v50  ;;  %v2282_v41 = vsub.f32 %v2154_v49, %v9645_v0  ;;  %v1598_v45 = vpop.f32.mrf.mxu0  ;;  %v6458_v19 = vmul.f32 %v6227_v43, %v2278_v6  ;;  %v9648_v50 = vld [vmem:[#allocation29_spill] sm:$0xff]  ;;  %v9649_v30 = vld [vmem:[#allocation30_spill] sm:$0xff]  ;;  %v6463_v51 = vmul.f32 %v6359_v25, %v2273_v37  ;;  %v9653_v49 = vld [vmem:[#allocation151_spill] sm:$0xff] }
 0x229   :  { %9638 = vst [vmem:[#allocation147_spill] sm:$0xff] %v6441_v38  ;;  %9646 = vst [vmem:[#allocation23_spill] sm:$0xff] %v6455_v42  ;;  %v2156_v22 = vsub.f32 %v1592_v61, %v9648_v50  ;;  %v2158_v52 = vsub.f32 %v1849_v3, %v9649_v30  ;;  %v6466_v2 = vmul.f32 %v6367_v10, %v2273_v37  ;;  %v6474_v53 = vpop.f32.mrf.mxu1  ;;  %v9654_v6 = vld [vmem:[#allocation152_spill] sm:$0xff]  ;;  %v9655_v50 = vld [vmem:[#allocation27_spill] sm:$0xff] }
 0x22a   :  { %9640 = vst [vmem:[#allocation148_spill] sm:$0xff] %v6444_v29  ;;  %9647 = vst [vmem:[#allocation25_spill] sm:$0xff] %v6458_v19  ;;  %v6469_v0 = vmul.f32 %v6375_v46, %v2275_v62  ;;  %v2277_v44 = vsub.f32 %v2149_v20, %v9653_v49  ;;  %v6472_v26 = vpop.f32.mrf.mxu0  ;;  %v2279_v29 = vsub.f32 %v2151_v36, %v9654_v6  ;;  %v9657_v38 = vld [vmem:[#allocation28_spill] sm:$0xff]  ;;  %v9658_v20 = vld [vmem:[#allocation157_spill] sm:$0xff] }
 0x22b   :  { %9650 = vst [vmem:[#allocation26_spill] sm:$0xff] %v6463_v51  ;;  %9651 = vst [vmem:[#allocation216_spill] sm:$0xff] %v6466_v2  ;;  %v2920_v61 = vmul.f32 %v6256_v15, %v2280_v16  ;;  %v2922_v3 = vmul.f32 %v6262_v4, %v2282_v41  ;;  %v2153_v30 = vsub.f32 %v6396_v27, %v9655_v50  ;;  %v1861_v8 = vpop.f32.mrf.mxu1  ;;  %v9672_v51 = vld [vmem:[#allocation156_spill] sm:$0xff]  ;;  %v9677_v36 = vld [vmem:[#allocation238_spill] sm:$0xff] }
 0x22c   :  { %9652 = vst [vmem:[#allocation218_spill] sm:$0xff] %v6469_v0  ;;  %v6482_v37 = vmul.f32 %v6388_v11, %v2275_v62  ;;  %v2155_v2 = vsub.f32 %v6398_v48, %v9657_v38  ;;  %v2284_v49 = vsub.f32 %v2156_v22, %v9658_v20  ;;  %v2286_v28 = vsub.f32 %v2158_v52, %v9659_v33  ;;  %v1604_v35 = vpop.f32.mrf.mxu0  ;;  %v9664_v62 = vld [vmem:[#allocation230_spill] sm:$0xff] }
 0x22d   :  { %v6493_v27 = vadd.f32 %v2920_v61, %v9662_v17  ;;  %v6496_v50 = vadd.f32 %v2922_v3, %v9664_v62  ;;  %v6499_v48 = vmul.f32 %v6248_v31, %v2277_v44  ;;  %v6502_v38 = vmul.f32 %v6290_v5, %v2277_v44  ;;  %v6512_v20 = vpop.f32.mrf.mxu1  ;;  %v9671_v61 = vld [vmem:[#allocation155_spill] sm:$0xff] }
 0x22e   :  { %9656 = vst [vmem:[#allocation24_spill] sm:$0xff] %v6482_v37  ;;  %v6505_v33 = vmul.f32 %v6306_v21, %v2280_v16  ;;  %v6508_v22 = vmul.f32 %v6314_v23, %v2282_v41  ;;  %v6510_v52 = vpop.f32.mrf.mxu0  ;;  %v6515_v17 = vmul.f32 %v6276_v54, %v2279_v29  ;;  %v2281_v3 = vsub.f32 %v2153_v30, %v9671_v61  ;;  %v9673_v16 = vld [vmem:[#allocation31_spill] sm:$0xff]  ;;  %v9674_v41 = vld [vmem:[#allocation33_spill] sm:$0xff]  ;;  %v9675_v37 = vld [vmem:[#allocation34_spill] sm:$0xff] }
 0x22f   :  { %9663 = vst [vmem:[#allocation153_spill] sm:$0xff] %v6493_v27  ;;  %9665 = vst [vmem:[#allocation154_spill] sm:$0xff] %v6496_v50  ;;  %v2924_v62 = vmul.f32 %v6180_v63, %v2284_v49  ;;  %v2926_v44 = vmul.f32 %v6186_v14, %v2286_v28  ;;  %v2283_v6 = vsub.f32 %v2155_v2, %v9672_v51  ;;  %v1867_v0 = vpop.f32.mrf.mxu1  ;;  %v9679_v61 = vld [vmem:[#allocation240_spill] sm:$0xff] }
 0x230   :  { %9666 = vst [vmem:[#allocation29_spill] sm:$0xff] %v6499_v48  ;;  %9667 = vst [vmem:[#allocation30_spill] sm:$0xff] %v6502_v38  ;;  %v2157_v50 = vsub.f32 %v6433_v39, %v9673_v16  ;;  %v2160_v27 = vsub.f32 %v1598_v45, %v9674_v41  ;;  %v2162_v38 = vsub.f32 %v1855_v7, %v9675_v37  ;;  %v1610_v19 = vpop.f32.mrf.mxu0  ;;  %v9681_v48 = vld [vmem:[#allocation32_spill] sm:$0xff]  ;;  %v9684_v37 = vld [vmem:[#allocation161_spill] sm:$0xff] }
 0x231   :  { %9668 = vst [vmem:[#allocation151_spill] sm:$0xff] %v6505_v33  ;;  %9669 = vst [vmem:[#allocation152_spill] sm:$0xff] %v6508_v22  ;;  %v6526_v42 = vmul.f32 %v6298_v59, %v2279_v29  ;;  %v6529_v30 = vadd.f32 %v2924_v62, %v9677_v36  ;;  %v2159_v51 = vsub.f32 %v6435_v58, %v9681_v48  ;;  %v9685_v41 = vld [vmem:[#allocation162_spill] sm:$0xff]  ;;  %v6544_v36 = vpop.f32.mrf.mxu1  ;;  %v9688_v58 = vld [vmem:[#allocation37_spill] sm:$0xff] }
 0x232   :  { %9670 = vst [vmem:[#allocation27_spill] sm:$0xff] %v6515_v17  ;;  %v6532_v17 = vadd.f32 %v2926_v44, %v9679_v61  ;;  %v2288_v16 = vsub.f32 %v2160_v27, %v9684_v37  ;;  %v2290_v29 = vsub.f32 %v2162_v38, %v9685_v41  ;;  %v6547_v62 = vmul.f32 %v6219_v12, %v2284_v49  ;;  %v9689_v61 = vld [vmem:[#allocation38_spill] sm:$0xff]  ;;  %v9693_v37 = vld [vmem:[#allocation159_spill] sm:$0xff]  ;;  %v9698_v45 = vld [vmem:[#allocation165_spill] sm:$0xff] }
 0x233   :  { %9676 = vst [vmem:[#allocation28_spill] sm:$0xff] %v6526_v42  ;;  %9678 = vst [vmem:[#allocation157_spill] sm:$0xff] %v6529_v30  ;;  %v6542_v42 = vpop.f32.mrf.mxu0  ;;  %v6550_v44 = vmul.f32 %v6227_v43, %v2286_v28  ;;  %v2164_v48 = vsub.f32 %v1604_v35, %v9688_v58  ;;  %v2166_v2 = vsub.f32 %v1861_v8, %v9689_v61  ;;  %v9694_v30 = vld [vmem:[#allocation160_spill] sm:$0xff]  ;;  %v9695_v8 = vld [vmem:[#allocation35_spill] sm:$0xff] }
 0x234   :  { %9680 = vst [vmem:[#allocation158_spill] sm:$0xff] %v6532_v17  ;;  %9686 = vst [vmem:[#allocation226_spill] sm:$0xff] %v6547_v62  ;;  %v6555_v7 = vmul.f32 %v6359_v25, %v2281_v3  ;;  %v6558_v27 = vmul.f32 %v6367_v10, %v2281_v3  ;;  %v6561_v38 = vmul.f32 %v6375_v46, %v2283_v6  ;;  %v1873_v17 = vpop.f32.mrf.mxu1  ;;  %v9697_v3 = vld [vmem:[#allocation36_spill] sm:$0xff] }
 0x235   :  { %9687 = vst [vmem:[#allocation230_spill] sm:$0xff] %v6550_v44  ;;  %v2285_v41 = vsub.f32 %v2157_v50, %v9693_v37  ;;  %v1616_v49 = vpop.f32.mrf.mxu0  ;;  %v2287_v28 = vsub.f32 %v2159_v51, %v9694_v30  ;;  %v2928_v22 = vmul.f32 %v6256_v15, %v2288_v16  ;;  %v2930_v35 = vmul.f32 %v6262_v4, %v2290_v29  ;;  %v9699_v50 = vld [vmem:[#allocation166_spill] sm:$0xff] }
 0x236   :  { %9690 = vst [vmem:[#allocation155_spill] sm:$0xff] %v6555_v7  ;;  %9691 = vst [vmem:[#allocation156_spill] sm:$0xff] %v6558_v27  ;;  %v2161_v58 = vsub.f32 %v6472_v26, %v9695_v8  ;;  %v6570_v61 = vmul.f32 %v6388_v11, %v2283_v6  ;;  %v2163_v27 = vsub.f32 %v6474_v53, %v9697_v3  ;;  %v6578_v30 = vpop.f32.mrf.mxu1  ;;  %v9702_v8 = vld [vmem:[#allocation250_spill] sm:$0xff]  ;;  %v9712_v26 = vld [vmem:[#allocation164_spill] sm:$0xff] }
 0x237   :  { %9692 = vst [vmem:[#allocation31_spill] sm:$0xff] %v6561_v38  ;;  %v2292_v33 = vsub.f32 %v2164_v48, %v9698_v45  ;;  %v2294_v37 = vsub.f32 %v2166_v2, %v9699_v50  ;;  %v6576_v39 = vpop.f32.mrf.mxu0  ;;  %v6585_v6 = vadd.f32 %v2928_v22, %v9702_v8  ;;  %v6591_v53 = vmul.f32 %v6248_v31, %v2285_v41 }
 0x238   :  { %9696 = vst [vmem:[#allocation33_spill] sm:$0xff] %v6570_v61  ;;  %v9704_v61 = vld [vmem:[#allocation252_spill] sm:$0xff]  ;;  %v6594_v2 = vmul.f32 %v6290_v5, %v2285_v41  ;;  %v6597_v45 = vmul.f32 %v6306_v21, %v2288_v16  ;;  %v6600_v48 = vmul.f32 %v6314_v23, %v2290_v29  ;;  %v6604_v50 = vpop.f32.mrf.mxu1  ;;  %v6607_v22 = vmul.f32 %v6276_v54, %v2287_v28  ;;  %v9713_v16 = vld [vmem:[#allocation39_spill] sm:$0xff]  ;;  %v9714_v29 = vld [vmem:[#allocation41_spill] sm:$0xff] }
 0x239   :  { %9703 = vst [vmem:[#allocation34_spill] sm:$0xff] %v6585_v6  ;;  %v6588_v32 = vadd.f32 %v2930_v35, %v9704_v61  ;;  %9706 = vst [vmem:[#allocation240_spill] sm:$0xff] %v6591_v53  ;;  %v6602_v3 = vpop.f32.mrf.mxu0  ;;  %v9711_v35 = vld [vmem:[#allocation163_spill] sm:$0xff]  ;;  %v2932_v8 = vmul.f32 %v6180_v63, %v2292_v33  ;;  %v2934_v41 = vmul.f32 %v6186_v14, %v2294_v37 }
 0x23a   :  { %9707 = vst [vmem:[#allocation32_spill] sm:$0xff] %v6594_v2  ;;  %9708 = vst [vmem:[#allocation161_spill] sm:$0xff] %v6597_v45  ;;  %v2289_v61 = vsub.f32 %v2161_v58, %v9711_v35  ;;  %v2291_v38 = vsub.f32 %v2163_v27, %v9712_v26  ;;  %v2168_v6 = vsub.f32 %v1610_v19, %v9714_v29  ;;  %v9715_v2 = vld [vmem:[#allocation42_spill] sm:$0xff]  ;;  %v6619_v62 = vpop.f32.mrf.mxu1  ;;  %v9717_v58 = vld [vmem:[#allocation260_spill] sm:$0xff] }
 0x23b   :  { %9705 = vst [vmem:[#allocation238_spill] sm:$0xff] %v6588_v32  ;;  %9709 = vst [vmem:[#allocation162_spill] sm:$0xff] %v6600_v48  ;;  %v2165_v32 = vsub.f32 %v6510_v52, %v9713_v16  ;;  %v2170_v44 = vsub.f32 %v1867_v0, %v9715_v2  ;;  %v6617_v7 = vpop.f32.mrf.mxu0  ;;  %v6622_v51 = vmul.f32 %v6298_v59, %v2287_v28  ;;  %v9721_v27 = vld [vmem:[#allocation40_spill] sm:$0xff]  ;;  %v9724_v16 = vld [vmem:[#allocation170_spill] sm:$0xff] }
 0x23c   :  { %9710 = vst [vmem:[#allocation37_spill] sm:$0xff] %v6607_v22  ;;  %v6625_v35 = vadd.f32 %v2932_v8, %v9717_v58  ;;  %v9719_v22 = vld [vmem:[#allocation264_spill] sm:$0xff]  ;;  %v2167_v52 = vsub.f32 %v6512_v20, %v9721_v27  ;;  %v2296_v29 = vsub.f32 %v2168_v6, %v9724_v16  ;;  %v6640_v8 = vpop.f32.mrf.mxu1  ;;  %v2172_v20 = vsub.f32 %v1616_v49, %v9229_v40 }
 0x23d   :  { %9716 = vst [vmem:[#allocation38_spill] sm:$0xff] %v6622_v51  ;;  %v6628_v53 = vadd.f32 %v2934_v41, %v9719_v22  ;;  %v2298_v28 = vsub.f32 %v2170_v44, %v9725_v24  ;;  %v6638_v51 = vpop.f32.mrf.mxu0  ;;  %v6643_v22 = vmul.f32 %v6219_v12, %v2292_v33  ;;  %v6646_v41 = vmul.f32 %v6227_v43, %v2294_v37  ;;  %v9731_v44 = vld [vmem:[#allocation167_spill] sm:$0xff]  ;;  %v9732_v37 = vld [vmem:[#allocation168_spill] sm:$0xff] }
 0x23e   :  { %9718 = vst [vmem:[#allocation159_spill] sm:$0xff] %v6625_v35  ;;  %v2174_v58 = vsub.f32 %v1873_v17, %v9230_v1  ;;  %v6651_v27 = vmul.f32 %v6359_v25, %v2289_v61  ;;  %v6654_v6 = vmul.f32 %v6367_v10, %v2289_v61  ;;  %v6657_v24 = vmul.f32 %v6375_v46, %v2291_v38  ;;  %v6662_v2 = vpop.f32.mrf.mxu1  ;;  %v9733_v17 = vld [vmem:[#allocation43_spill] sm:$0xff] }
 0x23f   :  { %9720 = vst [vmem:[#allocation160_spill] sm:$0xff] %v6628_v53  ;;  %9726 = vst [vmem:[#allocation35_spill] sm:$0xff] %v6643_v22  ;;  %v2293_v16 = vsub.f32 %v2165_v32, %v9731_v44  ;;  %v6660_v33 = vpop.f32.mrf.mxu0  ;;  %v2295_v26 = vsub.f32 %v2167_v52, %v9732_v37  ;;  %v2936_v40 = vmul.f32 %v6256_v15, %v2296_v29  ;;  %v9735_v53 = vld [vmem:[#allocation44_spill] sm:$0xff]  ;;  %v9736_v32 = vld [vmem:[#allocation183_spill] sm:$0xff] }
 0x240   :  { %9727 = vst [vmem:[#allocation36_spill] sm:$0xff] %v6646_v41  ;;  %9728 = vst [vmem:[#allocation165_spill] sm:$0xff] %v6651_v27  ;;  %v2938_v1 = vmul.f32 %v6262_v4, %v2298_v28  ;;  %v2169_v49 = vsub.f32 %v6542_v42, %v9733_v17  ;;  %v6670_v61 = vmul.f32 %v6388_v11, %v2291_v38  ;;  %v6678_v52 = vpop.f32.mrf.mxu1  ;;  %v9740_v17 = vld [vmem:[#allocation270_spill] sm:$0xff]  ;;  %v9750_v42 = vld [vmem:[#allocation177_spill] sm:$0xff] }
 0x241   :  { %9729 = vst [vmem:[#allocation166_spill] sm:$0xff] %v6654_v6  ;;  %9730 = vst [vmem:[#allocation250_spill] sm:$0xff] %v6657_v24  ;;  %v2171_v35 = vsub.f32 %v6544_v36, %v9735_v53  ;;  %v2300_v44 = vsub.f32 %v2172_v20, %v9736_v32  ;;  %v9737_v6 = vld [vmem:[#allocation184_spill] sm:$0xff]  ;;  %v6676_v0 = vpop.f32.mrf.mxu0  ;;  %v6685_v38 = vadd.f32 %v2936_v40, %v9740_v17  ;;  %v9762_v27 = vld [vmem:[#allocation195_spill] sm:$0xff] }
 0x242   :  { %9734 = vst [vmem:[#allocation252_spill] sm:$0xff] %v6670_v61  ;;  %v2302_v48 = vsub.f32 %v2174_v58, %v9737_v6  ;;  %v9742_v61 = vld [vmem:[#allocation272_spill] sm:$0xff]  ;;  %v6691_v36 = vmul.f32 %v6248_v31, %v2293_v16  ;;  %v6694_v53 = vmul.f32 %v6290_v5, %v2293_v16  ;;  %v6697_v20 = vmul.f32 %v6306_v21, %v2296_v29  ;;  %v6704_v32 = vpop.f32.mrf.mxu1  ;;  %v9751_v29 = vld [vmem:[#allocation47_spill] sm:$0xff] }
 0x243   :  { %9741 = vst [vmem:[#allocation163_spill] sm:$0xff] %v6685_v38  ;;  %v6688_v24 = vadd.f32 %v2938_v1, %v9742_v61  ;;  %v6700_v58 = vmul.f32 %v6314_v23, %v2298_v28  ;;  %v6702_v6 = vpop.f32.mrf.mxu0  ;;  %v6707_v40 = vmul.f32 %v6276_v54, %v2295_v26  ;;  %v9749_v1 = vld [vmem:[#allocation176_spill] sm:$0xff]  ;;  %v2940_v17 = vmul.f32 %v6180_v63, %v2300_v44  ;;  %v9752_v28 = vld [vmem:[#allocation49_spill] sm:$0xff] }
 0x244   :  { %9744 = vst [vmem:[#allocation39_spill] sm:$0xff] %v6691_v36  ;;  %9745 = vst [vmem:[#allocation41_spill] sm:$0xff] %v6694_v53  ;;  %v2297_v61 = vsub.f32 %v2169_v49, %v9749_v1  ;;  %v2942_v16 = vmul.f32 %v6186_v14, %v2302_v48  ;;  %v2299_v45 = vsub.f32 %v2171_v35, %v9750_v42  ;;  %v9753_v53 = vld [vmem:[#allocation50_spill] sm:$0xff]  ;;  %v6721_v22 = vpop.f32.mrf.mxu1  ;;  %v9755_v1 = vld [vmem:[#allocation280_spill] sm:$0xff] }
 0x245   :  { %9743 = vst [vmem:[#allocation164_spill] sm:$0xff] %v6688_v24  ;;  %9746 = vst [vmem:[#allocation42_spill] sm:$0xff] %v6697_v20  ;;  %v2173_v24 = vsub.f32 %v6576_v39, %v9751_v29  ;;  %v2176_v38 = vsub.f32 %v6602_v3, %v9752_v28  ;;  %v2178_v41 = vsub.f32 %v6604_v50, %v9753_v53  ;;  %v6719_v19 = vpop.f32.mrf.mxu0  ;;  %v9757_v35 = vld [vmem:[#allocation284_spill] sm:$0xff]  ;;  %v9770_v53 = vld [vmem:[#allocation191_spill] sm:$0xff] }
 0x246   :  { %9747 = vst [vmem:[#allocation260_spill] sm:$0xff] %v6700_v58  ;;  %9748 = vst [vmem:[#allocation264_spill] sm:$0xff] %v6707_v40  ;;  %v6724_v49 = vmul.f32 %v6298_v59, %v2295_v26  ;;  %v6727_v37 = vadd.f32 %v2940_v17, %v9755_v1  ;;  %v6730_v42 = vadd.f32 %v2942_v16, %v9757_v35  ;;  %v9759_v39 = vld [vmem:[#allocation48_spill] sm:$0xff]  ;;  %v6742_v17 = vpop.f32.mrf.mxu1 }
 0x247   :  { %v2175_v29 = vsub.f32 %v6578_v30, %v9759_v39  ;;  %v2304_v40 = vsub.f32 %v2176_v38, %v9762_v27  ;;  %v9763_v36 = vld [vmem:[#allocation196_spill] sm:$0xff]  ;;  %v6745_v16 = vmul.f32 %v6219_v12, %v2300_v44  ;;  %v6748_v1 = vmul.f32 %v6227_v43, %v2302_v48  ;;  %v9769_v44 = vld [vmem:[#allocation190_spill] sm:$0xff] }
 0x248   :  { %9754 = vst [vmem:[#allocation40_spill] sm:$0xff] %v6724_v49  ;;  %9756 = vst [vmem:[#allocation170_spill] sm:$0xff] %v6727_v37  ;;  %v2306_v26 = vsub.f32 %v2178_v41, %v9763_v36  ;;  %v6740_v49 = vpop.f32.mrf.mxu0  ;;  %v2180_v30 = vsub.f32 %v6638_v51, %v9259_v9  ;;  %v2182_v35 = vsub.f32 %v6640_v8, %v9260_v55  ;;  %v6766_v48 = vpop.f32.mrf.mxu1  ;;  %v9771_v8 = vld [vmem:[#allocation51_spill] sm:$0xff] }
 0x249   :  { %9758 = vst [vmem:[#allocation171_spill] sm:$0xff] %v6730_v42  ;;  %9764 = vst [vmem:[#allocation167_spill] sm:$0xff] %v6745_v16  ;;  %v6755_v27 = vmul.f32 %v6359_v25, %v2297_v61  ;;  %v6758_v41 = vmul.f32 %v6367_v10, %v2297_v61  ;;  %v6761_v38 = vmul.f32 %v6375_v46, %v2299_v45  ;;  %v9773_v42 = vld [vmem:[#allocation52_spill] sm:$0xff] }
 0x24a   :  { %9765 = vst [vmem:[#allocation168_spill] sm:$0xff] %v6748_v1  ;;  %v2301_v36 = vsub.f32 %v2173_v24, %v9769_v44  ;;  %v6764_v39 = vpop.f32.mrf.mxu0  ;;  %v2303_v9 = vsub.f32 %v2175_v29, %v9770_v53  ;;  %v2944_v51 = vmul.f32 %v6256_v15, %v2304_v40  ;;  %v2946_v55 = vmul.f32 %v6262_v4, %v2306_v26  ;;  %v9774_v24 = vld [vmem:[#allocation208_spill] sm:$0xff]  ;;  %v6782_v29 = vpop.f32.mrf.mxu1 }
 0x24b   :  { %9766 = vst [vmem:[#allocation43_spill] sm:$0xff] %v6755_v27  ;;  %9767 = vst [vmem:[#allocation44_spill] sm:$0xff] %v6758_v41  ;;  %v2177_v28 = vsub.f32 %v6617_v7, %v9771_v8  ;;  %v6774_v61 = vmul.f32 %v6388_v11, %v2299_v45  ;;  %v2179_v37 = vsub.f32 %v6619_v62, %v9773_v42  ;;  %v9775_v41 = vld [vmem:[#allocation209_spill] sm:$0xff]  ;;  %v9778_v8 = vld [vmem:[#allocation290_spill] sm:$0xff] }
 0x24c   :  { %9768 = vst [vmem:[#allocation183_spill] sm:$0xff] %v6761_v38  ;;  %v2308_v44 = vsub.f32 %v2180_v30, %v9774_v24  ;;  %v2310_v58 = vsub.f32 %v2182_v35, %v9775_v41  ;;  %v6780_v50 = vpop.f32.mrf.mxu0  ;;  %v6789_v45 = vadd.f32 %v2944_v51, %v9778_v8  ;;  %v6795_v62 = vmul.f32 %v6248_v31, %v2301_v36  ;;  %v6808_v24 = vpop.f32.mrf.mxu1  ;;  %v9788_v7 = vld [vmem:[#allocation202_spill] sm:$0xff]  ;;  %v9800_v27 = vld [vmem:[#allocation221_spill] sm:$0xff] }
 0x24d   :  { %9772 = vst [vmem:[#allocation184_spill] sm:$0xff] %v6774_v61  ;;  %v9780_v61 = vld [vmem:[#allocation292_spill] sm:$0xff]  ;;  %v6798_v42 = vmul.f32 %v6290_v5, %v2301_v36  ;;  %v6801_v30 = vmul.f32 %v6306_v21, %v2304_v40  ;;  %v6804_v35 = vmul.f32 %v6314_v23, %v2306_v26  ;;  %v6811_v51 = vmul.f32 %v6276_v54, %v2303_v9  ;;  %v9789_v40 = vld [vmem:[#allocation55_spill] sm:$0xff]  ;;  %v9790_v26 = vld [vmem:[#allocation57_spill] sm:$0xff] }
 0x24e   :  { %9779 = vst [vmem:[#allocation270_spill] sm:$0xff] %v6789_v45  ;;  %v6792_v38 = vadd.f32 %v2946_v55, %v9780_v61  ;;  %9782 = vst [vmem:[#allocation176_spill] sm:$0xff] %v6795_v62  ;;  %v6806_v41 = vpop.f32.mrf.mxu0  ;;  %v9787_v55 = vld [vmem:[#allocation201_spill] sm:$0xff]  ;;  %v2948_v8 = vmul.f32 %v6180_v63, %v2308_v44  ;;  %v2950_v36 = vmul.f32 %v6186_v14, %v2310_v58  ;;  %v6825_v16 = vpop.f32.mrf.mxu1  ;;  %v9801_v62 = vld [vmem:[#allocation222_spill] sm:$0xff] }
 0x24f   :  { %9783 = vst [vmem:[#allocation177_spill] sm:$0xff] %v6798_v42  ;;  %9784 = vst [vmem:[#allocation47_spill] sm:$0xff] %v6801_v30  ;;  %v2305_v61 = vsub.f32 %v2177_v28, %v9787_v55  ;;  %v2307_v20 = vsub.f32 %v2179_v37, %v9788_v7  ;;  %v2184_v45 = vsub.f32 %v6676_v0, %v9790_v26  ;;  %v9791_v42 = vld [vmem:[#allocation58_spill] sm:$0xff]  ;;  %v9793_v55 = vld [vmem:[#allocation300_spill] sm:$0xff] }
 0x250   :  { %9781 = vst [vmem:[#allocation272_spill] sm:$0xff] %v6792_v38  ;;  %9785 = vst [vmem:[#allocation49_spill] sm:$0xff] %v6804_v35  ;;  %v2181_v38 = vsub.f32 %v6660_v33, %v9789_v40  ;;  %v2186_v1 = vsub.f32 %v6678_v52, %v9791_v42  ;;  %v6823_v3 = vpop.f32.mrf.mxu0  ;;  %v6828_v28 = vmul.f32 %v6298_v59, %v2303_v9  ;;  %v9795_v37 = vld [vmem:[#allocation304_spill] sm:$0xff] }
 0x251   :  { %9786 = vst [vmem:[#allocation50_spill] sm:$0xff] %v6811_v51  ;;  %v6831_v53 = vadd.f32 %v2948_v8, %v9793_v55  ;;  %v6834_v7 = vadd.f32 %v2950_v36, %v9795_v37  ;;  %v9797_v33 = vld [vmem:[#allocation56_spill] sm:$0xff]  ;;  %v2312_v51 = vsub.f32 %v2184_v45, %v9800_v27  ;;  %v6846_v8 = vpop.f32.mrf.mxu1  ;;  %v6849_v36 = vmul.f32 %v6359_v25, %v2305_v61  ;;  %v9804_v37 = vld [vmem:[#allocation62_spill] sm:$0xff] }
 0x252   :  { %9792 = vst [vmem:[#allocation280_spill] sm:$0xff] %v6828_v28  ;;  %v2183_v40 = vsub.f32 %v6662_v2, %v9797_v33  ;;  %v2314_v9 = vsub.f32 %v2186_v1, %v9801_v62  ;;  %v6844_v28 = vpop.f32.mrf.mxu0  ;;  %v6852_v55 = vmul.f32 %v6367_v10, %v2305_v61  ;;  %v2188_v2 = vsub.f32 %v6719_v19, %v9289_v60  ;;  %v9808_v62 = vld [vmem:[#allocation214_spill] sm:$0xff]  ;;  %v9810_v19 = vld [vmem:[#allocation215_spill] sm:$0xff]  ;;  %v9814_v35 = vld [vmem:[#allocation236_spill] sm:$0xff] }
 0x253   :  { %9794 = vst [vmem:[#allocation284_spill] sm:$0xff] %v6831_v53  ;;  %9796 = vst [vmem:[#allocation48_spill] sm:$0xff] %v6834_v7  ;;  %v2190_v33 = vsub.f32 %v6721_v22, %v9804_v37  ;;  %v6859_v27 = vmul.f32 %v6375_v46, %v2307_v20  ;;  %v6862_v1 = vmul.f32 %v6219_v12, %v2308_v44  ;;  %v6870_v61 = vpop.f32.mrf.mxu1  ;;  %v9811_v44 = vld [vmem:[#allocation59_spill] sm:$0xff] }
 0x254   :  { %9802 = vst [vmem:[#allocation195_spill] sm:$0xff] %v6849_v36  ;;  %9803 = vst [vmem:[#allocation196_spill] sm:$0xff] %v6852_v55  ;;  %v6865_v45 = vmul.f32 %v6227_v43, %v2310_v58  ;;  %v2309_v42 = vsub.f32 %v2181_v38, %v9808_v62  ;;  %v6868_v26 = vpop.f32.mrf.mxu0  ;;  %v6873_v60 = vmul.f32 %v6388_v11, %v2307_v20  ;;  %v9812_v58 = vld [vmem:[#allocation60_spill] sm:$0xff]  ;;  %v9813_v38 = vld [vmem:[#allocation235_spill] sm:$0xff] }
 0x255   :  { %9805 = vst [vmem:[#allocation190_spill] sm:$0xff] %v6859_v27  ;;  %9806 = vst [vmem:[#allocation191_spill] sm:$0xff] %v6862_v1  ;;  %v2311_v22 = vsub.f32 %v2183_v40, %v9810_v19  ;;  %v2952_v37 = vmul.f32 %v6256_v15, %v2312_v51  ;;  %v2954_v7 = vmul.f32 %v6262_v4, %v2314_v9  ;;  %v6886_v20 = vpop.f32.mrf.mxu1  ;;  %v9815_v19 = vld [vmem:[#allocation311_spill] sm:$0xff] }
 0x256   :  { %9807 = vst [vmem:[#allocation51_spill] sm:$0xff] %v6865_v45  ;;  %9809 = vst [vmem:[#allocation52_spill] sm:$0xff] %v6873_v60  ;;  %v2185_v53 = vsub.f32 %v6702_v6, %v9811_v44  ;;  %v2187_v55 = vsub.f32 %v6704_v32, %v9812_v58  ;;  %v2316_v62 = vsub.f32 %v2188_v2, %v9813_v38  ;;  %v6884_v30 = vpop.f32.mrf.mxu0  ;;  %v9826_v2 = vld [vmem:[#allocation229_spill] sm:$0xff]  ;;  %v9830_v1 = vld [vmem:[#allocation319_spill] sm:$0xff] }
 0x257   :  { %v2318_v52 = vsub.f32 %v2190_v33, %v9814_v35  ;;  %v6889_v40 = vmul.f32 %v6306_v21, %v2312_v51  ;;  %v6892_v60 = vadd.f32 %v2952_v37, %v9815_v19  ;;  %v6895_v0 = vmul.f32 %v6314_v23, %v2314_v9  ;;  %v6912_v58 = vpop.f32.mrf.mxu1  ;;  %v9825_v19 = vld [vmem:[#allocation228_spill] sm:$0xff]  ;;  %v9839_v36 = vld [vmem:[#allocation67_spill] sm:$0xff] }
 0x258   :  { %v6898_v6 = vadd.f32 %v2954_v7, %v5515_v34  ;;  %v6905_v44 = vmul.f32 %v6248_v31, %v2309_v42  ;;  %v6908_v51 = vmul.f32 %v6290_v5, %v2309_v42  ;;  %v6910_v37 = vpop.f32.mrf.mxu0  ;;  %v6915_v9 = vmul.f32 %v6276_v54, %v2311_v22  ;;  %v9827_v42 = vld [vmem:[#allocation65_spill] sm:$0xff]  ;;  %v9836_v32 = vld [vmem:[#allocation248_spill] sm:$0xff] }
 0x259   :  { %9816 = vst [vmem:[#allocation208_spill] sm:$0xff] %v6892_v60  ;;  %9817 = vst [vmem:[#allocation209_spill] sm:$0xff] %v6895_v0  ;;  %v6918_v34 = vmul.f32 %v6298_v59, %v2311_v22  ;;  %v2956_v7 = vmul.f32 %v6180_v63, %v2316_v62  ;;  %v2958_v38 = vmul.f32 %v6186_v14, %v2318_v52  ;;  %v6930_v45 = vpop.f32.mrf.mxu1  ;;  %v9828_v22 = vld [vmem:[#allocation310_spill] sm:$0xff]  ;;  %v9857_v0 = vld [vmem:[#allocation331_spill] sm:$0xff] }
 0x25a   :  { %9818 = vst [vmem:[#allocation290_spill] sm:$0xff] %v6898_v6  ;;  %9821 = vst [vmem:[#allocation292_spill] sm:$0xff] %v6905_v44  ;;  %v2313_v33 = vsub.f32 %v2185_v53, %v9825_v19  ;;  %v2315_v6 = vsub.f32 %v2187_v55, %v9826_v2  ;;  %v2192_v60 = vsub.f32 %v6764_v39, %v9827_v42  ;;  %v6928_v27 = vpop.f32.mrf.mxu0  ;;  %v9832_v55 = vld [vmem:[#allocation323_spill] sm:$0xff] }
 0x25b   :  { %9822 = vst [vmem:[#allocation201_spill] sm:$0xff] %v6908_v51  ;;  %9823 = vst [vmem:[#allocation202_spill] sm:$0xff] %v6915_v9  ;;  %v2194_v51 = vsub.f32 %v6766_v48, %v9305_v56  ;;  %v6937_v53 = vadd.f32 %v2956_v7, %v9830_v1  ;;  %v6940_v2 = vadd.f32 %v2958_v38, %v9832_v55  ;;  %v9834_v56 = vld [vmem:[#allocation63_spill] sm:$0xff]  ;;  %v6951_v44 = vpop.f32.mrf.mxu1  ;;  %v9840_v7 = vld [vmem:[#allocation68_spill] sm:$0xff] }
 0x25c   :  { %9824 = vst [vmem:[#allocation55_spill] sm:$0xff] %v6918_v34  ;;  %v6943_v39 = vmul.f32 %v6219_v12, %v2316_v62  ;;  %v2189_v48 = vsub.f32 %v6740_v49, %v9834_v56  ;;  %v9835_v19 = vld [vmem:[#allocation247_spill] sm:$0xff]  ;;  %v6949_v34 = vpop.f32.mrf.mxu0  ;;  %9838 = vst [vmem:[#allocation304_spill] sm:$0xff] %v6951_v44  ;;  %v2193_v1 = vsub.f32 %v6780_v50, %v9839_v36  ;;  %v9841_v55 = vld [vmem:[#allocation69_spill] sm:$0xff] }
 0x25d   :  { %9831 = vst [vmem:[#allocation57_spill] sm:$0xff] %v6937_v53  ;;  %9833 = vst [vmem:[#allocation58_spill] sm:$0xff] %v6940_v2  ;;  %v2320_v42 = vsub.f32 %v2192_v60, %v9835_v19  ;;  %v2322_v9 = vsub.f32 %v2194_v51, %v9836_v32  ;;  %v2195_v38 = vsub.f32 %v6782_v29, %v9840_v7  ;;  %v9842_v2 = vld [vmem:[#allocation70_spill] sm:$0xff]  ;;  %v9844_v56 = vld [vmem:[#allocation64_spill] sm:$0xff]  ;;  %v6974_v29 = vpop.f32.mrf.mxu1 }
 0x25e   :  { %9837 = vst [vmem:[#allocation300_spill] sm:$0xff] %v6949_v34  ;;  %v2196_v62 = vsub.f32 %v6806_v41, %v9841_v55  ;;  %v2198_v49 = vsub.f32 %v6808_v24, %v9842_v2  ;;  %v6962_v60 = vmul.f32 %v6359_v25, %v2313_v33  ;;  %v6965_v32 = vmul.f32 %v6367_v10, %v2313_v33  ;;  %v6972_v36 = vpop.f32.mrf.mxu0  ;;  %v9848_v19 = vld [vmem:[#allocation255_spill] sm:$0xff]  ;;  %v9849_v7 = vld [vmem:[#allocation256_spill] sm:$0xff]  ;;  %v9850_v53 = vld [vmem:[#allocation262_spill] sm:$0xff] }
 0x25f   :  { %v6968_v51 = vmul.f32 %v6227_v43, %v2318_v52  ;;  %v2191_v50 = vsub.f32 %v6742_v17, %v9844_v56  ;;  %9845 = vst [vmem:[#allocation221_spill] sm:$0xff] %v6972_v36  ;;  %9846 = vst [vmem:[#allocation222_spill] sm:$0xff] %v6974_v29  ;;  %v6977_v41 = vmul.f32 %v6375_v46, %v2315_v6  ;;  %v9851_v56 = vld [vmem:[#allocation263_spill] sm:$0xff]  ;;  %v6992_v36 = vpop.f32.mrf.mxu1  ;;  %v9856_v44 = vld [vmem:[#allocation241_spill] sm:$0xff] }
 0x260   :  { %9843 = vst [vmem:[#allocation56_spill] sm:$0xff] %v6965_v32  ;;  %v6980_v24 = vmul.f32 %v6388_v11, %v2315_v6  ;;  %v2960_v2 = vmul.f32 %v6256_v15, %v2320_v42  ;;  %v2962_v33 = vmul.f32 %v6262_v4, %v2322_v9  ;;  %v2321_v52 = vsub.f32 %v2193_v1, %v9848_v19  ;;  %v6990_v29 = vpop.f32.mrf.mxu0  ;;  %v9855_v6 = vld [vmem:[#allocation66_spill] sm:$0xff] }
 0x261   :  { %v2323_v55 = vsub.f32 %v2195_v38, %v9849_v7  ;;  %v2324_v17 = vsub.f32 %v2196_v62, %v9850_v53  ;;  %v6988_v32 = vsub.f32 %v2198_v49, %v9851_v56  ;;  %9853 = vst [vmem:[#allocation215_spill] sm:$0xff] %v6990_v29  ;;  %9854 = vst [vmem:[#allocation59_spill] sm:$0xff] %v6992_v36  ;;  %v9859_v1 = vld [vmem:[#allocation334_spill] sm:$0xff]  ;;  %v9861_v53 = vld [vmem:[#allocation320_spill] sm:$0xff] }
 0x262   :  { %9847 = vst [vmem:[#allocation62_spill] sm:$0xff] %v6980_v24  ;;  %v2317_v34 = vsub.f32 %v2189_v48, %v9856_v44  ;;  %v6998_v35 = vadd.f32 %v2960_v2, %v9857_v0  ;;  %v7001_v19 = vadd.f32 %v2962_v33, %v9859_v1  ;;  %v9862_v62 = vld [vmem:[#allocation242_spill] sm:$0xff]  ;;  %v2576_v7 = vmul.f32 %v6306_v21, %v2320_v42  ;;  %v7008_v36 = vpop.f32.mrf.mxu0  ;;  %v7010_v24 = vpop.f32.mrf.mxu1  ;;  %v9865_v42 = vld [vmem:[#allocation71_spill] sm:$0xff]  ;;  %v9866_v33 = vld [vmem:[#allocation72_spill] sm:$0xff] }
 0x263   :  { %9852 = vst [vmem:[#allocation214_spill] sm:$0xff] %v6988_v32  ;;  %v2319_v49 = vsub.f32 %v2191_v50, %v9862_v62  ;;  %v2578_v56 = vmul.f32 %v6314_v23, %v2322_v9  ;;  %9863 = vst [vmem:[#allocation236_spill] sm:$0xff] %v7008_v36  ;;  %v2577_v44 = vmul.f32 %v6359_v25, %v2321_v52  ;;  %v130_v50 = vld [vmem:[%s8551_s3 + $0x8] sm:$0xff] }
 0x264   :  { %9858 = vst [vmem:[#allocation60_spill] sm:$0xff] %v6998_v35  ;;  %9860 = vst [vmem:[#allocation235_spill] sm:$0xff] %v7001_v19  ;;  %v2579_v0 = vmul.f32 %v6375_v46, %v2323_v55  ;;  %v2964_v48 = vmul.f32 %v6180_v63, %v2324_v17  ;;  %v2966_v2 = vmul.f32 %v6186_v14, %v6988_v32  ;;  %v9867_v62 = vld [vmem:[#allocation73_spill] sm:$0xff]  ;;  %v7028_v35 = vpop.f32.mrf.mxu0  ;;  %3220 = vmatprep.mubr.f32.mxu0 %v130_v50 }
 0x265   :  { %9864 = vst [vmem:[#allocation311_spill] sm:$0xff] %v7010_v24  ;;  %v2197_v9 = vsub.f32 %v6823_v3, %v9865_v42  ;;  %v2199_v1 = vsub.f32 %v6825_v16, %v9866_v33  ;;  %v2200_v38 = vsub.f32 %v6844_v28, %v9867_v62  ;;  %v2202_v19 = vsub.f32 %v6846_v8, %v9337_v13  ;;  %v9873_v13 = vld [vmem:[#allocation275_spill] sm:$0xff]  ;;  %v9874_v42 = vld [vmem:[#allocation276_spill] sm:$0xff]  ;;  %v7046_v62 = vpop.f32.mrf.mxu1 }
 0x266   :  { %9868 = vst [vmem:[#allocation228_spill] sm:$0xff] %v7028_v35  ;;  %v2573_v32 = vmul.f32 %v6248_v31, %v2317_v34  ;;  %v7032_v24 = vmul.f32 %v6290_v5, %v2317_v34  ;;  %v7035_v36 = vadd.f32 %v2964_v48, %v5623_v18  ;;  %v7038_v3 = vadd.f32 %v2966_v2, %v5635_v47  ;;  %v9875_v34 = vld [vmem:[#allocation45_spill] sm:$0xff]  ;;  %v9876_v35 = vld [vmem:[#allocation75_spill] sm:$0xff]  ;;  %v9878_v2 = vld [vmem:[#allocation340_spill] sm:$0xff] }
 0x267   :  { %3297 = vmatprep.mubr.f32.mxu1 %v130_v50  ;;  %v2575_v16 = vmul.f32 %v6276_v54, %v2319_v49  ;;  %v7042_v28 = vmul.f32 %v6298_v59, %v2319_v49  ;;  %v2328_v8 = vsub.f32 %v2200_v38, %v9873_v13  ;;  %v2330_v33 = vsub.f32 %v2202_v19, %v9874_v42  ;;  %v9877_v48 = vld [vmem:[#allocation335_spill] sm:$0xff]  ;;  %v9882_v19 = vld [vmem:[#allocation46_spill] sm:$0xff]  ;;  %v7076_v42 = vpop.f32.mrf.mxu1 }
 0x268   :  { %9869 = vst [vmem:[#allocation229_spill] sm:$0xff] %v7032_v24  ;;  %9870 = vst [vmem:[#allocation65_spill] sm:$0xff] %v7035_v36  ;;  %v2325_v24 = vsub.f32 %v2197_v9, %v9875_v34  ;;  %v2201_v18 = vsub.f32 %v6868_v26, %v9876_v35  ;;  %v2705_v47 = vsub.f32 %v9877_v48, %v2577_v44  ;;  %v9879_v36 = vld [vmem:[#allocation328_spill] sm:$0xff] }
 0x269   :  { %9871 = vst [vmem:[#allocation310_spill] sm:$0xff] %v7038_v3  ;;  %9872 = vst [vmem:[#allocation319_spill] sm:$0xff] %v7042_v28  ;;  %v2707_v50 = vsub.f32 %v9878_v2, %v2579_v0  ;;  %v7053_v3 = vpop.f32.mrf.mxu0  ;;  %v2704_v49 = vsub.f32 %v9879_v36, %v2576_v7  ;;  %v9880_v28 = vld [vmem:[#allocation332_spill] sm:$0xff]  ;;  %v7058_v38 = vmul.f32 %v6367_v10, %v2321_v52  ;;  %v9886_v7 = vld [vmem:[#allocation282_spill] sm:$0xff] }
 0x26a   :  { %v2706_v29 = vsub.f32 %v9880_v28, %v2578_v56  ;;  %v2327_v13 = vsub.f32 %v2199_v1, %v9882_v19  ;;  %v7062_v9 = vmul.f32 %v6388_v11, %v2323_v55  ;;  %v2968_v26 = vmul.f32 %v6256_v15, %v2328_v8  ;;  %v9884_v44 = vld [vmem:[#allocation76_spill] sm:$0xff]  ;;  %3156 = vmatprep.subr.mxu0 %v2705_v47  ;;  %v9887_v52 = vld [vmem:[#allocation77_spill] sm:$0xff]  ;;  %v9888_v28 = vld [vmem:[#allocation78_spill] sm:$0xff] }
 0x26b   :  { %9881 = vst [vmem:[#allocation323_spill] sm:$0xff] %v7058_v38  ;;  %v2970_v35 = vmul.f32 %v6262_v4, %v2330_v33  ;;  %v2203_v0 = vsub.f32 %v6870_v61, %v9884_v44  ;;  %v7069_v36 = vmul.f32 %v6219_v12, %v2324_v17  ;;  %v2329_v56 = vsub.f32 %v2201_v18, %v9886_v7  ;;  %v9891_v48 = vld [vmem:[#allocation348_spill] sm:$0xff]  ;;  %v7090_v2 = vpop.f32.mrf.mxu0  ;;  %v9899_v19 = vld [vmem:[#allocation283_spill] sm:$0xff] }
 0x26c   :  { %9883 = vst [vmem:[#allocation63_spill] sm:$0xff] %v7062_v9  ;;  %3233 = vmatprep.subr.mxu1 %v2707_v50  ;;  %v2204_v1 = vsub.f32 %v6884_v30, %v9887_v52  ;;  %v2206_v55 = vsub.f32 %v6886_v20, %v9888_v28  ;;  %v7079_v34 = vmul.f32 %v6248_v31, %v2325_v24  ;;  %v9893_v47 = vld [vmem:[#allocation352_spill] sm:$0xff]  ;;  %v10136_v38 = vld [vmem:[#allocation103_spill] sm:$0xff] }
 0x26d   :  { %9885 = vst [vmem:[#allocation247_spill] sm:$0xff] %v7069_v36  ;;  %v7082_v61 = vmul.f32 %v6290_v5, %v2325_v24  ;;  %v7085_v17 = vadd.f32 %v2968_v26, %v9891_v48  ;;  %v7088_v18 = vadd.f32 %v2970_v35, %v9893_v47  ;;  %3157 = vmatpush1.msra.mxu0 %v2704_v49  ;;  %v9900_v35 = vld [vmem:[#allocation53_spill] sm:$0xff]  ;;  %v9901_v49 = vld [vmem:[#allocation54_spill] sm:$0xff]  ;;  %v9902_v52 = vld [vmem:[#allocation324_spill] sm:$0xff] }
 0x26e   :  { %9889 = vst [vmem:[#allocation248_spill] sm:$0xff] %v7079_v34  ;;  %v7093_v30 = vmul.f32 %v6276_v54, %v2327_v13  ;;  %v7096_v20 = vmul.f32 %v6298_v59, %v2327_v13  ;;  %v7099_v50 = vmul.f32 %v6306_v21, %v2328_v8  ;;  %v7102_v24 = vmul.f32 %v6314_v23, %v2330_v33  ;;  %v9904_v13 = vld [vmem:[#allocation326_spill] sm:$0xff] }
 0x26f   :  { %9890 = vst [vmem:[#allocation67_spill] sm:$0xff] %v7082_v61  ;;  %9892 = vst [vmem:[#allocation68_spill] sm:$0xff] %v7085_v17  ;;  %3234 = vmatpush1.msra.mxu1 %v2706_v29  ;;  %v2331_v26 = vsub.f32 %v2203_v0, %v9899_v19  ;;  %v2332_v44 = vsub.f32 %v2204_v1, %v9900_v35  ;;  %v2334_v7 = vsub.f32 %v2206_v55, %v9901_v49  ;;  %v9906_v17 = vld [vmem:[#allocation80_spill] sm:$0xff]  ;;  %v7116_v29 = vpop.f32.mrf.mxu1  ;;  %v9912_v19 = vld [vmem:[#allocation81_spill] sm:$0xff] }
 0x270   :  { %9894 = vst [vmem:[#allocation69_spill] sm:$0xff] %v7088_v18  ;;  %9895 = vst [vmem:[#allocation70_spill] sm:$0xff] %v7093_v30  ;;  %v2701_v28 = vsub.f32 %v9902_v52, %v2573_v32  ;;  %v7109_v48 = vmul.f32 %v6359_v25, %v2329_v56  ;;  %v2703_v47 = vsub.f32 %v9904_v13, %v2575_v16  ;;  %v9905_v18 = vld [vmem:[#allocation79_spill] sm:$0xff]  ;;  %v7126_v16 = vpop.f32.mrf.mxu0  ;;  %v10018_v36 = vld [vmem:[#allocation330_spill] sm:$0xff] }
 0x271   :  { %9896 = vst [vmem:[#allocation64_spill] sm:$0xff] %v7096_v20  ;;  %9897 = vst [vmem:[#allocation255_spill] sm:$0xff] %v7099_v50  ;;  %v2205_v8 = vsub.f32 %v6910_v37, %v9905_v18  ;;  %v2207_v33 = vsub.f32 %v6912_v58, %v9906_v17  ;;  %v7119_v0 = vmul.f32 %v6367_v10, %v2329_v56  ;;  %v9909_v37 = vld [vmem:[#allocation295_spill] sm:$0xff]  ;;  %v9911_v56 = vld [vmem:[#allocation313_spill] sm:$0xff] }
 0x272   :  { %9898 = vst [vmem:[#allocation256_spill] sm:$0xff] %v7102_v24  ;;  %9903 = vst [vmem:[#allocation262_spill] sm:$0xff] %v7109_v48  ;;  %v7122_v1 = vmul.f32 %v6219_v12, %v2332_v44  ;;  %v2972_v32 = vmul.f32 %v6180_v63, %v2332_v44  ;;  %v2974_v55 = vmul.f32 %v6186_v14, %v2334_v7  ;;  %3158 = vmatprep.subr.mxu0 %v2701_v28  ;;  %v9915_v44 = vld [vmem:[#allocation361_spill] sm:$0xff]  ;;  %v10021_v20 = vld [vmem:[#allocation91_spill] sm:$0xff] }
 0x273   :  { %9907 = vst [vmem:[#allocation263_spill] sm:$0xff] %v7119_v0  ;;  %3235 = vmatprep.subr.mxu1 %v2703_v47  ;;  %v2333_v18 = vsub.f32 %v2205_v8, %v9909_v37  ;;  %v9910_v58 = vsub.f32 %v9855_v6, %v6943_v39  ;;  %v2697_v17 = vsub.f32 %v9911_v56, %v6962_v60  ;;  %v9918_v39 = vld [vmem:[#allocation317_spill] sm:$0xff]  ;;  %v7159_v8 = vpop.f32.mrf.mxu1 }
 0x274   :  { %9908 = vst [vmem:[#allocation66_spill] sm:$0xff] %v7122_v1  ;;  %v2208_v35 = vsub.f32 %v6928_v27, %v9912_v19  ;;  %v7137_v63 = vmul.f32 %v6375_v46, %v2331_v26  ;;  %v7140_v14 = vadd.f32 %v2972_v32, %v5693_v57  ;;  %v7143_v49 = vadd.f32 %v2974_v55, %v9915_v44  ;;  %v9922_v57 = vld [vmem:[#allocation296_spill] sm:$0xff]  ;;  %v9924_v32 = vld [vmem:[#allocation82_spill] sm:$0xff]  ;;  %v9927_v37 = vld [vmem:[#allocation305_spill] sm:$0xff] }
 0x275   :  { %3159 = vmatpush1.msra.mxu0 %v9910_v58  ;;  %v9917_v52 = vsub.f32 %v9861_v53, %v6968_v51  ;;  %v2699_v6 = vsub.f32 %v9918_v39, %v6977_v41  ;;  %v7151_v60 = vmul.f32 %v6388_v11, %v2331_v26  ;;  %v7156_v13 = vmul.f32 %v6227_v43, %v2334_v7  ;;  %v9923_v51 = vld [vmem:[#allocation302_spill] sm:$0xff]  ;;  %v9926_v55 = vld [vmem:[#allocation292_spill] sm:$0xff]  ;;  %v7169_v43 = vpop.f32.mrf.mxu0  ;;  %v9930_v56 = vld [vmem:[#allocation209_spill] sm:$0xff] }
 0x276   :  { %9913 = vst [vmem:[#allocation241_spill] sm:$0xff] %v7137_v63  ;;  %9914 = vst [vmem:[#allocation331_spill] sm:$0xff] %v7140_v14  ;;  %v2335_v47 = vsub.f32 %v2207_v33, %v9922_v57  ;;  %3160 = vmatprep.subr.mxu0 %v2697_v17  ;;  %v2336_v53 = vsub.f32 %v2208_v35, %v9923_v51  ;;  %v2210_v41 = vsub.f32 %v6930_v45, %v9924_v32  ;;  %v9929_v33 = vld [vmem:[#allocation312_spill] sm:$0xff]  ;;  %v9932_v19 = vld [vmem:[#allocation202_spill] sm:$0xff] }
 0x277   :  { %9916 = vst [vmem:[#allocation334_spill] sm:$0xff] %v7143_v49  ;;  %3236 = vmatpush1.msra.mxu1 %v9917_v52  ;;  %9919 = vst [vmem:[#allocation320_spill] sm:$0xff] %v7151_v60  ;;  %v9925_v26 = vsub.f32 %v9828_v22, %v6889_v40  ;;  %v2693_v58 = vsub.f32 %v9927_v37, %v9926_v55  ;;  %v7172_v7 = vmul.f32 %v6248_v31, %v2333_v18  ;;  %v9933_v35 = vld [vmem:[#allocation307_spill] sm:$0xff]  ;;  %v9935_v52 = vld [vmem:[#allocation300_spill] sm:$0xff] }
 0x278   :  { %9921 = vst [vmem:[#allocation242_spill] sm:$0xff] %v7156_v13  ;;  %3237 = vmatprep.subr.mxu1 %v2699_v6  ;;  %v9931_v17 = vsub.f32 %v9929_v33, %v9930_v56  ;;  %v2695_v44 = vsub.f32 %v9933_v35, %v9932_v19  ;;  %v9934_v45 = vld [vmem:[#allocation83_spill] sm:$0xff]  ;;  %v9936_v40 = vld [vmem:[#allocation84_spill] sm:$0xff]  ;;  %v7184_v57 = vmul.f32 %v6290_v5, %v2333_v18  ;;  %v9941_v55 = vld [vmem:[#allocation61_spill] sm:$0xff] }
 0x279   :  { %3161 = vmatpush1.msra.mxu0 %v9925_v26  ;;  %9928 = vst [vmem:[#allocation71_spill] sm:$0xff] %v7172_v7  ;;  %v2209_v39 = vsub.f32 %v9935_v52, %v9934_v45  ;;  %v9937_v22 = vld [vmem:[#allocation304_spill] sm:$0xff]  ;;  %v7187_v51 = vmul.f32 %v6306_v21, %v2336_v53  ;;  %v2976_v31 = vmul.f32 %v6256_v15, %v2336_v53  ;;  %v9940_v32 = vld [vmem:[#allocation303_spill] sm:$0xff]  ;;  %v9946_v35 = vld [vmem:[#allocation293_spill] sm:$0xff]  ;;  %v7199_v21 = vpop.f32.mrf.mxu1 }
 0x27a   :  { %3238 = vmatpush1.msra.mxu1 %v9931_v17  ;;  %v2211_v6 = vsub.f32 %v9937_v22, %v9936_v40  ;;  %9938 = vst [vmem:[#allocation72_spill] sm:$0xff] %v7184_v57  ;;  %v2338_v26 = vsub.f32 %v2210_v41, %v9940_v32  ;;  %3162 = vmatprep.subr.mxu0 %v2693_v58  ;;  %v9942_v33 = vld [vmem:[#allocation299_spill] sm:$0xff]  ;;  %v9947_v5 = vld [vmem:[#allocation85_spill] sm:$0xff]  ;;  %v9955_v22 = vld [vmem:[#allocation190_spill] sm:$0xff] }
 0x27b   :  { %9939 = vst [vmem:[#allocation73_spill] sm:$0xff] %v7187_v51  ;;  %3239 = vmatprep.subr.mxu1 %v2695_v44  ;;  %v2337_v37 = vsub.f32 %v2209_v39, %v9941_v55  ;;  %v9943_v56 = vld [vmem:[#allocation191_spill] sm:$0xff]  ;;  %v9948_v18 = vld [vmem:[#allocation221_spill] sm:$0xff]  ;;  %v7202_v15 = vmul.f32 %v6276_v54, %v2335_v47  ;;  %v9999_v14 = vld [vmem:[#allocation168_spill] sm:$0xff] }
 0x27c   :  { %v9944_v17 = vsub.f32 %v9942_v33, %v9943_v56  ;;  %v9945_v19 = vld [vmem:[#allocation195_spill] sm:$0xff]  ;;  %v2212_v52 = vsub.f32 %v9948_v18, %v9947_v5  ;;  %v9950_v53 = vld [vmem:[#allocation369_spill] sm:$0xff]  ;;  %v2978_v58 = vmul.f32 %v6262_v4, %v2338_v26  ;;  %v7213_v33 = vpop.f32.mrf.mxu0  ;;  %v7216_v56 = vmul.f32 %v6298_v59, %v2335_v47  ;;  %v9965_v59 = vld [vmem:[#allocation86_spill] sm:$0xff] }
 0x27d   :  { %v2689_v45 = vsub.f32 %v9946_v35, %v9945_v19  ;;  %9949 = vst [vmem:[#allocation275_spill] sm:$0xff] %v7202_v15  ;;  %v7205_v41 = vadd.f32 %v2976_v31, %v9950_v53  ;;  %v9952_v44 = vld [vmem:[#allocation301_spill] sm:$0xff]  ;;  %v9953_v39 = vld [vmem:[#allocation51_spill] sm:$0xff]  ;;  %v7221_v31 = vmul.f32 %v6314_v23, %v2338_v26  ;;  %v7228_v18 = vmul.f32 %v6359_v25, %v2337_v37  ;;  %v9964_v53 = vld [vmem:[#allocation314_spill] sm:$0xff] }
 0x27e   :  { %3163 = vmatpush1.msra.mxu0 %v9944_v17  ;;  %v9954_v40 = vsub.f32 %v9952_v44, %v9953_v39  ;;  %v9956_v32 = vld [vmem:[#allocation297_spill] sm:$0xff]  ;;  %9957 = vst [vmem:[#allocation45_spill] sm:$0xff] %v7216_v56  ;;  %v2340_v44 = vsub.f32 %v2212_v52, %v9964_v53  ;;  %v9966_v47 = vld [vmem:[#allocation222_spill] sm:$0xff]  ;;  %v9970_v23 = vld [vmem:[#allocation291_spill] sm:$0xff]  ;;  %v7245_v53 = vpop.f32.mrf.mxu1 }
 0x27f   :  { %9951 = vst [vmem:[#allocation276_spill] sm:$0xff] %v7205_v41  ;;  %v2691_v55 = vsub.f32 %v9956_v32, %v9955_v22  ;;  %9959 = vst [vmem:[#allocation75_spill] sm:$0xff] %v7221_v31  ;;  %v9960_v19 = vld [vmem:[#allocation309_spill] sm:$0xff]  ;;  %3164 = vmatprep.subr.mxu0 %v2689_v45  ;;  %v2214_v39 = vsub.f32 %v9966_v47, %v9965_v59  ;;  %v9968_v22 = vld [vmem:[#allocation47_spill] sm:$0xff]  ;;  %v7248_v59 = vmul.f32 %v6367_v10, %v2337_v37 }
 0x280   :  { %3240 = vmatpush1.msra.mxu1 %v9954_v40  ;;  %v2339_v4 = vsub.f32 %v2211_v6, %v9960_v19  ;;  %v9961_v35 = vld [vmem:[#allocation373_spill] sm:$0xff]  ;;  %9963 = vst [vmem:[#allocation340_spill] sm:$0xff] %v7228_v18  ;;  %v9973_v45 = vld [vmem:[#allocation176_spill] sm:$0xff]  ;;  %v9976_v25 = vld [vmem:[#allocation287_spill] sm:$0xff]  ;;  %v7251_v47 = vmul.f32 %v6219_v12, %v2340_v44  ;;  %v7294_v41 = vpop.f32.mrf.mxu1 }
 0x281   :  { %v7225_v5 = vadd.f32 %v2978_v58, %v9961_v35  ;;  %3241 = vmatprep.subr.mxu1 %v2691_v55  ;;  %v9967_v40 = vld [vmem:[#allocation289_spill] sm:$0xff]  ;;  %v9975_v35 = vld [vmem:[#allocation50_spill] sm:$0xff]  ;;  %v9977_v55 = vld [vmem:[#allocation87_spill] sm:$0xff]  ;;  %9979 = vst [vmem:[#allocation328_spill] sm:$0xff] %v7248_v59 }
 0x282   :  { %v9969_v32 = vsub.f32 %v9967_v40, %v9968_v22  ;;  %v9971_v26 = vld [vmem:[#allocation49_spill] sm:$0xff]  ;;  %v2687_v28 = vsub.f32 %v9976_v25, %v9975_v35  ;;  %v9978_v17 = vld [vmem:[#allocation215_spill] sm:$0xff]  ;;  %9980 = vst [vmem:[#allocation332_spill] sm:$0xff] %v7251_v47  ;;  %v7256_v40 = vld [vmem:[%s8552_s4] sm:$0xff]  ;;  %v7268_v25 = vmul.f32 %v6375_v46, %v2339_v4 }
 0x283   :  { %9962 = vst [vmem:[#allocation335_spill] sm:$0xff] %v7225_v5  ;;  %v9972_v6 = vsub.f32 %v9970_v23, %v9971_v26  ;;  %v9974_v58 = vld [vmem:[#allocation285_spill] sm:$0xff]  ;;  %v2213_v52 = vsub.f32 %v9978_v17, %v9977_v55  ;;  %v2980_v22 = vmul.f32 %v7256_v40, %v2340_v44  ;;  %v7260_v26 = vpop.f32.mrf.mxu0  ;;  %v9983_v10 = vld [vmem:[#allocation88_spill] sm:$0xff]  ;;  %v9984_v37 = vld [vmem:[#allocation59_spill] sm:$0xff] }
 0x284   :  { %3165 = vmatpush1.msra.mxu0 %v9969_v32  ;;  %v2685_v19 = vsub.f32 %v9974_v58, %v9973_v45  ;;  %v9981_v32 = vld [vmem:[#allocation315_spill] sm:$0xff]  ;;  %v9982_v17 = vld [vmem:[#allocation321_spill] sm:$0xff]  ;;  %v2215_v45 = vsub.f32 %v9984_v37, %v9983_v10  ;;  %9987 = vst [vmem:[#allocation46_spill] sm:$0xff] %v7268_v25  ;;  %v7276_v44 = vld [vmem:[%s8552_s4 + $0x10] sm:$0xff] }
 0x285   :  { %3242 = vmatpush1.msra.mxu1 %v9972_v6  ;;  %v2342_v23 = vsub.f32 %v2214_v39, %v9981_v32  ;;  %v2341_v6 = vsub.f32 %v2213_v52, %v9982_v17  ;;  %v9985_v12 = vld [vmem:[#allocation43_spill] sm:$0xff]  ;;  %v9986_v58 = vld [vmem:[#allocation273_spill] sm:$0xff]  ;;  %v10019_v31 = vld [vmem:[#allocation264_spill] sm:$0xff] }
 0x286   :  { %3166 = vmatprep.subr.mxu0 %v2685_v19  ;;  %3243 = vmatprep.subr.mxu1 %v2687_v28  ;;  %v2681_v35 = vsub.f32 %v9986_v58, %v9985_v12  ;;  %v9988_v55 = vld [vmem:[#allocation381_spill] sm:$0xff]  ;;  %v9990_v39 = vld [vmem:[#allocation279_spill] sm:$0xff]  ;;  %v10008_v58 = vld [vmem:[#allocation322_spill] sm:$0xff] }
 0x287   :  { %v7271_v49 = vadd.f32 %v2980_v22, %v9988_v55  ;;  %v2982_v28 = vmul.f32 %v7276_v44, %v2342_v23  ;;  %v9991_v19 = vld [vmem:[#allocation167_spill] sm:$0xff]  ;;  %v9994_v17 = vld [vmem:[#allocation277_spill] sm:$0xff]  ;;  %v7287_v22 = vmul.f32 %v6388_v11, %v2339_v4  ;;  %v10035_v1 = vld [vmem:[#allocation36_spill] sm:$0xff] }
 0x288   :  { %v9992_v52 = vsub.f32 %v9990_v39, %v9991_v19  ;;  %v9993_v32 = vld [vmem:[#allocation183_spill] sm:$0xff]  ;;  %v9998_v55 = vld [vmem:[#allocation281_spill] sm:$0xff]  ;;  %v7299_v39 = vld [vmem:[%s8553_s5 + $0x10] sm:$0xff] }
 0x289   :  { %9989 = vst [vmem:[#allocation76_spill] sm:$0xff] %v7271_v49  ;;  %v2683_v10 = vsub.f32 %v9994_v17, %v9993_v32  ;;  %9996 = vst [vmem:[#allocation282_spill] sm:$0xff] %v7287_v22  ;;  %v10000_v5 = vsub.f32 %v9998_v55, %v9999_v14  ;;  %v7302_v19 = vmul.f32 %v7299_v39, %v2342_v23  ;;  %v10002_v11 = vld [vmem:[#allocation383_spill] sm:$0xff]  ;;  %v10005_v32 = vld [vmem:[#allocation236_spill] sm:$0xff]  ;;  %v7311_v55 = vpop.f32.mrf.mxu0 }
 0x28a   :  { %3167 = vmatpush1.msra.mxu0 %v9992_v52  ;;  %v7305_v4 = vadd.f32 %v2982_v28, %v10002_v11  ;;  %v10004_v52 = vld [vmem:[#allocation89_spill] sm:$0xff]  ;;  %v10006_v14 = vld [vmem:[#allocation90_spill] sm:$0xff]  ;;  %v2343_v28 = vsub.f32 %v2215_v45, %v10008_v58  ;;  %v10020_v46 = vld [vmem:[#allocation267_spill] sm:$0xff] }
 0x28b   :  { %3244 = vmatpush1.msra.mxu1 %v10000_v5  ;;  %3168 = vmatprep.subr.mxu0 %v2681_v35  ;;  %10001 = vst [vmem:[#allocation77_spill] sm:$0xff] %v7302_v19  ;;  %v2216_v17 = vsub.f32 %v10005_v32, %v10004_v52  ;;  %v10007_v5 = vld [vmem:[#allocation311_spill] sm:$0xff]  ;;  %v7316_v37 = vld [vmem:[%s8553_s5 + $0x8] sm:$0xff]  ;;  %v10013_v32 = vld [vmem:[#allocation260_spill] sm:$0xff]  ;;  %v2679_v13 = vsub.f32 %v10020_v46, %v10019_v31  ;;  %v7350_v46 = vpop.f32.mrf.mxu1 }
 0x28c   :  { %10003 = vst [vmem:[#allocation78_spill] sm:$0xff] %v7305_v4  ;;  %3245 = vmatprep.subr.mxu1 %v2683_v10  ;;  %v2218_v35 = vsub.f32 %v10007_v5, %v10006_v14  ;;  %v7319_v23 = vmul.f32 %v7316_v37, %v2341_v6  ;;  %v10009_v11 = vld [vmem:[#allocation269_spill] sm:$0xff]  ;;  %v10010_v10 = vld [vmem:[#allocation42_spill] sm:$0xff]  ;;  %v10012_v52 = vld [vmem:[#allocation271_spill] sm:$0xff] }
 0x28d   :  { %v10011_v4 = vsub.f32 %v10009_v11, %v10010_v10  ;;  %v10014_v49 = vsub.f32 %v10012_v52, %v10013_v32  ;;  %v10015_v14 = vld [vmem:[#allocation39_spill] sm:$0xff]  ;;  %v10016_v5 = vld [vmem:[#allocation265_spill] sm:$0xff]  ;;  %v10022_v45 = vld [vmem:[#allocation228_spill] sm:$0xff] }
 0x28e   :  { %v2677_v30 = vsub.f32 %v10016_v5, %v10015_v14  ;;  %v10017_v24 = vld [vmem:[#allocation329_spill] sm:$0xff]  ;;  %v2346_v34 = vsub.f32 %v2218_v35, %v10018_v36  ;;  %v2217_v58 = vsub.f32 %v10022_v45, %v10021_v20  ;;  %v10024_v11 = vld [vmem:[#allocation92_spill] sm:$0xff]  ;;  %v7377_v32 = vld [vmem:[%s8552_s4 + $0x30] sm:$0xff]  ;;  %v7380_v5 = vpop.f32.mrf.mxu0 }
 0x28f   :  { %3169 = vmatpush1.msra.mxu0 %v10011_v4  ;;  %3246 = vmatpush1.msra.mxu1 %v10014_v49  ;;  %v2344_v63 = vsub.f32 %v2216_v17, %v10017_v24  ;;  %v7339_v4 = vld [vmem:[%s8552_s4 + $0x8] sm:$0xff]  ;;  %v2219_v24 = vsub.f32 %v7046_v62, %v10024_v11  ;;  %v7355_v20 = vld [vmem:[%s8553_s5 + $0x20] sm:$0xff]  ;;  %v10031_v11 = vld [vmem:[#allocation259_spill] sm:$0xff] }
 0x290   :  { %v7342_v49 = vmul.f32 %v7339_v4, %v2341_v6  ;;  %3170 = vmatprep.subr.mxu0 %v2677_v30  ;;  %v10025_v17 = vld [vmem:[#allocation165_spill] sm:$0xff]  ;;  %v7363_v62 = vld [vmem:[%s8552_s4 + $0x20] sm:$0xff]  ;;  %v2986_v14 = vmul.f32 %v7377_v32, %v2346_v34  ;;  %3247 = vmatprep.subr.mxu1 %v2679_v13  ;;  %v10037_v15 = vld [vmem:[#allocation250_spill] sm:$0xff]  ;;  %v7440_v19 = vpop.f32.mrf.mxu0 }
 0x291   :  { %v10026_v36 = vld [vmem:[#allocation253_spill] sm:$0xff]  ;;  %v7358_v6 = vmul.f32 %v7355_v20, %v2344_v63  ;;  %v2984_v30 = vmul.f32 %v7363_v62, %v2344_v63  ;;  %v10039_v60 = vld [vmem:[#allocation342_spill] sm:$0xff]  ;;  %v10040_v45 = vld [vmem:[#allocation391_spill] sm:$0xff] }
 0x292   :  { %10023 = vst [vmem:[#allocation348_spill] sm:$0xff] %v7342_v49  ;;  %v2673_v35 = vsub.f32 %v10026_v36, %v10025_v17  ;;  %v10027_v10 = vld [vmem:[#allocation93_spill] sm:$0xff]  ;;  %v10032_v17 = vld [vmem:[#allocation35_spill] sm:$0xff]  ;;  %v10057_v63 = vld [vmem:[#allocation240_spill] sm:$0xff] }
 0x293   :  { %v2220_v31 = vsub.f32 %v7053_v3, %v10027_v10  ;;  %10028 = vst [vmem:[#allocation352_spill] sm:$0xff] %v7358_v6  ;;  %v7369_v3 = vld [vmem:[%s8553_s5 + $0x30] sm:$0xff]  ;;  %v10033_v36 = vsub.f32 %v10031_v11, %v10032_v17  ;;  %v10034_v10 = vld [vmem:[#allocation261_spill] sm:$0xff]  ;;  %v7402_v11 = vadd.f32 %v2984_v30, %v10040_v45  ;;  %v10042_v17 = vld [vmem:[#allocation395_spill] sm:$0xff] }
 0x294   :  { %v7372_v52 = vmul.f32 %v7369_v3, %v2346_v34  ;;  %v10036_v27 = vsub.f32 %v10034_v10, %v10035_v1  ;;  %v10038_v50 = vld [vmem:[#allocation257_spill] sm:$0xff]  ;;  %v7396_v34 = vld [vmem:[%s8553_s5 + $0x18] sm:$0xff]  ;;  %v10048_v10 = vld [vmem:[#allocation338_spill] sm:$0xff] }
 0x295   :  { %3171 = vmatpush1.msra.mxu0 %v10033_v36  ;;  %v2675_v61 = vsub.f32 %v10038_v50, %v10037_v15  ;;  %v2348_v0 = vsub.f32 %v2220_v31, %v10039_v60  ;;  %v7399_v13 = vmul.f32 %v7396_v34, %v2343_v28  ;;  %10041 = vst [vmem:[#allocation53_spill] sm:$0xff] %v7402_v11  ;;  %v10044_v1 = vld [vmem:[#allocation337_spill] sm:$0xff]  ;;  %v7411_v50 = vld [vmem:[%s8552_s4 + $0x18] sm:$0xff]  ;;  %v10074_v49 = vld [vmem:[#allocation230_spill] sm:$0xff] }
 0x296   :  { %10029 = vst [vmem:[#allocation283_spill] sm:$0xff] %v7372_v52  ;;  %3248 = vmatpush1.msra.mxu1 %v10036_v27  ;;  %v7405_v36 = vadd.f32 %v2986_v14, %v10042_v17  ;;  %v2345_v27 = vsub.f32 %v2217_v58, %v10044_v1  ;;  %3172 = vmatprep.subr.mxu0 %v2673_v35  ;;  %v7421_v17 = vpop.f32.mrf.mxu1  ;;  %v7426_v58 = vld [vmem:[%s8553_s5] sm:$0xff]  ;;  %v10050_v1 = vld [vmem:[#allocation94_spill] sm:$0xff]  ;;  %v10052_v45 = vld [vmem:[#allocation161_spill] sm:$0xff] }
 0x297   :  { %v7414_v60 = vmul.f32 %v7411_v50, %v2343_v28  ;;  %v2347_v14 = vsub.f32 %v2219_v24, %v10048_v10  ;;  %3249 = vmatprep.subr.mxu1 %v2675_v61  ;;  %v7429_v35 = vmul.f32 %v7426_v58, %v2348_v0  ;;  %v2988_v28 = vmul.f32 %v7256_v40, %v2348_v0  ;;  %v10054_v61 = vld [vmem:[#allocation251_spill] sm:$0xff]  ;;  %v10055_v24 = vld [vmem:[#allocation162_spill] sm:$0xff]  ;;  %v10059_v22 = vld [vmem:[#allocation37_spill] sm:$0xff] }
 0x298   :  { %10043 = vst [vmem:[#allocation54_spill] sm:$0xff] %v7405_v36  ;;  %v2222_v31 = vsub.f32 %v7076_v42, %v10050_v1  ;;  %v10051_v36 = vld [vmem:[#allocation249_spill] sm:$0xff]  ;;  %v10056_v10 = vsub.f32 %v10054_v61, %v10055_v24  ;;  %v10058_v56 = vld [vmem:[#allocation243_spill] sm:$0xff]  ;;  %v10062_v42 = vld [vmem:[#allocation96_spill] sm:$0xff] }
 0x299   :  { %10045 = vst [vmem:[#allocation324_spill] sm:$0xff] %v7414_v60  ;;  %10049 = vst [vmem:[#allocation326_spill] sm:$0xff] %v7429_v35  ;;  %v10053_v11 = vsub.f32 %v10051_v36, %v10052_v45  ;;  %v2669_v57 = vsub.f32 %v10058_v56, %v10057_v63  ;;  %v10060_v51 = vld [vmem:[#allocation245_spill] sm:$0xff]  ;;  %v10061_v0 = vld [vmem:[#allocation95_spill] sm:$0xff]  ;;  %v2223_v1 = vsub.f32 %v7116_v29, %v10062_v42  ;;  %v7481_v60 = vpop.f32.mrf.mxu1 }
 0x29a   :  { %3250 = vmatpush1.msra.mxu1 %v10056_v10  ;;  %v2671_v54 = vsub.f32 %v10060_v51, %v10059_v22  ;;  %v2221_v59 = vsub.f32 %v7090_v2, %v10061_v0  ;;  %v7461_v56 = vld [vmem:[%s8552_s4 + $0x28] sm:$0xff]  ;;  %v10064_v2 = vld [vmem:[#allocation403_spill] sm:$0xff]  ;;  %v10091_v6 = vld [vmem:[#allocation152_spill] sm:$0xff] }
 0x29b   :  { %3173 = vmatpush1.msra.mxu0 %v10053_v11  ;;  %v7453_v11 = vld [vmem:[%s8553_s5 + $0x28] sm:$0xff]  ;;  %v7464_v51 = vmul.f32 %v7461_v56, %v2345_v27  ;;  %v7467_v22 = vadd.f32 %v2988_v28, %v10064_v2  ;;  %v10066_v29 = vld [vmem:[#allocation343_spill] sm:$0xff]  ;;  %v10071_v2 = vld [vmem:[#allocation226_spill] sm:$0xff] }
 0x29c   :  { %v7456_v36 = vmul.f32 %v7453_v11, %v2345_v27  ;;  %v2350_v63 = vsub.f32 %v2222_v31, %v10066_v29  ;;  %v7473_v45 = vld [vmem:[%s8553_s5 + $0x38] sm:$0xff]  ;;  %3174 = vmatprep.subr.mxu0 %v2669_v57  ;;  %3251 = vmatprep.subr.mxu1 %v2671_v54  ;;  %v10067_v24 = vld [vmem:[#allocation349_spill] sm:$0xff] }
 0x29d   :  { %10063 = vst [vmem:[#allocation79_spill] sm:$0xff] %v7464_v51  ;;  %10065 = vst [vmem:[#allocation80_spill] sm:$0xff] %v7467_v22  ;;  %v7476_v61 = vmul.f32 %v7473_v45, %v2347_v14  ;;  %v2349_v10 = vsub.f32 %v2221_v59, %v10067_v24  ;;  %v10068_v0 = vld [vmem:[#allocation155_spill] sm:$0xff]  ;;  %v10070_v31 = vld [vmem:[#allocation237_spill] sm:$0xff]  ;;  %v7494_v24 = vpop.f32.mrf.mxu0 }
 0x29e   :  { %v10069_v27 = vld [vmem:[#allocation231_spill] sm:$0xff]  ;;  %v2990_v28 = vmul.f32 %v7276_v44, %v2350_v63  ;;  %v10072_v29 = vsub.f32 %v10070_v31, %v10071_v2  ;;  %v10077_v57 = vld [vmem:[#allocation233_spill] sm:$0xff] }
 0x29f   :  { %v2665_v42 = vsub.f32 %v10069_v27, %v10068_v0  ;;  %v10073_v22 = vld [vmem:[#allocation239_spill] sm:$0xff]  ;;  %v10078_v51 = vld [vmem:[#allocation97_spill] sm:$0xff]  ;;  %v7514_v2 = vmul.f32 %v7316_v37, %v2349_v10 }
 0x2a0   :  { %3175 = vmatpush1.msra.mxu0 %v10072_v29  ;;  %v10075_v52 = vsub.f32 %v10073_v22, %v10074_v49  ;;  %v10076_v30 = vld [vmem:[#allocation31_spill] sm:$0xff]  ;;  %v2224_v59 = vsub.f32 %v7126_v16, %v10078_v51  ;;  %v10083_v16 = vld [vmem:[#allocation405_spill] sm:$0xff]  ;;  %v10085_v29 = vld [vmem:[#allocation356_spill] sm:$0xff] }
 0x2a1   :  { %v2667_v54 = vsub.f32 %v10077_v57, %v10076_v30  ;;  %v7499_v0 = vld [vmem:[%s8552_s4 + $0x38] sm:$0xff]  ;;  %v10082_v30 = vld [vmem:[#allocation350_spill] sm:$0xff]  ;;  %3176 = vmatprep.subr.mxu0 %v2665_v42  ;;  %v7511_v51 = vadd.f32 %v2990_v28, %v10083_v16  ;;  %v10087_v47 = vld [vmem:[#allocation225_spill] sm:$0xff] }
 0x2a2   :  { %3252 = vmatpush1.msra.mxu1 %v10075_v52  ;;  %v7502_v27 = vmul.f32 %v7499_v0, %v2347_v14  ;;  %v7507_v52 = vmul.f32 %v7299_v39, %v2350_v63  ;;  %v2351_v22 = vsub.f32 %v2223_v1, %v10082_v30  ;;  %v2352_v57 = vsub.f32 %v2224_v59, %v10085_v29  ;;  %v10086_v14 = vld [vmem:[#allocation98_spill] sm:$0xff]  ;;  %v10088_v49 = vld [vmem:[#allocation151_spill] sm:$0xff]  ;;  %v10093_v42 = vld [vmem:[#allocation29_spill] sm:$0xff]  ;;  %v7531_v29 = vpop.f32.mrf.mxu1 }
 0x2a3   :  { %10084 = vst [vmem:[#allocation81_spill] sm:$0xff] %v7511_v51  ;;  %3253 = vmatprep.subr.mxu1 %v2667_v54  ;;  %v10089_v12 = vsub.f32 %v10087_v47, %v10088_v49  ;;  %v10090_v63 = vld [vmem:[#allocation227_spill] sm:$0xff]  ;;  %v10272_v25 = vld [vmem:[#allocation129_spill] sm:$0xff] }
 0x2a4   :  { %10079 = vst [vmem:[#allocation295_spill] sm:$0xff] %v7502_v27  ;;  %10081 = vst [vmem:[#allocation313_spill] sm:$0xff] %v7507_v52  ;;  %v2226_v27 = vsub.f32 %v7159_v8, %v10086_v14  ;;  %v10092_v1 = vsub.f32 %v10090_v63, %v10091_v6  ;;  %v10094_v28 = vld [vmem:[#allocation219_spill] sm:$0xff]  ;;  %v7534_v8 = vmul.f32 %v7339_v4, %v2349_v10  ;;  %v10100_v6 = vld [vmem:[#allocation357_spill] sm:$0xff]  ;;  %v7541_v14 = vpop.f32.mrf.mxu0  ;;  %v7570_v31 = vpop.f32.mrf.mxu1 }
 0x2a5   :  { %3177 = vmatpush1.msra.mxu0 %v10089_v12  ;;  %v2661_v30 = vsub.f32 %v10094_v28, %v10093_v42  ;;  %v10095_v16 = vld [vmem:[#allocation27_spill] sm:$0xff]  ;;  %v7537_v47 = vmul.f32 %v7355_v20, %v2352_v57  ;;  %v2992_v12 = vmul.f32 %v7363_v62, %v2352_v57  ;;  %v10103_v42 = vld [vmem:[#allocation26_spill] sm:$0xff]  ;;  %v10107_v57 = vld [vmem:[#allocation213_spill] sm:$0xff] }
 0x2a6   :  { %3254 = vmatpush1.msra.mxu1 %v10092_v1  ;;  %v10096_v51 = vld [vmem:[#allocation223_spill] sm:$0xff]  ;;  %10098 = vst [vmem:[#allocation361_spill] sm:$0xff] %v7534_v8  ;;  %v2354_v49 = vsub.f32 %v2226_v27, %v10100_v6  ;;  %v10102_v1 = vld [vmem:[#allocation100_spill] sm:$0xff]  ;;  %v7582_v35 = vpop.f32.mrf.mxu0  ;;  %v10132_v52 = vld [vmem:[#allocation370_spill] sm:$0xff] }
 0x2a7   :  { %v2663_v15 = vsub.f32 %v10096_v51, %v10095_v16  ;;  %v10097_v54 = vld [vmem:[#allocation99_spill] sm:$0xff]  ;;  %10099 = vst [vmem:[#allocation317_spill] sm:$0xff] %v7537_v47  ;;  %3178 = vmatprep.subr.mxu0 %v2661_v30  ;;  %v10101_v51 = vld [vmem:[#allocation362_spill] sm:$0xff]  ;;  %v7549_v16 = vmul.f32 %v7396_v34, %v2351_v22  ;;  %v10134_v47 = vld [vmem:[#allocation204_spill] sm:$0xff] }
 0x2a8   :  { %v2225_v59 = vsub.f32 %v7169_v43, %v10097_v54  ;;  %v2227_v43 = vsub.f32 %v7199_v21, %v10102_v1  ;;  %v10104_v28 = vld [vmem:[#allocation207_spill] sm:$0xff]  ;;  %v10105_v54 = vld [vmem:[#allocation413_spill] sm:$0xff]  ;;  %v2994_v27 = vmul.f32 %v7377_v32, %v2354_v49 }
 0x2a9   :  { %3255 = vmatprep.subr.mxu1 %v2663_v15  ;;  %v2657_v10 = vsub.f32 %v10104_v28, %v10103_v42  ;;  %v7552_v8 = vadd.f32 %v2992_v12, %v10105_v54  ;;  %v10108_v6 = vld [vmem:[#allocation23_spill] sm:$0xff]  ;;  %v10110_v15 = vld [vmem:[#allocation218_spill] sm:$0xff]  ;;  %v7563_v42 = vmul.f32 %v7411_v50, %v2351_v22  ;;  %v10115_v12 = vld [vmem:[#allocation217_spill] sm:$0xff] }
 0x2aa   :  { %v2353_v63 = vsub.f32 %v2225_v59, %v10101_v51  ;;  %v10109_v30 = vsub.f32 %v10107_v57, %v10108_v6  ;;  %v10111_v59 = vld [vmem:[#allocation211_spill] sm:$0xff]  ;;  %v10116_v54 = vld [vmem:[#allocation25_spill] sm:$0xff]  ;;  %v7573_v57 = vmul.f32 %v7369_v3, %v2354_v49 }
 0x2ab   :  { %10106 = vst [vmem:[#allocation296_spill] sm:$0xff] %v7552_v8  ;;  %v2659_v51 = vsub.f32 %v10111_v59, %v10110_v15  ;;  %10113 = vst [vmem:[#allocation302_spill] sm:$0xff] %v7563_v42  ;;  %v10117_v8 = vsub.f32 %v10115_v12, %v10116_v54  ;;  %v10119_v6 = vld [vmem:[#allocation417_spill] sm:$0xff]  ;;  %v10122_v59 = vld [vmem:[#allocation102_spill] sm:$0xff] }
 0x2ac   :  { %3179 = vmatpush1.msra.mxu0 %v10109_v30  ;;  %10118 = vst [vmem:[#allocation82_spill] sm:$0xff] %v7573_v57  ;;  %v7576_v30 = vadd.f32 %v2994_v27, %v10119_v6  ;;  %v10121_v15 = vld [vmem:[#allocation101_spill] sm:$0xff]  ;;  %v2230_v1 = vsub.f32 %v7245_v53, %v10122_v59  ;;  %v10124_v54 = vld [vmem:[#allocation203_spill] sm:$0xff]  ;;  %v10128_v6 = vld [vmem:[#allocation150_spill] sm:$0xff] }
 0x2ad   :  { %3256 = vmatpush1.msra.mxu1 %v10117_v8  ;;  %3180 = vmatprep.subr.mxu0 %v2657_v10  ;;  %v2228_v22 = vsub.f32 %v7213_v33, %v10121_v15  ;;  %v7585_v8 = vmul.f32 %v7453_v11, %v2353_v63  ;;  %v10123_v10 = vld [vmem:[#allocation363_spill] sm:$0xff]  ;;  %v10125_v49 = vld [vmem:[#allocation149_spill] sm:$0xff] }
 0x2ae   :  { %10120 = vst [vmem:[#allocation292_spill] sm:$0xff] %v7576_v30  ;;  %3257 = vmatprep.subr.mxu1 %v2659_v51  ;;  %v2355_v12 = vsub.f32 %v2227_v43, %v10123_v10  ;;  %v10126_v42 = vsub.f32 %v10124_v54, %v10125_v49  ;;  %v10127_v27 = vld [vmem:[#allocation205_spill] sm:$0xff]  ;;  %v10130_v30 = vld [vmem:[#allocation19_spill] sm:$0xff]  ;;  %v2229_v43 = vsub.f32 %v7260_v26, %v10136_v38 }
 0x2af   :  { %v10129_v51 = vsub.f32 %v10127_v27, %v10128_v6  ;;  %v10131_v33 = vld [vmem:[#allocation197_spill] sm:$0xff]  ;;  %v2356_v53 = vsub.f32 %v2228_v22, %v10132_v52  ;;  %v10133_v59 = vld [vmem:[#allocation371_spill] sm:$0xff]  ;;  %v7603_v10 = vmul.f32 %v7461_v56, %v2353_v63 }
 0x2b0   :  { %3181 = vmatpush1.msra.mxu0 %v10126_v42  ;;  %v2653_v15 = vsub.f32 %v10131_v33, %v10130_v30  ;;  %v2358_v21 = vsub.f32 %v2230_v1, %v10133_v59  ;;  %v10135_v28 = vld [vmem:[#allocation199_spill] sm:$0xff]  ;;  %v10138_v42 = vld [vmem:[#allocation104_spill] sm:$0xff]  ;;  %v10139_v49 = vld [vmem:[#allocation145_spill] sm:$0xff]  ;;  %v7611_v1 = vpop.f32.mrf.mxu1 }
 0x2b1   :  { %3258 = vmatpush1.msra.mxu1 %v10129_v51  ;;  %v2655_v9 = vsub.f32 %v10135_v28, %v10134_v47  ;;  %10137 = vst [vmem:[#allocation305_spill] sm:$0xff] %v7603_v10  ;;  %v2231_v54 = vsub.f32 %v7294_v41, %v10138_v42  ;;  %v10140_v27 = vld [vmem:[#allocation187_spill] sm:$0xff]  ;;  %v10141_v6 = vld [vmem:[#allocation105_spill] sm:$0xff]  ;;  %v7614_v47 = vmul.f32 %v7426_v58, %v2356_v53  ;;  %v7621_v41 = vpop.f32.mrf.mxu0  ;;  %v10149_v59 = vld [vmem:[#allocation18_spill] sm:$0xff] }
 0x2b2   :  { %3182 = vmatprep.subr.mxu0 %v2653_v15  ;;  %v2649_v30 = vsub.f32 %v10140_v27, %v10139_v49  ;;  %v2232_v52 = vsub.f32 %v7311_v55, %v10141_v6  ;;  %v2996_v38 = vmul.f32 %v7256_v40, %v2356_v53  ;;  %v7618_v26 = vmul.f32 %v7299_v39, %v2358_v21  ;;  %v10145_v51 = vld [vmem:[#allocation193_spill] sm:$0xff]  ;;  %v10148_v15 = vld [vmem:[#allocation194_spill] sm:$0xff]  ;;  %v10153_v6 = vld [vmem:[#allocation384_spill] sm:$0xff] }
 0x2b3   :  { %10142 = vst [vmem:[#allocation312_spill] sm:$0xff] %v7614_v47  ;;  %v2998_v63 = vmul.f32 %v7276_v44, %v2358_v21  ;;  %3259 = vmatprep.subr.mxu1 %v2655_v9  ;;  %v10146_v55 = vld [vmem:[#allocation17_spill] sm:$0xff]  ;;  %v10150_v42 = vsub.f32 %v10148_v15, %v10149_v59  ;;  %v7635_v9 = vmul.f32 %v7473_v45, %v2355_v12  ;;  %v10156_v22 = vld [vmem:[#allocation427_spill] sm:$0xff]  ;;  %v10169_v59 = vld [vmem:[#allocation186_spill] sm:$0xff] }
 0x2b4   :  { %10143 = vst [vmem:[#allocation209_spill] sm:$0xff] %v7618_v26  ;;  %v10147_v33 = vsub.f32 %v10145_v51, %v10146_v55  ;;  %v10151_v53 = vld [vmem:[#allocation21_spill] sm:$0xff]  ;;  %v2360_v10 = vsub.f32 %v2232_v52, %v10153_v6  ;;  %v10166_v6 = vld [vmem:[#allocation182_spill] sm:$0xff]  ;;  %v10177_v28 = vld [vmem:[#allocation107_spill] sm:$0xff] }
 0x2b5   :  { %3260 = vmatpush1.msra.mxu1 %v10150_v42  ;;  %v10152_v49 = vld [vmem:[#allocation189_spill] sm:$0xff]  ;;  %v7641_v57 = vadd.f32 %v2998_v63, %v10156_v22  ;;  %v10192_v52 = vld [vmem:[#allocation110_spill] sm:$0xff] }
 0x2b6   :  { %3183 = vmatpush1.msra.mxu0 %v10147_v33  ;;  %v2651_v27 = vsub.f32 %v10152_v49, %v10151_v53  ;;  %v10154_v21 = vld [vmem:[#allocation425_spill] sm:$0xff]  ;;  %v7645_v33 = vmul.f32 %v7499_v0, %v2355_v12  ;;  %v10162_v53 = vld [vmem:[#allocation378_spill] sm:$0xff]  ;;  %v7655_v63 = vmul.f32 %v7355_v20, %v2360_v10 }
 0x2b7   :  { %v7638_v48 = vadd.f32 %v2996_v38, %v10154_v21  ;;  %10157 = vst [vmem:[#allocation307_spill] sm:$0xff] %v7641_v57  ;;  %v10158_v51 = vld [vmem:[#allocation377_spill] sm:$0xff]  ;;  %3184 = vmatprep.subr.mxu0 %v2649_v30  ;;  %v2359_v49 = vsub.f32 %v2231_v54, %v10162_v53  ;;  %v7652_v38 = vpop.f32.mrf.mxu1  ;;  %v10164_v30 = vld [vmem:[#allocation106_spill] sm:$0xff]  ;;  %v7666_v54 = vpop.f32.mrf.mxu0 }
 0x2b8   :  { %v2357_v55 = vsub.f32 %v2229_v43, %v10158_v51  ;;  %10159 = vst [vmem:[#allocation83_spill] sm:$0xff] %v7645_v33  ;;  %3261 = vmatprep.subr.mxu1 %v2651_v27  ;;  %10163 = vst [vmem:[#allocation300_spill] sm:$0xff] %v7655_v63  ;;  %v3000_v43 = vmul.f32 %v7363_v62, %v2360_v10  ;;  %v2234_v12 = vsub.f32 %v7350_v46, %v10164_v30  ;;  %v10165_v22 = vld [vmem:[#allocation181_spill] sm:$0xff]  ;;  %v10171_v27 = vld [vmem:[#allocation175_spill] sm:$0xff] }
 0x2b9   :  { %10155 = vst [vmem:[#allocation202_spill] sm:$0xff] %v7638_v48  ;;  %v10167_v21 = vsub.f32 %v10165_v22, %v10166_v6  ;;  %v10168_v51 = vld [vmem:[#allocation185_spill] sm:$0xff]  ;;  %v10172_v53 = vld [vmem:[#allocation138_spill] sm:$0xff]  ;;  %v10174_v48 = vld [vmem:[#allocation179_spill] sm:$0xff]  ;;  %v2233_v46 = vsub.f32 %v7380_v5, %v10177_v28 }
 0x2ba   :  { %v10170_v42 = vsub.f32 %v10168_v51, %v10169_v59  ;;  %v10173_v57 = vsub.f32 %v10171_v27, %v10172_v53  ;;  %v10175_v33 = vld [vmem:[#allocation16_spill] sm:$0xff]  ;;  %v10179_v6 = vld [vmem:[#allocation109_spill] sm:$0xff]  ;;  %v10187_v5 = vld [vmem:[#allocation494_spill] sm:$0xff] }
 0x2bb   :  { %3185 = vmatpush1.msra.mxu0 %v10167_v21  ;;  %v10176_v10 = vsub.f32 %v10174_v48, %v10175_v33  ;;  %v10178_v30 = vld [vmem:[#allocation108_spill] sm:$0xff]  ;;  %v2236_v59 = vsub.f32 %v7440_v19, %v10179_v6  ;;  %v10180_v21 = vld [vmem:[#allocation435_spill] sm:$0xff]  ;;  %v10183_v53 = vld [vmem:[#allocation169_spill] sm:$0xff] }
 0x2bc   :  { %3262 = vmatpush1.msra.mxu1 %v10170_v42  ;;  %3186 = vmatprep.subr.mxu0 %v10173_v57  ;;  %v2235_v22 = vsub.f32 %v7421_v17, %v10178_v30  ;;  %v7681_v42 = vmul.f32 %v7316_v37, %v2357_v55  ;;  %v7684_v51 = vadd.f32 %v3000_v43, %v10180_v21  ;;  %v10182_v57 = vld [vmem:[#allocation385_spill] sm:$0xff]  ;;  %v10190_v19 = vld [vmem:[#allocation392_spill] sm:$0xff]  ;;  %v10191_v6 = vld [vmem:[#allocation399_spill] sm:$0xff]  ;;  %v7700_v21 = vpop.f32.mrf.mxu1 }
 0x2bd   :  { %3263 = vmatprep.subr.mxu1 %v10176_v10  ;;  %v2362_v27 = vsub.f32 %v2234_v12, %v10182_v57  ;;  %v10184_v48 = vld [vmem:[#allocation493_spill] sm:$0xff]  ;;  %v7694_v17 = vmul.f32 %v7339_v4, %v2357_v55  ;;  %v2361_v30 = vsub.f32 %v2233_v46, %v10190_v19  ;;  %v2364_v26 = vsub.f32 %v2236_v59, %v10191_v6  ;;  %v10199_v19 = vld [vmem:[#allocation439_spill] sm:$0xff]  ;;  %v10209_v47 = vld [vmem:[#allocation114_spill] sm:$0xff] }
 0x2be   :  { %10181 = vst [vmem:[#allocation84_spill] sm:$0xff] %v7684_v51  ;;  %v10185_v33 = vsub.f32 %v10183_v53, %v10184_v48  ;;  %v10186_v10 = vld [vmem:[#allocation173_spill] sm:$0xff]  ;;  %v2238_v43 = vsub.f32 %v7481_v60, %v10192_v52  ;;  %v7703_v12 = vmul.f32 %v7396_v34, %v2359_v49  ;;  %v10193_v53 = vld [vmem:[#allocation111_spill] sm:$0xff]  ;;  %v7711_v46 = vmul.f32 %v7411_v50, %v2359_v49  ;;  %v10220_v63 = vld [vmem:[#allocation116_spill] sm:$0xff] }
 0x2bf   :  { %v10188_v28 = vsub.f32 %v10186_v10, %v10187_v5  ;;  %10189 = vst [vmem:[#allocation304_spill] sm:$0xff] %v7694_v17  ;;  %v3002_v57 = vmul.f32 %v7377_v32, %v2362_v27  ;;  %v2237_v48 = vsub.f32 %v7494_v24, %v10193_v53  ;;  %v1730_v10 = vpop.f32.mrf.mxu0  ;;  %v7716_v52 = vmul.f32 %v7369_v3, %v2362_v27  ;;  %v10198_v5 = vld [vmem:[#allocation393_spill] sm:$0xff]  ;;  %v10204_v27 = vld [vmem:[#allocation406_spill] sm:$0xff] }
 0x2c0   :  { %3187 = vmatpush1.msra.mxu0 %v10185_v33  ;;  %v10194_v33 = vld [vmem:[#allocation112_spill] sm:$0xff]  ;;  %10195 = vst [vmem:[#allocation303_spill] sm:$0xff] %v7711_v46  ;;  %v7723_v24 = vmul.f32 %v7453_v11, %v2361_v30  ;;  %v3004_v49 = vmul.f32 %v7256_v40, %v2364_v26  ;;  %v7730_v53 = vmul.f32 %v7461_v56, %v2361_v30  ;;  %v10205_v46 = vld [vmem:[#allocation113_spill] sm:$0xff] }
 0x2c1   :  { %3264 = vmatpush1.msra.mxu1 %v10188_v28  ;;  %v2239_v55 = vsub.f32 %v7531_v29, %v10194_v33  ;;  %10197 = vst [vmem:[#allocation61_spill] sm:$0xff] %v7716_v52  ;;  %v2363_v28 = vsub.f32 %v2235_v22, %v10198_v5  ;;  %v7720_v6 = vadd.f32 %v3002_v57, %v10199_v19  ;;  %v10203_v33 = vld [vmem:[#allocation400_spill] sm:$0xff]  ;;  %v1987_v57 = vpop.f32.mrf.mxu1  ;;  %v10206_v5 = vld [vmem:[#allocation447_spill] sm:$0xff] }
 0x2c2   :  { %v7726_v29 = vmul.f32 %v7426_v58, %v2364_v26  ;;  %10202 = vst [vmem:[#allocation195_spill] sm:$0xff] %v7730_v53  ;;  %v2366_v60 = vsub.f32 %v2238_v43, %v10203_v33  ;;  %v2365_v51 = vsub.f32 %v2237_v48, %v10204_v27  ;;  %v2240_v22 = vsub.f32 %v7541_v14, %v10205_v46  ;;  %v10210_v26 = vld [vmem:[#allocation115_spill] sm:$0xff]  ;;  %v7744_v53 = vpop.f32.mrf.mxu0 }
 0x2c3   :  { %10200 = vst [vmem:[#allocation299_spill] sm:$0xff] %v7720_v6  ;;  %v7737_v19 = vadd.f32 %v3004_v49, %v10206_v5  ;;  %v10208_v6 = vld [vmem:[#allocation407_spill] sm:$0xff]  ;;  %v2242_v15 = vsub.f32 %v7570_v31, %v10209_v47  ;;  %v2241_v30 = vsub.f32 %v7582_v35, %v10210_v26  ;;  %v7747_v43 = vmul.f32 %v7473_v45, %v2363_v28  ;;  %v10215_v35 = vld [vmem:[#allocation414_spill] sm:$0xff]  ;;  %v10217_v5 = vld [vmem:[#allocation449_spill] sm:$0xff]  ;;  %v7771_v59 = vpop.f32.mrf.mxu1 }
 0x2c4   :  { %10201 = vst [vmem:[#allocation191_spill] sm:$0xff] %v7726_v29  ;;  %v2367_v17 = vsub.f32 %v2239_v55, %v10208_v6  ;;  %v7750_v48 = vmul.f32 %v7499_v0, %v2363_v28  ;;  %v7753_v14 = vmul.f32 %v7299_v39, %v2366_v60  ;;  %v3006_v46 = vmul.f32 %v7276_v44, %v2366_v60  ;;  %v10216_v33 = vld [vmem:[#allocation415_spill] sm:$0xff]  ;;  %v10233_v55 = vld [vmem:[#allocation428_spill] sm:$0xff] }
 0x2c5   :  { %10207 = vst [vmem:[#allocation293_spill] sm:$0xff] %v7737_v19  ;;  %v2368_v49 = vsub.f32 %v2240_v22, %v10215_v35  ;;  %v2370_v27 = vsub.f32 %v2242_v15, %v10216_v33  ;;  %v7766_v28 = vmul.f32 %v7316_v37, %v2365_v51  ;;  %v10219_v19 = vld [vmem:[#allocation421_spill] sm:$0xff]  ;;  %v2243_v60 = vsub.f32 %v7611_v1, %v10220_v63  ;;  %v1736_v35 = vpop.f32.mrf.mxu0  ;;  %v10238_v33 = vld [vmem:[#allocation122_spill] sm:$0xff] }
 0x2c6   :  { %10211 = vst [vmem:[#allocation85_spill] sm:$0xff] %v7750_v48  ;;  %10212 = vst [vmem:[#allocation221_spill] sm:$0xff] %v7753_v14  ;;  %v7763_v26 = vadd.f32 %v3006_v46, %v10217_v5  ;;  %v2369_v48 = vsub.f32 %v2241_v30, %v10219_v19  ;;  %v7774_v6 = vmul.f32 %v7339_v4, %v2365_v51  ;;  %v10225_v63 = vld [vmem:[#allocation117_spill] sm:$0xff] }
 0x2c7   :  { %v7777_v22 = vmul.f32 %v7396_v34, %v2367_v17  ;;  %v3008_v15 = vmul.f32 %v7363_v62, %v2368_v49  ;;  %v3010_v46 = vmul.f32 %v7377_v32, %v2370_v27  ;;  %v7784_v19 = vmul.f32 %v7411_v50, %v2367_v17  ;;  %v10226_v30 = vld [vmem:[#allocation457_spill] sm:$0xff] }
 0x2c8   :  { %10218 = vst [vmem:[#allocation369_spill] sm:$0xff] %v7763_v26  ;;  %10221 = vst [vmem:[#allocation301_spill] sm:$0xff] %v7774_v6  ;;  %v7787_v1 = vmul.f32 %v7355_v20, %v2368_v49  ;;  %v2244_v51 = vsub.f32 %v7621_v41, %v10225_v63  ;;  %v7795_v26 = vmul.f32 %v7369_v3, %v2370_v27  ;;  %v10229_v6 = vld [vmem:[#allocation461_spill] sm:$0xff]  ;;  %v10232_v49 = vld [vmem:[#allocation422_spill] sm:$0xff]  ;;  %v1993_v63 = vpop.f32.mrf.mxu1 }
 0x2c9   :  { %10223 = vst [vmem:[#allocation51_spill] sm:$0xff] %v7784_v19  ;;  %v7792_v47 = vadd.f32 %v3008_v15, %v10226_v30  ;;  %v7798_v52 = vadd.f32 %v3010_v46, %v10229_v6  ;;  %v7801_v5 = vmul.f32 %v7453_v11, %v2369_v48  ;;  %v7804_v17 = vmul.f32 %v7461_v56, %v2369_v48  ;;  %v10234_v41 = vld [vmem:[#allocation118_spill] sm:$0xff]  ;;  %v10235_v30 = vld [vmem:[#allocation119_spill] sm:$0xff]  ;;  %v10237_v46 = vld [vmem:[#allocation121_spill] sm:$0xff]  ;;  %v1738_v48 = vpop.f32.mrf.mxu0 }
 0x2ca   :  { %10224 = vst [vmem:[#allocation190_spill] sm:$0xff] %v7787_v1  ;;  %10228 = vst [vmem:[#allocation309_spill] sm:$0xff] %v7795_v26  ;;  %v2371_v19 = vsub.f32 %v2243_v60, %v10232_v49  ;;  %v2372_v14 = vsub.f32 %v2244_v51, %v10233_v55  ;;  %v2246_v15 = vsub.f32 %v7652_v38, %v10234_v41  ;;  %v10241_v51 = vld [vmem:[#allocation429_spill] sm:$0xff] }
 0x2cb   :  { %10227 = vst [vmem:[#allocation297_spill] sm:$0xff] %v7792_v47  ;;  %10230 = vst [vmem:[#allocation373_spill] sm:$0xff] %v7798_v52  ;;  %v2245_v27 = vsub.f32 %v7666_v54, %v10235_v30  ;;  %v10236_v47 = vld [vmem:[#allocation120_spill] sm:$0xff]  ;;  %v2248_v52 = vsub.f32 %v1730_v10, %v10237_v46  ;;  %v2250_v29 = vsub.f32 %v1987_v57, %v10238_v33  ;;  %v10246_v60 = vld [vmem:[#allocation469_spill] sm:$0xff] }
 0x2cc   :  { %10231 = vst [vmem:[#allocation314_spill] sm:$0xff] %v7804_v17  ;;  %v2247_v6 = vsub.f32 %v7700_v21, %v10236_v47  ;;  %v7819_v55 = vmul.f32 %v7426_v58, %v2372_v14  ;;  %v3012_v38 = vmul.f32 %v7256_v40, %v2372_v14  ;;  %v2374_v49 = vsub.f32 %v2246_v15, %v10241_v51  ;;  %v10243_v30 = vld [vmem:[#allocation436_spill] sm:$0xff]  ;;  %v10244_v47 = vld [vmem:[#allocation443_spill] sm:$0xff]  ;;  %v1995_v51 = vpop.f32.mrf.mxu1  ;;  %v10260_v26 = vld [vmem:[#allocation125_spill] sm:$0xff] }
 0x2cd   :  { %v2373_v21 = vsub.f32 %v2245_v27, %v10243_v30  ;;  %v2376_v10 = vsub.f32 %v2248_v52, %v10244_v47  ;;  %v10245_v46 = vld [vmem:[#allocation444_spill] sm:$0xff]  ;;  %v7829_v33 = vmul.f32 %v7473_v45, %v2371_v19  ;;  %v10248_v14 = vld [vmem:[#allocation123_spill] sm:$0xff]  ;;  %v7838_v41 = vmul.f32 %v7499_v0, %v2371_v19  ;;  %v10252_v30 = vld [vmem:[#allocation437_spill] sm:$0xff] }
 0x2ce   :  { %10240 = vst [vmem:[#allocation86_spill] sm:$0xff] %v7819_v55  ;;  %v2378_v57 = vsub.f32 %v2250_v29, %v10245_v46  ;;  %v7832_v31 = vadd.f32 %v3012_v38, %v10246_v60  ;;  %v3014_v1 = vmul.f32 %v7276_v44, %v2374_v49  ;;  %v2249_v15 = vsub.f32 %v7744_v53, %v10248_v14  ;;  %v1742_v46 = vpop.f32.mrf.mxu0  ;;  %v10253_v60 = vld [vmem:[#allocation471_spill] sm:$0xff]  ;;  %v10261_v17 = vld [vmem:[#allocation126_spill] sm:$0xff]  ;;  %v1999_v55 = vpop.f32.mrf.mxu1 }
 0x2cf   :  { %10249 = vst [vmem:[#allocation289_spill] sm:$0xff] %v7838_v41  ;;  %v7843_v29 = vmul.f32 %v7299_v39, %v2374_v49  ;;  %v2375_v47 = vsub.f32 %v2247_v6, %v10252_v30  ;;  %v7853_v53 = vmul.f32 %v7355_v20, %v2376_v10  ;;  %v3016_v19 = vmul.f32 %v7363_v62, %v2376_v10  ;;  %v10256_v30 = vld [vmem:[#allocation124_spill] sm:$0xff] }
 0x2d0   :  { %10247 = vst [vmem:[#allocation222_spill] sm:$0xff] %v7832_v31  ;;  %v7847_v38 = vadd.f32 %v3014_v1, %v10253_v60  ;;  %v7850_v31 = vmul.f32 %v7316_v37, %v2373_v21  ;;  %v7857_v14 = vmul.f32 %v7339_v4, %v2373_v21  ;;  %v7860_v49 = vmul.f32 %v7369_v3, %v2378_v57  ;;  %v10257_v60 = vld [vmem:[#allocation479_spill] sm:$0xff]  ;;  %v10271_v21 = vld [vmem:[#allocation128_spill] sm:$0xff] }
 0x2d1   :  { %10251 = vst [vmem:[#allocation47_spill] sm:$0xff] %v7843_v29  ;;  %v3018_v6 = vmul.f32 %v7377_v32, %v2378_v57  ;;  %v2251_v1 = vsub.f32 %v7771_v59, %v10256_v30  ;;  %v7866_v52 = vadd.f32 %v3016_v19, %v10257_v60  ;;  %v2252_v54 = vsub.f32 %v1736_v35, %v10260_v26  ;;  %v10264_v59 = vld [vmem:[#allocation483_spill] sm:$0xff]  ;;  %v1744_v19 = vpop.f32.mrf.mxu0  ;;  %v10267_v26 = vld [vmem:[#allocation458_spill] sm:$0xff] }
 0x2d2   :  { %10254 = vst [vmem:[#allocation291_spill] sm:$0xff] %v7847_v38  ;;  %10255 = vst [vmem:[#allocation49_spill] sm:$0xff] %v7857_v14  ;;  %v10259_v38 = vld [vmem:[#allocation450_spill] sm:$0xff]  ;;  %v2254_v10 = vsub.f32 %v1993_v63, %v10261_v17  ;;  %v7874_v27 = vmul.f32 %v7396_v34, %v2375_v47  ;;  %v7877_v57 = vmul.f32 %v7411_v50, %v2375_v47  ;;  %v10268_v17 = vld [vmem:[#allocation459_spill] sm:$0xff] }
 0x2d3   :  { %10258 = vst [vmem:[#allocation176_spill] sm:$0xff] %v7866_v52  ;;  %v2377_v41 = vsub.f32 %v2249_v15, %v10259_v38  ;;  %v7880_v30 = vadd.f32 %v3018_v6, %v10264_v59  ;;  %v10266_v15 = vld [vmem:[#allocation478_spill] sm:$0xff]  ;;  %v2380_v35 = vsub.f32 %v2252_v54, %v10267_v26  ;;  %v10269_v60 = vld [vmem:[#allocation127_spill] sm:$0xff]  ;;  %v2255_v7 = vsub.f32 %v1995_v51, %v10271_v21  ;;  %v10281_v59 = vld [vmem:[#allocation473_spill] sm:$0xff]  ;;  %v2001_v38 = vpop.f32.mrf.mxu1 }
 0x2d4   :  { %10263 = vst [vmem:[#allocation285_spill] sm:$0xff] %v7877_v57  ;;  %v2382_v63 = vsub.f32 %v2254_v10, %v10268_v17  ;;  %v2253_v52 = vsub.f32 %v1738_v48, %v10269_v60  ;;  %v10270_v14 = vld [vmem:[#allocation451_spill] sm:$0xff]  ;;  %v2256_v47 = vsub.f32 %v1742_v46, %v10272_v25  ;;  %v10273_v57 = vld [vmem:[#allocation130_spill] sm:$0xff]  ;;  %v10278_v46 = vld [vmem:[#allocation8_spill] sm:$0xff] }
 0x2d5   :  { %10265 = vst [vmem:[#allocation50_spill] sm:$0xff] %v7880_v30  ;;  %v2379_v29 = vsub.f32 %v2251_v1, %v10270_v14  ;;  %v2258_v18 = vsub.f32 %v1999_v55, %v10273_v57  ;;  %v10274_v6 = vld [vmem:[#allocation482_spill] sm:$0xff]  ;;  %v7894_v30 = vmul.f32 %v7453_v11, %v2377_v41  ;;  %v3020_v54 = vmul.f32 %v7256_v40, %v2380_v35  ;;  %v10275_v26 = vld [vmem:[#allocation131_spill] sm:$0xff]  ;;  %v10276_v1 = vld [vmem:[#allocation465_spill] sm:$0xff] }
 0x2d6   :  { %v2257_v10 = vsub.f32 %v1744_v19, %v10275_v26  ;;  %v2636_v48 = vmul.f32 %v7426_v58, %v2380_v35  ;;  %v3022_v14 = vmul.f32 %v7276_v44, %v2382_v63  ;;  %v2381_v51 = vsub.f32 %v2253_v52, %v10276_v1  ;;  %v10277_v21 = vld [vmem:[#allocation466_spill] sm:$0xff]  ;;  %v10280_v17 = vld [vmem:[#allocation472_spill] sm:$0xff] }
 0x2d7   :  { %v2383_v25 = vsub.f32 %v2255_v7, %v10277_v21  ;;  %v7903_v55 = vadd.f32 %v3020_v54, %v10278_v46  ;;  %v7906_v57 = vmul.f32 %v7299_v39, %v2382_v63  ;;  %v2384_v60 = vsub.f32 %v2256_v47, %v10280_v17  ;;  %v10282_v7 = vld [vmem:[#allocation489_spill] sm:$0xff]  ;;  %v10284_v26 = vld [vmem:[#allocation480_spill] sm:$0xff] }
 0x2d8   :  { %v2386_v40 = vsub.f32 %v2258_v18, %v10281_v59  ;;  %v7911_v19 = vmul.f32 %v7461_v56, %v2377_v41  ;;  %v7914_v58 = vmul.f32 %v7473_v45, %v2379_v29  ;;  %v7917_v52 = vmul.f32 %v7499_v0, %v2379_v29  ;;  %v10285_v21 = vld [vmem:[#allocation132_spill] sm:$0xff] }
 0x2d9   :  { %10279 = vst [vmem:[#allocation287_spill] sm:$0xff] %v7903_v55  ;;  %v7920_v35 = vadd.f32 %v3022_v14, %v10282_v7  ;;  %v2637_v63 = vmul.f32 %v7316_v37, %v2381_v51  ;;  %v2639_v54 = vmul.f32 %v7396_v34, %v2383_v25  ;;  %v2640_v47 = vmul.f32 %v7355_v20, %v2384_v60  ;;  %v10286_v46 = vld [vmem:[#allocation488_spill] sm:$0xff]  ;;  %v10287_v14 = vld [vmem:[#allocation9_spill] sm:$0xff]  ;;  %v10288_v34 = vld [vmem:[#allocation11_spill] sm:$0xff] }
 0x2da   :  { %v3024_v18 = vmul.f32 %v7363_v62, %v2384_v60  ;;  %v2642_v41 = vmul.f32 %v7369_v3, %v2386_v40  ;;  %v3026_v59 = vmul.f32 %v7377_v32, %v2386_v40  ;;  %v2385_v1 = vsub.f32 %v2257_v10, %v10284_v26  ;;  %v10290_v3 = vld [vmem:[#allocation491_spill] sm:$0xff]  ;;  %v10291_v60 = vld [vmem:[#allocation174_spill] sm:$0xff]  ;;  %v10294_v26 = vld [vmem:[#allocation481_spill] sm:$0xff] }
 0x2db   :  { %10283 = vst [vmem:[#allocation87_spill] sm:$0xff] %v7920_v35  ;;  %v2259_v29 = vsub.f32 %v2001_v38, %v10285_v21  ;;  %v2764_v17 = vsub.f32 %v10286_v46, %v2636_v48  ;;  %v2766_v7 = vsub.f32 %v10287_v14, %v7906_v57  ;;  %v7934_v37 = vmul.f32 %v7339_v4, %v2381_v51  ;;  %v10293_v48 = vld [vmem:[#allocation12_spill] sm:$0xff]  ;;  %v10295_v21 = vld [vmem:[#allocation490_spill] sm:$0xff] }
 0x2dc   :  { %v7937_v20 = vadd.f32 %v3024_v18, %v10288_v34  ;;  %v7940_v62 = vmul.f32 %v7411_v50, %v2383_v25  ;;  %v2768_v32 = vsub.f32 %v10290_v3, %v2640_v47  ;;  %v7944_v10 = vadd.f32 %v3026_v59, %v10291_v60  ;;  %v10296_v51 = vld [vmem:[#allocation134_spill] sm:$0xff]  ;;  %v10297_v25 = vld [vmem:[#allocation135_spill] sm:$0xff]  ;;  %v10298_v47 = vld [vmem:[#allocation484_spill] sm:$0xff] }
 0x2dd   :  { %v2641_v38 = vmul.f32 %v7453_v11, %v2385_v1  ;;  %v2770_v40 = vsub.f32 %v10293_v48, %v2642_v41  ;;  %v2387_v57 = vsub.f32 %v2259_v29, %v10294_v26  ;;  %v2765_v4 = vsub.f32 %v10295_v21, %v2637_v63  ;;  %v10299_v59 = vld [vmem:[#allocation486_spill] sm:$0xff]  ;;  %v10301_v63 = vld [vmem:[#allocation476_spill] sm:$0xff] }
 0x2de   :  { %10289 = vst [vmem:[#allocation215_spill] sm:$0xff] %v7937_v20  ;;  %10292 = vst [vmem:[#allocation315_spill] sm:$0xff] %v7944_v10  ;;  %v2767_v46 = vsub.f32 %v10296_v51, %v2639_v54  ;;  %v7952_v18 = vmul.f32 %v7461_v56, %v2385_v1  ;;  %v2761_v34 = vsub.f32 %v10298_v47, %v7894_v30  ;;  %v10300_v41 = vld [vmem:[#allocation474_spill] sm:$0xff]  ;;  %v10303_v30 = vld [vmem:[#allocation464_spill] sm:$0xff] }
 0x2df   :  { %v2769_v14 = vsub.f32 %v10297_v25, %v2641_v38  ;;  %v2763_v3 = vsub.f32 %v10299_v59, %v7914_v58  ;;  %v2643_v11 = vmul.f32 %v7473_v45, %v2387_v57  ;;  %v2757_v29 = vsub.f32 %v10300_v41, %v7850_v31  ;;  %v10302_v54 = vld [vmem:[#allocation462_spill] sm:$0xff]  ;;  %v10304_v58 = vld [vmem:[#allocation452_spill] sm:$0xff]  ;;  %v10329_v47 = vld [vmem:[#allocation323_spill] sm:$0xff] }
 0x2e0   :  { %v2759_v60 = vsub.f32 %v10301_v63, %v7874_v27  ;;  %v2753_v56 = vsub.f32 %v10302_v54, %v7801_v5  ;;  %v7967_v1 = vmul.f32 %v7499_v0, %v2387_v57  ;;  %v2755_v38 = vsub.f32 %v10303_v30, %v7829_v33  ;;  %v10305_v45 = vld [vmem:[#allocation454_spill] sm:$0xff]  ;;  %v10306_v31 = vld [vmem:[#allocation136_spill] sm:$0xff]  ;;  %v10324_v54 = vld [vmem:[#allocation71_spill] sm:$0xff] }
 0x2e1   :  { %3188 = vmatprep.subr.mxu0 %v2769_v14  ;;  %v2749_v48 = vsub.f32 %v10304_v58, %v7766_v28  ;;  %v2751_v26 = vsub.f32 %v10305_v45, %v7777_v22  ;;  %v2771_v21 = vsub.f32 %v10306_v31, %v2643_v11  ;;  %v10307_v27 = vld [vmem:[#allocation440_spill] sm:$0xff]  ;;  %v10308_v5 = vld [vmem:[#allocation442_spill] sm:$0xff]  ;;  %v10327_v14 = vld [vmem:[#allocation353_spill] sm:$0xff] }
 0x2e2   :  { %3189 = vmatpush2.msra.mxu0 %v2768_v32  ;;  %v2745_v51 = vsub.f32 %v10307_v27, %v7723_v24  ;;  %v10309_v57 = vld [vmem:[#allocation430_spill] sm:$0xff]  ;;  %v10310_v33 = vld [vmem:[#allocation432_spill] sm:$0xff]  ;;  %v10328_v31 = vld [vmem:[#allocation339_spill] sm:$0xff] }
 0x2e3   :  { %v2741_v25 = vsub.f32 %v10309_v57, %v7681_v42  ;;  %3190 = vmatprep.subr.mxu0 %v2765_v4  ;;  %v10311_v28 = vld [vmem:[#allocation418_spill] sm:$0xff]  ;;  %v10312_v22 = vld [vmem:[#allocation420_spill] sm:$0xff]  ;;  %3265 = vmatprep.subr.mxu1 %v2771_v21  ;;  %v10321_v57 = vsub.f32 %v10266_v15, %v7853_v53  ;;  %v8013_v0 = vadd.f32 %v10329_v47, %v10328_v31  ;;  %v10332_v53 = vld [vmem:[#allocation325_spill] sm:$0xff] }
 0x2e4   :  { %v10313_v32 = vld [vmem:[#allocation408_spill] sm:$0xff]  ;;  %3191 = vmatpush2.msra.mxu0 %v2764_v17  ;;  %v10314_v24 = vld [vmem:[#allocation410_spill] sm:$0xff]  ;;  %3266 = vmatpush2.msra.mxu1 %v2770_v40  ;;  %v10331_v17 = vld [vmem:[#allocation63_spill] sm:$0xff] }
 0x2e5   :  { %v10315_v42 = vld [vmem:[#allocation396_spill] sm:$0xff]  ;;  %v10316_v63 = vld [vmem:[#allocation398_spill] sm:$0xff]  ;;  %3192 = vmatprep.subr.mxu0 %v2761_v34  ;;  %3267 = vmatprep.subr.mxu1 %v2767_v46  ;;  %v10330_v46 = vld [vmem:[#allocation341_spill] sm:$0xff] }
 0x2e6   :  { %v10317_v30 = vld [vmem:[#allocation386_spill] sm:$0xff]  ;;  %v10318_v45 = vld [vmem:[#allocation388_spill] sm:$0xff]  ;;  %3193 = vmatpush2.msra.mxu0 %v10321_v57  ;;  %3268 = vmatpush2.msra.mxu1 %v2766_v7  ;;  %v8017_v35 = vadd.f32 %v10331_v17, %v10330_v46  ;;  %v10333_v15 = vld [vmem:[#allocation229_spill] sm:$0xff] }
 0x2e7   :  { %v10319_v27 = vld [vmem:[#allocation340_spill] sm:$0xff]  ;;  %v10320_v21 = vld [vmem:[#allocation374_spill] sm:$0xff]  ;;  %3194 = vmatprep.subr.mxu0 %v2757_v29  ;;  %v8021_v57 = vadd.f32 %v10333_v15, %v10332_v53  ;;  %3269 = vmatprep.subr.mxu1 %v2763_v3  ;;  %v10337_v58 = vld [vmem:[#allocation327_spill] sm:$0xff]  ;;  %v10344_v53 = vsub.f32 %v10274_v6, %v7860_v49 }
 0x2e8   :  { %v10322_v41 = vld [vmem:[#allocation46_spill] sm:$0xff]  ;;  %v10323_v4 = vld [vmem:[#allocation376_spill] sm:$0xff]  ;;  %v10338_v7 = vld [vmem:[#allocation319_spill] sm:$0xff] }
 0x2e9   :  { %v10325_v40 = vld [vmem:[#allocation364_spill] sm:$0xff]  ;;  %v10326_v11 = vld [vmem:[#allocation262_spill] sm:$0xff]  ;;  %v8028_v29 = vadd.f32 %v10338_v7, %v10337_v58  ;;  %3270 = vmatpush2.msra.mxu1 %v10344_v53  ;;  %v10349_v58 = vld [vmem:[#allocation55_spill] sm:$0xff] }
 0x2ea   :  { %v10334_v59 = vld [vmem:[#allocation468_spill] sm:$0xff]  ;;  %v10335_v34 = vld [vmem:[#allocation86_spill] sm:$0xff]  ;;  %3271 = vmatprep.subr.mxu1 %v2759_v60 }
 0x2eb   :  { %v10336_v55 = vsub.f32 %v10334_v59, %v10335_v34  ;;  %v10339_v10 = vld [vmem:[#allocation316_spill] sm:$0xff]  ;;  %v10341_v20 = vld [vmem:[#allocation318_spill] sm:$0xff]  ;;  %v10346_v59 = vld [vmem:[#allocation201_spill] sm:$0xff] }
 0x2ec   :  { %v10340_v47 = vld [vmem:[#allocation56_spill] sm:$0xff]  ;;  %v10342_v17 = vld [vmem:[#allocation62_spill] sm:$0xff] }
 0x2ed   :  { %3195 = vmatpush2.msra.mxu0 %v10336_v55  ;;  %v8032_v31 = vadd.f32 %v10340_v47, %v10339_v10  ;;  %v8036_v46 = vadd.f32 %v10342_v17, %v10341_v20  ;;  %v10345_v3 = vld [vmem:[#allocation306_spill] sm:$0xff]  ;;  %v10348_v34 = vld [vmem:[#allocation308_spill] sm:$0xff] }
 0x2ee   :  { %3196 = vmatprep.subr.mxu0 %v2753_v56  ;;  %v8043_v55 = vadd.f32 %v10346_v59, %v10345_v3  ;;  %v8047_v15 = vadd.f32 %v10349_v58, %v10348_v34  ;;  %v10351_v7 = vld [vmem:[#allocation294_spill] sm:$0xff]  ;;  %v10352_v10 = vld [vmem:[#allocation196_spill] sm:$0xff]  ;;  %v10360_v3 = vld [vmem:[#allocation177_spill] sm:$0xff] }
 0x2ef   :  { %10343 = vst [vmem:[#allocation321_spill] sm:$0xff] %v8036_v46  ;;  %v8051_v47 = vadd.f32 %v10352_v10, %v10351_v7  ;;  %v10353_v20 = vld [vmem:[#allocation456_spill] sm:$0xff]  ;;  %v10354_v17 = vld [vmem:[#allocation190_spill] sm:$0xff]  ;;  %v10365_v7 = vld [vmem:[#allocation47_spill] sm:$0xff] }
 0x2f0   :  { %10347 = vst [vmem:[#allocation88_spill] sm:$0xff] %v8043_v55  ;;  %10350 = vst [vmem:[#allocation59_spill] sm:$0xff] %v8047_v15  ;;  %v10355_v46 = vsub.f32 %v10353_v20, %v10354_v17  ;;  %v10356_v49 = vld [vmem:[#allocation298_spill] sm:$0xff]  ;;  %v10357_v6 = vld [vmem:[#allocation52_spill] sm:$0xff] }
 0x2f1   :  { %v8058_v56 = vadd.f32 %v10357_v6, %v10356_v49  ;;  %v10359_v53 = vld [vmem:[#allocation286_spill] sm:$0xff]  ;;  %v10361_v55 = vld [vmem:[#allocation288_spill] sm:$0xff] }
 0x2f2   :  { %3197 = vmatpush2.msra.mxu0 %v10355_v46  ;;  %v8062_v59 = vadd.f32 %v10360_v3, %v10359_v53  ;;  %v10362_v34 = vld [vmem:[#allocation280_spill] sm:$0xff]  ;;  %v10364_v15 = vld [vmem:[#allocation470_spill] sm:$0xff]  ;;  %v10374_v53 = vld [vmem:[#allocation41_spill] sm:$0xff] }
 0x2f3   :  { %10358 = vst [vmem:[#allocation43_spill] sm:$0xff] %v8058_v56  ;;  %v8066_v58 = vadd.f32 %v10362_v34, %v10361_v55  ;;  %v10366_v10 = vsub.f32 %v10364_v15, %v10365_v7  ;;  %3198 = vmatprep.subr.mxu0 %v2749_v48  ;;  %v10367_v60 = vld [vmem:[#allocation274_spill] sm:$0xff]  ;;  %v10368_v20 = vld [vmem:[#allocation44_spill] sm:$0xff]  ;;  %v10376_v34 = vld [vmem:[#allocation191_spill] sm:$0xff] }
 0x2f4   :  { %v8073_v46 = vadd.f32 %v10368_v20, %v10367_v60  ;;  %v10370_v17 = vld [vmem:[#allocation278_spill] sm:$0xff]  ;;  %v10371_v49 = vld [vmem:[#allocation184_spill] sm:$0xff] }
 0x2f5   :  { %10363 = vst [vmem:[#allocation273_spill] sm:$0xff] %v8066_v58  ;;  %3272 = vmatpush2.msra.mxu1 %v10366_v10  ;;  %v8077_v6 = vadd.f32 %v10371_v49, %v10370_v17  ;;  %v10373_v56 = vld [vmem:[#allocation266_spill] sm:$0xff]  ;;  %v10378_v15 = vld [vmem:[#allocation268_spill] sm:$0xff] }
 0x2f6   :  { %10369 = vst [vmem:[#allocation381_spill] sm:$0xff] %v8073_v46  ;;  %v8081_v3 = vadd.f32 %v10374_v53, %v10373_v56  ;;  %3273 = vmatprep.subr.mxu1 %v2755_v38  ;;  %v10375_v55 = vld [vmem:[#allocation446_spill] sm:$0xff]  ;;  %v10379_v7 = vld [vmem:[#allocation40_spill] sm:$0xff]  ;;  %v10387_v56 = vld [vmem:[#allocation309_spill] sm:$0xff] }
 0x2f7   :  { %10372 = vst [vmem:[#allocation279_spill] sm:$0xff] %v8077_v6  ;;  %v10377_v58 = vsub.f32 %v10375_v55, %v10376_v34  ;;  %v8088_v48 = vadd.f32 %v10379_v7, %v10378_v15  ;;  %v10381_v10 = vld [vmem:[#allocation254_spill] sm:$0xff]  ;;  %v10384_v17 = vld [vmem:[#allocation252_spill] sm:$0xff] }
 0x2f8   :  { %v10382_v60 = vld [vmem:[#allocation166_spill] sm:$0xff]  ;;  %v10386_v6 = vld [vmem:[#allocation460_spill] sm:$0xff] }
 0x2f9   :  { %3199 = vmatpush2.msra.mxu0 %v10377_v58  ;;  %10380 = vst [vmem:[#allocation167_spill] sm:$0xff] %v8088_v48  ;;  %v8092_v20 = vadd.f32 %v10382_v60, %v10381_v10  ;;  %v10383_v46 = vld [vmem:[#allocation258_spill] sm:$0xff]  ;;  %v10388_v53 = vsub.f32 %v10386_v6, %v10387_v56  ;;  %v10389_v38 = vld [vmem:[#allocation244_spill] sm:$0xff]  ;;  %v10401_v56 = vld [vmem:[#allocation33_spill] sm:$0xff] }
 0x2fa   :  { %v8096_v49 = vadd.f32 %v10384_v17, %v10383_v46  ;;  %3200 = vmatprep.subr.mxu0 %v2745_v51  ;;  %v10390_v55 = vld [vmem:[#allocation32_spill] sm:$0xff]  ;;  %v10392_v34 = vld [vmem:[#allocation246_spill] sm:$0xff] }
 0x2fb   :  { %3274 = vmatpush2.msra.mxu1 %v10388_v53  ;;  %v8103_v58 = vadd.f32 %v10390_v55, %v10389_v38  ;;  %v10393_v15 = vld [vmem:[#allocation38_spill] sm:$0xff]  ;;  %v10395_v48 = vld [vmem:[#allocation232_spill] sm:$0xff] }
 0x2fc   :  { %10385 = vst [vmem:[#allocation183_spill] sm:$0xff] %v8096_v49  ;;  %v8107_v7 = vadd.f32 %v10393_v15, %v10392_v34  ;;  %v10396_v10 = vld [vmem:[#allocation156_spill] sm:$0xff]  ;;  %3275 = vmatprep.subr.mxu1 %v2751_v26  ;;  %v10397_v46 = vld [vmem:[#allocation434_spill] sm:$0xff] }
 0x2fd   :  { %10391 = vst [vmem:[#allocation277_spill] sm:$0xff] %v8103_v58  ;;  %v8111_v60 = vadd.f32 %v10396_v10, %v10395_v48  ;;  %v10398_v17 = vld [vmem:[#allocation300_spill] sm:$0xff]  ;;  %v10400_v6 = vld [vmem:[#allocation234_spill] sm:$0xff]  ;;  %v10408_v48 = vld [vmem:[#allocation221_spill] sm:$0xff] }
 0x2fe   :  { %10394 = vst [vmem:[#allocation281_spill] sm:$0xff] %v8107_v7  ;;  %v10399_v49 = vsub.f32 %v10397_v46, %v10398_v17  ;;  %v8118_v51 = vadd.f32 %v10401_v56, %v10400_v6  ;;  %v10403_v53 = vld [vmem:[#allocation220_spill] sm:$0xff]  ;;  %v10404_v38 = vld [vmem:[#allocation30_spill] sm:$0xff] }
 0x2ff   :  { %v8122_v55 = vadd.f32 %v10404_v38, %v10403_v53  ;;  %v10405_v58 = vld [vmem:[#allocation224_spill] sm:$0xff]  ;;  %v10410_v26 = vld [vmem:[#allocation210_spill] sm:$0xff] }
 0x300   :  { %3201 = vmatpush2.msra.mxu0 %v10399_v49  ;;  %10402 = vst [vmem:[#allocation168_spill] sm:$0xff] %v8118_v51  ;;  %v10406_v34 = vld [vmem:[#allocation28_spill] sm:$0xff]  ;;  %v10416_v51 = vld [vmem:[#allocation198_spill] sm:$0xff] }
 0x301   :  { %v8126_v15 = vadd.f32 %v10406_v34, %v10405_v58  ;;  %v10407_v7 = vld [vmem:[#allocation448_spill] sm:$0xff]  ;;  %3202 = vmatprep.subr.mxu0 %v2741_v25  ;;  %v10419_v58 = vsub.f32 %v10308_v5, %v7747_v43  ;;  %v10432_v5 = vsub.f32 %v10311_v28, %v7585_v8  ;;  %v10442_v28 = vld [vmem:[#allocation137_spill] sm:$0xff] }
 0x302   :  { %v10409_v10 = vsub.f32 %v10407_v7, %v10408_v48  ;;  %v10411_v46 = vld [vmem:[#allocation216_spill] sm:$0xff] }
 0x303   :  { %v8133_v49 = vadd.f32 %v10411_v46, %v10410_v26  ;;  %v10413_v17 = vld [vmem:[#allocation212_spill] sm:$0xff] }
 0x304   :  { %3276 = vmatpush2.msra.mxu1 %v10409_v10  ;;  %v10414_v6 = vld [vmem:[#allocation24_spill] sm:$0xff]  ;;  %v10424_v10 = vld [vmem:[#allocation206_spill] sm:$0xff] }
 0x305   :  { %10412 = vst [vmem:[#allocation383_spill] sm:$0xff] %v8133_v49  ;;  %v8137_v56 = vadd.f32 %v10414_v6, %v10413_v17  ;;  %v10417_v53 = vld [vmem:[#allocation20_spill] sm:$0xff]  ;;  %3277 = vmatprep.subr.mxu1 %v10419_v58  ;;  %v10426_v49 = vld [vmem:[#allocation146_spill] sm:$0xff] }
 0x306   :  { %v8141_v38 = vadd.f32 %v10417_v53, %v10416_v51  ;;  %v10420_v34 = vld [vmem:[#allocation424_spill] sm:$0xff]  ;;  %v10429_v53 = vld [vmem:[#allocation438_spill] sm:$0xff] }
 0x307   :  { %10415 = vst [vmem:[#allocation89_spill] sm:$0xff] %v8137_v56  ;;  %v10421_v7 = vld [vmem:[#allocation312_spill] sm:$0xff]  ;;  %v10428_v56 = vld [vmem:[#allocation22_spill] sm:$0xff] }
 0x308   :  { %10418 = vst [vmem:[#allocation236_spill] sm:$0xff] %v8141_v38  ;;  %v10422_v48 = vsub.f32 %v10420_v34, %v10421_v7  ;;  %v10423_v25 = vld [vmem:[#allocation200_spill] sm:$0xff]  ;;  %v10430_v38 = vld [vmem:[#allocation61_spill] sm:$0xff]  ;;  %v10433_v58 = vld [vmem:[#allocation178_spill] sm:$0xff] }
 0x309   :  { %v8151_v26 = vadd.f32 %v10424_v10, %v10423_v25  ;;  %v10425_v46 = vld [vmem:[#allocation188_spill] sm:$0xff]  ;;  %v10431_v43 = vsub.f32 %v10429_v53, %v10430_v38  ;;  %v10434_v34 = vld [vmem:[#allocation141_spill] sm:$0xff]  ;;  %v10436_v25 = vld [vmem:[#allocation142_spill] sm:$0xff]  ;;  %v10438_v38 = vsub.f32 %v10310_v33, %v7703_v12  ;;  %v8187_v53 = vadd.f32 %v7967_v1, %v10442_v28 }
 0x30a   :  { %3203 = vmatpush2.msra.mxu0 %v10422_v48  ;;  %v8155_v17 = vadd.f32 %v10426_v49, %v10425_v46  ;;  %v10427_v6 = vld [vmem:[#allocation192_spill] sm:$0xff]  ;;  %v8169_v7 = vadd.f32 %v10434_v34, %v10433_v58  ;;  %v10444_v58 = vld [vmem:[#allocation10_spill] sm:$0xff]  ;;  %v10448_v33 = vsub.f32 %v10313_v32, %v7514_v2  ;;  %v10457_v32 = vld [vmem:[#allocation477_spill] sm:$0xff] }
 0x30b   :  { %v8159_v51 = vadd.f32 %v10428_v56, %v10427_v6  ;;  %3278 = vmatpush2.msra.mxu1 %v10431_v43  ;;  %3204 = vmatprep.subr.mxu0 %v10432_v5  ;;  %v10435_v48 = vld [vmem:[#allocation180_spill] sm:$0xff]  ;;  %v10440_v6 = vld [vmem:[#allocation317_spill] sm:$0xff]  ;;  %v10445_v34 = vld [vmem:[#allocation426_spill] sm:$0xff] }
 0x30c   :  { %v8173_v49 = vadd.f32 %v10436_v25, %v10435_v48  ;;  %v10437_v10 = vld [vmem:[#allocation492_spill] sm:$0xff]  ;;  %3279 = vmatprep.subr.mxu1 %v10438_v38  ;;  %v10443_v43 = vld [vmem:[#allocation133_spill] sm:$0xff]  ;;  %v10451_v38 = vld [vmem:[#allocation475_spill] sm:$0xff] }
 0x30d   :  { %v8177_v56 = vadd.f32 %v7952_v18, %v10437_v10  ;;  %v10439_v46 = vld [vmem:[#allocation412_spill] sm:$0xff]  ;;  %v8191_v5 = vadd.f32 %v7934_v37, %v10443_v43  ;;  %v8195_v18 = vadd.f32 %v7940_v62, %v10444_v58  ;;  %v10446_v48 = vld [vmem:[#allocation209_spill] sm:$0xff]  ;;  %v10450_v10 = vld [vmem:[#allocation487_spill] sm:$0xff] }
 0x30e   :  { %v10441_v8 = vsub.f32 %v10439_v46, %v10440_v6  ;;  %v10447_v12 = vsub.f32 %v10445_v34, %v10446_v48  ;;  %v10449_v25 = vld [vmem:[#allocation485_spill] sm:$0xff]  ;;  %v8209_v37 = vadd.f32 %v7917_v52, %v10450_v10  ;;  %v10453_v6 = vsub.f32 %v10312_v22, %v7635_v9  ;;  %v10455_v28 = vld [vmem:[#allocation326_spill] sm:$0xff]  ;;  %v10459_v58 = vld [vmem:[#allocation463_spill] sm:$0xff] }
 0x30f   :  { %v8205_v1 = vadd.f32 %v7911_v19, %v10449_v25  ;;  %v10452_v46 = vld [vmem:[#allocation49_spill] sm:$0xff]  ;;  %v10460_v34 = vld [vmem:[#allocation314_spill] sm:$0xff]  ;;  %v10461_v48 = vld [vmem:[#allocation467_spill] sm:$0xff]  ;;  %v10466_v22 = vsub.f32 %v10315_v42, %v7456_v36 }
 0x310   :  { %3205 = vmatpush2.msra.mxu0 %v10441_v8  ;;  %3280 = vmatpush2.msra.mxu1 %v10447_v12  ;;  %v8213_v62 = vadd.f32 %v10452_v46, %v10451_v38  ;;  %v10454_v8 = vld [vmem:[#allocation402_spill] sm:$0xff]  ;;  %v10458_v43 = vld [vmem:[#allocation285_spill] sm:$0xff]  ;;  %v8227_v52 = vadd.f32 %v10460_v34, %v10459_v58  ;;  %v10463_v25 = vld [vmem:[#allocation416_spill] sm:$0xff]  ;;  %v10473_v34 = vsub.f32 %v10314_v24, %v7549_v16 }
 0x311   :  { %3206 = vmatprep.subr.mxu0 %v10448_v33  ;;  %3281 = vmatprep.subr.mxu1 %v10453_v6  ;;  %v10456_v2 = vsub.f32 %v10454_v8, %v10455_v28  ;;  %v8223_v19 = vadd.f32 %v10458_v43, %v10457_v32  ;;  %v10462_v12 = vld [vmem:[#allocation289_spill] sm:$0xff]  ;;  %v10464_v10 = vld [vmem:[#allocation82_spill] sm:$0xff]  ;;  %v10469_v8 = vld [vmem:[#allocation455_spill] sm:$0xff]  ;;  %v10486_v24 = vsub.f32 %v10317_v30, %v7319_v23 }
 0x312   :  { %v8231_v33 = vadd.f32 %v10462_v12, %v10461_v48  ;;  %v10465_v9 = vsub.f32 %v10463_v25, %v10464_v10  ;;  %v10467_v38 = vld [vmem:[#allocation453_spill] sm:$0xff]  ;;  %v10470_v28 = vld [vmem:[#allocation51_spill] sm:$0xff]  ;;  %v10474_v48 = vld [vmem:[#allocation390_spill] sm:$0xff] }
 0x313   :  { %3207 = vmatpush2.msra.mxu0 %v10456_v2  ;;  %v10468_v46 = vld [vmem:[#allocation301_spill] sm:$0xff]  ;;  %v8245_v2 = vadd.f32 %v10470_v28, %v10469_v8  ;;  %v10472_v43 = vld [vmem:[#allocation195_spill] sm:$0xff]  ;;  %v10475_v12 = vld [vmem:[#allocation352_spill] sm:$0xff] }
 0x314   :  { %3282 = vmatpush2.msra.mxu1 %v10465_v9  ;;  %3208 = vmatprep.subr.mxu0 %v10466_v22  ;;  %v8241_v6 = vadd.f32 %v10468_v46, %v10467_v38  ;;  %v10471_v32 = vld [vmem:[#allocation441_spill] sm:$0xff]  ;;  %v10476_v36 = vsub.f32 %v10474_v48, %v10475_v12  ;;  %v10479_v9 = vld [vmem:[#allocation431_spill] sm:$0xff]  ;;  %v10480_v22 = vld [vmem:[#allocation304_spill] sm:$0xff] }
 0x315   :  { %v8249_v58 = vadd.f32 %v10472_v43, %v10471_v32  ;;  %3283 = vmatprep.subr.mxu1 %v10473_v34  ;;  %v10477_v42 = vld [vmem:[#allocation445_spill] sm:$0xff]  ;;  %v8263_v38 = vadd.f32 %v10480_v22, %v10479_v9  ;;  %v10482_v8 = vld [vmem:[#allocation303_spill] sm:$0xff]  ;;  %v10483_v32 = vld [vmem:[#allocation404_spill] sm:$0xff] }
 0x316   :  { %3209 = vmatpush2.msra.mxu0 %v10476_v36  ;;  %v10478_v25 = vld [vmem:[#allocation85_spill] sm:$0xff]  ;;  %v10487_v34 = vld [vmem:[#allocation419_spill] sm:$0xff] }
 0x317   :  { %v8259_v10 = vadd.f32 %v10478_v25, %v10477_v42  ;;  %v10481_v46 = vld [vmem:[#allocation433_spill] sm:$0xff]  ;;  %3210 = vmatprep.subr.mxu0 %v10486_v24  ;;  %v10489_v36 = vld [vmem:[#allocation423_spill] sm:$0xff] }
 0x318   :  { %v8267_v28 = vadd.f32 %v10482_v8, %v10481_v46  ;;  %v10484_v43 = vld [vmem:[#allocation313_spill] sm:$0xff]  ;;  %v10490_v42 = vld [vmem:[#allocation83_spill] sm:$0xff]  ;;  %v10495_v8 = vsub.f32 %v10316_v63, %v7476_v61  ;;  %v10508_v63 = vsub.f32 %v10320_v21, %v10319_v27 }
 0x319   :  { %v10485_v16 = vsub.f32 %v10483_v32, %v10484_v43  ;;  %v10488_v48 = vld [vmem:[#allocation305_spill] sm:$0xff]  ;;  %v8281_v25 = vadd.f32 %v10490_v42, %v10489_v36  ;;  %v10496_v32 = vld [vmem:[#allocation380_spill] sm:$0xff]  ;;  %v10499_v30 = vld [vmem:[#allocation411_spill] sm:$0xff] }
 0x31a   :  { %v8277_v12 = vadd.f32 %v10488_v48, %v10487_v34  ;;  %v10492_v9 = vld [vmem:[#allocation409_spill] sm:$0xff]  ;;  %v10497_v43 = vld [vmem:[#allocation332_spill] sm:$0xff]  ;;  %v10502_v48 = vld [vmem:[#allocation79_spill] sm:$0xff] }
 0x31b   :  { %3284 = vmatpush2.msra.mxu1 %v10485_v16  ;;  %10491 = vst [vmem:[#allocation90_spill] sm:$0xff] %v8281_v25  ;;  %v10493_v22 = vld [vmem:[#allocation361_spill] sm:$0xff]  ;;  %v10498_v23 = vsub.f32 %v10496_v32, %v10497_v43  ;;  %v10500_v16 = vld [vmem:[#allocation302_spill] sm:$0xff]  ;;  %v10504_v25 = vld [vmem:[#allocation295_spill] sm:$0xff] }
 0x31c   :  { %v8285_v46 = vadd.f32 %v10493_v22, %v10492_v9  ;;  %3285 = vmatprep.subr.mxu1 %v10495_v8  ;;  %v8295_v24 = vadd.f32 %v10500_v16, %v10499_v30  ;;  %v10501_v34 = vld [vmem:[#allocation397_spill] sm:$0xff]  ;;  %v10505_v22 = vld [vmem:[#allocation394_spill] sm:$0xff]  ;;  %v10509_v8 = vld [vmem:[#allocation387_spill] sm:$0xff] }
 0x31d   :  { %3211 = vmatpush2.msra.mxu0 %v10498_v23  ;;  %v8299_v36 = vadd.f32 %v10502_v48, %v10501_v34  ;;  %v10503_v42 = vld [vmem:[#allocation401_spill] sm:$0xff]  ;;  %v10510_v32 = vld [vmem:[#allocation348_spill] sm:$0xff]  ;;  %v10514_v34 = vld [vmem:[#allocation375_spill] sm:$0xff] }
 0x31e   :  { %10494 = vst [vmem:[#allocation311_spill] sm:$0xff] %v8285_v46  ;;  %v8303_v9 = vadd.f32 %v10504_v25, %v10503_v42  ;;  %v10506_v46 = vld [vmem:[#allocation283_spill] sm:$0xff]  ;;  %3212 = vmatprep.subr.mxu0 %v10508_v63  ;;  %v8313_v43 = vadd.f32 %v10510_v32, %v10509_v8  ;;  %v10511_v23 = vld [vmem:[#allocation389_spill] sm:$0xff]  ;;  %v10512_v30 = vld [vmem:[#allocation324_spill] sm:$0xff] }
 0x31f   :  { %v10507_v61 = vsub.f32 %v10505_v22, %v10506_v46  ;;  %v8317_v16 = vadd.f32 %v10512_v30, %v10511_v23  ;;  %v10515_v48 = vld [vmem:[#allocation328_spill] sm:$0xff]  ;;  %v10517_v46 = vsub.f32 %v10318_v45, %v7399_v13  ;;  %v10519_v22 = vld [vmem:[#allocation73_spill] sm:$0xff]  ;;  %v10521_v21 = vld [vmem:[#allocation379_spill] sm:$0xff]  ;;  %v10531_v45 = vsub.f32 %v10325_v40, %v10324_v54 }
 0x320   :  { %v8321_v25 = vadd.f32 %v10515_v48, %v10514_v34  ;;  %v10518_v42 = vld [vmem:[#allocation368_spill] sm:$0xff]  ;;  %v10523_v8 = vld [vmem:[#allocation365_spill] sm:$0xff]  ;;  %v10525_v30 = vld [vmem:[#allocation367_spill] sm:$0xff] }
 0x321   :  { %3286 = vmatpush2.msra.mxu1 %v10507_v61  ;;  %10513 = vst [vmem:[#allocation322_spill] sm:$0xff] %v8317_v16  ;;  %v10520_v27 = vsub.f32 %v10518_v42, %v10519_v22  ;;  %v10522_v61 = vld [vmem:[#allocation282_spill] sm:$0xff]  ;;  %v10524_v32 = vld [vmem:[#allocation72_spill] sm:$0xff]  ;;  %v10526_v16 = vld [vmem:[#allocation45_spill] sm:$0xff] }
 0x322   :  { %10516 = vst [vmem:[#allocation269_spill] sm:$0xff] %v8321_v25  ;;  %3287 = vmatprep.subr.mxu1 %v10517_v46  ;;  %v8331_v63 = vadd.f32 %v10522_v61, %v10521_v21  ;;  %v8335_v23 = vadd.f32 %v10524_v32, %v10523_v8  ;;  %v8339_v34 = vadd.f32 %v10526_v16, %v10525_v30  ;;  %v10528_v48 = vld [vmem:[#allocation382_spill] sm:$0xff]  ;;  %v10529_v25 = vld [vmem:[#allocation77_spill] sm:$0xff]  ;;  %v10533_v42 = vld [vmem:[#allocation263_spill] sm:$0xff] }
 0x323   :  { %3213 = vmatpush2.msra.mxu0 %v10520_v27  ;;  %v10530_v13 = vsub.f32 %v10528_v48, %v10529_v25  ;;  %v10532_v46 = vld [vmem:[#allocation354_spill] sm:$0xff]  ;;  %v10536_v21 = vld [vmem:[#allocation320_spill] sm:$0xff]  ;;  %v10538_v8 = vld [vmem:[#allocation345_spill] sm:$0xff]  ;;  %v10543_v48 = vsub.f32 %v10323_v4, %v10322_v41 }
 0x324   :  { %10527 = vst [vmem:[#allocation42_spill] sm:$0xff] %v8339_v34  ;;  %3214 = vmatprep.subr.mxu0 %v10531_v45  ;;  %v8349_v22 = vadd.f32 %v10533_v42, %v10532_v46  ;;  %v10535_v27 = vld [vmem:[#allocation358_spill] sm:$0xff]  ;;  %v10539_v32 = vld [vmem:[#allocation67_spill] sm:$0xff] }
 0x325   :  { %3288 = vmatpush2.msra.mxu1 %v10530_v13  ;;  %v8353_v61 = vadd.f32 %v10536_v21, %v10535_v27  ;;  %v8357_v16 = vadd.f32 %v10539_v32, %v10538_v8  ;;  %v10541_v30 = vld [vmem:[#allocation255_spill] sm:$0xff]  ;;  %v10545_v40 = vld [vmem:[#allocation366_spill] sm:$0xff]  ;;  %v10550_v21 = vld [vmem:[#allocation64_spill] sm:$0xff] }
 0x326   :  { %10534 = vst [vmem:[#allocation271_spill] sm:$0xff] %v8349_v22  ;;  %v10542_v34 = vld [vmem:[#allocation347_spill] sm:$0xff]  ;;  %3289 = vmatprep.subr.mxu1 %v10543_v48  ;;  %v10547_v46 = vld [vmem:[#allocation66_spill] sm:$0xff]  ;;  %v10554_v22 = vld [vmem:[#allocation372_spill] sm:$0xff]  ;;  %v10557_v48 = vsub.f32 %v10327_v14, %v10326_v11 }
 0x327   :  { %10537 = vst [vmem:[#allocation260_spill] sm:$0xff] %v8353_v61  ;;  %10540 = vst [vmem:[#allocation39_spill] sm:$0xff] %v8357_v16  ;;  %v2712_v25 = vsub.f32 %v10542_v34, %v10541_v30  ;;  %v10544_v54 = vld [vmem:[#allocation275_spill] sm:$0xff]  ;;  %v10549_v27 = vld [vmem:[#allocation346_spill] sm:$0xff] }
 0x328   :  { %v2719_v13 = vsub.f32 %v10545_v40, %v10544_v54  ;;  %v10546_v45 = vld [vmem:[#allocation359_spill] sm:$0xff]  ;;  %v8371_v61 = vadd.f32 %v10550_v21, %v10549_v27  ;;  %v10551_v8 = vld [vmem:[#allocation214_spill] sm:$0xff]  ;;  %v10553_v34 = vld [vmem:[#allocation360_spill] sm:$0xff] }
 0x329   :  { %v10548_v42 = vsub.f32 %v10546_v45, %v10547_v46  ;;  %v2582_v32 = vmul.f32 %v7299_v39, %v10551_v8  ;;  %v10552_v16 = vld [vmem:[#allocation242_spill] sm:$0xff]  ;;  %v10555_v41 = vld [vmem:[#allocation75_spill] sm:$0xff]  ;;  %v10558_v54 = vld [vmem:[#allocation248_spill] sm:$0xff] }
 0x32a   :  { %v2718_v30 = vsub.f32 %v10553_v34, %v10552_v16  ;;  %v10556_v4 = vsub.f32 %v10554_v22, %v10555_v41  ;;  %v10559_v40 = vld [vmem:[#allocation344_spill] sm:$0xff]  ;;  %v10561_v27 = vld [vmem:[#allocation247_spill] sm:$0xff]  ;;  %v10562_v21 = vld [vmem:[#allocation74_spill] sm:$0xff] }
 0x32b   :  { %3215 = vmatpush2.msra.mxu0 %v10548_v42  ;;  %v2709_v45 = vsub.f32 %v10559_v40, %v10558_v54  ;;  %v10560_v46 = vld [vmem:[#allocation336_spill] sm:$0xff]  ;;  %v2708_v39 = vsub.f32 %v10562_v21, %v10561_v27  ;;  %v10563_v8 = vld [vmem:[#allocation241_spill] sm:$0xff]  ;;  %v10564_v16 = vld [vmem:[#allocation355_spill] sm:$0xff] }
 0x32c   :  { %3290 = vmatpush2.msra.mxu1 %v10556_v4  ;;  %3216 = vmatprep.subr.mxu0 %v10557_v48  ;;  %v2455_v42 = vmul.f32 %v7411_v50, %v10560_v46  ;;  %v2715_v34 = vsub.f32 %v10564_v16, %v10563_v8  ;;  %v10565_v22 = vld [vmem:[#allocation333_spill] sm:$0xff]  ;;  %v10566_v4 = vld [vmem:[#allocation256_spill] sm:$0xff]  ;;  %v10567_v14 = vld [vmem:[#allocation351_spill] sm:$0xff] }
 0x32d   :  { %3291 = vmatprep.subr.mxu1 %v2719_v13  ;;  %3217 = vmatpush2.msra.mxu0 %v2712_v25  ;;  %v2454_v41 = vmul.f32 %v7276_v44, %v10565_v22  ;;  %v2714_v11 = vsub.f32 %v10567_v14, %v10566_v4  ;;  %v8398_v50 = vld [vmem:[%s8551_s3] sm:$0xff]  ;;  %v10568_v48 = vld [vmem:[#allocation70_spill] sm:$0xff]  ;;  %v10570_v25 = vld [vmem:[#allocation235_spill] sm:$0xff] }
 0x32e   :  { %3292 = vmatpush2.msra.mxu1 %v2718_v30  ;;  %3218 = vmatprep.subr.mxu0 %v2709_v45  ;;  %v2711_v13 = vsub.f32 %v2455_v42, %v10568_v48  ;;  %v10569_v44 = vld [vmem:[#allocation60_spill] sm:$0xff]  ;;  %v10572_v30 = vld [vmem:[#allocation58_spill] sm:$0xff]  ;;  %v10577_v46 = vld [vmem:[#allocation59_spill] sm:$0xff] }
 0x32f   :  { %3293 = vmatprep.subr.mxu1 %v2715_v34  ;;  %3219 = vmatpush2.msra.mxu0 %v2708_v39  ;;  %v2710_v54 = vsub.f32 %v2454_v41, %v2582_v32  ;;  %v10571_v32 = vld [vmem:[#allocation57_spill] sm:$0xff]  ;;  %v10574_v40 = vld [vmem:[#allocation208_spill] sm:$0xff]  ;;  %v10575_v45 = vld [vmem:[#allocation290_spill] sm:$0xff] }
 0x330   :  { %3294 = vmatpush2.msra.mxu1 %v2714_v11  ;;  %3318 = vmatprep.subr.mxu0 %v8013_v0  ;;  %v10573_v0 = vld [vmem:[#allocation321_spill] sm:$0xff]  ;;  %v10578_v42 = vld [vmem:[#allocation284_spill] sm:$0xff]  ;;  %v10581_v27 = vld [vmem:[#allocation270_spill] sm:$0xff] }
 0x331   :  { %3295 = vmatprep.subr.mxu1 %v2711_v13  ;;  %3221 = vmatmul.mubr.f32.vlgmr.msra.gmra.mxu0 %v8398_v50  ;;  %v10583_v21 = vld [vmem:[#allocation273_spill] sm:$0xff]  ;;  %v10584_v39 = vld [vmem:[#allocation170_spill] sm:$0xff]  ;;  %v10585_v8 = vld [vmem:[#allocation171_spill] sm:$0xff] }
 0x332   :  { %3296 = vmatpush2.msra.mxu1 %v2710_v54  ;;  %3319 = vmatpush1.msra.mxu0 %v10569_v44  ;;  %v10586_v16 = vld [vmem:[#allocation381_spill] sm:$0xff]  ;;  %v10587_v34 = vld [vmem:[#allocation279_spill] sm:$0xff]  ;;  %v10594_v11 = vld [vmem:[#allocation34_spill] sm:$0xff] }
 0x333   :  { %3395 = vmatprep.subr.mxu1 %v8017_v35  ;;  %3298 = vmatmul.mubr.f32.vlgmr.msra.gmra.mxu1 %v8398_v50  ;;  %v10576_v35 = vld [vmem:[#allocation88_spill] sm:$0xff]  ;;  %v10588_v22 = vld [vmem:[#allocation163_spill] sm:$0xff]  ;;  %v10595_v48 = vld [vmem:[#allocation238_spill] sm:$0xff] }
 0x334   :  { %3396 = vmatpush1.msra.mxu1 %v10570_v25  ;;  %3320 = vmatprep.subr.mxu0 %v8021_v57  ;;  %v10579_v57 = vld [vmem:[#allocation48_spill] sm:$0xff]  ;;  %v10590_v41 = vld [vmem:[#allocation167_spill] sm:$0xff]  ;;  %v10596_v13 = vld [vmem:[#allocation277_spill] sm:$0xff] }
 0x335   :  { %3397 = vmatprep.subr.mxu1 %v8028_v29  ;;  %3321 = vmatpush1.msra.mxu0 %v10571_v32  ;;  %v10580_v29 = vld [vmem:[#allocation43_spill] sm:$0xff]  ;;  %v10597_v54 = vld [vmem:[#allocation281_spill] sm:$0xff]  ;;  %v10600_v25 = vld [vmem:[#allocation168_spill] sm:$0xff] }
 0x336   :  { %3398 = vmatpush1.msra.mxu1 %v10572_v30  ;;  %3322 = vmatprep.subr.mxu0 %v8032_v31  ;;  %v10582_v31 = vld [vmem:[#allocation272_spill] sm:$0xff]  ;;  %v10591_v4 = vld [vmem:[#allocation159_spill] sm:$0xff]  ;;  %v10598_v44 = vld [vmem:[#allocation157_spill] sm:$0xff] }
 0x337   :  { %3399 = vmatprep.subr.mxu1 %v10573_v0  ;;  %3323 = vmatpush1.msra.mxu0 %v10574_v40  ;;  %v10593_v14 = vld [vmem:[#allocation183_spill] sm:$0xff]  ;;  %v10601_v32 = vld [vmem:[#allocation153_spill] sm:$0xff]  ;;  %v10604_v0 = vld [vmem:[#allocation148_spill] sm:$0xff] }
 0x338   :  { %3400 = vmatpush1.msra.mxu1 %v10575_v45  ;;  %3324 = vmatprep.subr.mxu0 %v10576_v35  ;;  %v10603_v30 = vld [vmem:[#allocation147_spill] sm:$0xff]  ;;  %v10606_v45 = vld [vmem:[#allocation89_spill] sm:$0xff] }
 0x339   :  { %3401 = vmatprep.subr.mxu1 %v10577_v46  ;;  %3325 = vmatpush1.msra.mxu0 %v10578_v42  ;;  %v10605_v40 = vld [vmem:[#allocation383_spill] sm:$0xff]  ;;  %v10609_v46 = vld [vmem:[#allocation236_spill] sm:$0xff] }
 0x33a   :  { %3402 = vmatpush1.msra.mxu1 %v10579_v57  ;;  %3326 = vmatprep.subr.mxu0 %v8051_v47  ;;  %v10589_v47 = vld [vmem:[#allocation164_spill] sm:$0xff]  ;;  %v10607_v35 = vld [vmem:[#allocation143_spill] sm:$0xff] }
 0x33b   :  { %3403 = vmatprep.subr.mxu1 %v10580_v29  ;;  %3327 = vmatpush1.msra.mxu0 %v10581_v27  ;;  %v10610_v42 = vld [vmem:[#allocation139_spill] sm:$0xff]  ;;  %v10614_v29 = vld [vmem:[#allocation13_spill] sm:$0xff]  ;;  %v10615_v27 = vld [vmem:[#allocation172_spill] sm:$0xff] }
 0x33c   :  { %3404 = vmatpush1.msra.mxu1 %v10582_v31  ;;  %3328 = vmatprep.subr.mxu0 %v8062_v59  ;;  %v10592_v59 = vld [vmem:[#allocation160_spill] sm:$0xff]  ;;  %v10613_v57 = vld [vmem:[#allocation15_spill] sm:$0xff] }
 0x33d   :  { %3405 = vmatprep.subr.mxu1 %v10583_v21  ;;  %3329 = vmatpush1.msra.mxu0 %v10584_v39  ;;  %v10633_v31 = vld [vmem:[#allocation296_spill] sm:$0xff]  ;;  %v10640_v39 = vld [vmem:[#allocation322_spill] sm:$0xff] }
 0x33e   :  { %3406 = vmatpush1.msra.mxu1 %v10585_v8  ;;  %3330 = vmatprep.subr.mxu0 %v10586_v16  ;;  %v10636_v21 = vld [vmem:[#allocation80_spill] sm:$0xff]  ;;  %v10642_v16 = vld [vmem:[#allocation78_spill] sm:$0xff] }
 0x33f   :  { %3407 = vmatprep.subr.mxu1 %v10587_v34  ;;  %3331 = vmatpush1.msra.mxu0 %v10588_v22  ;;  %v10641_v8 = vld [vmem:[#allocation76_spill] sm:$0xff]  ;;  %v10647_v22 = vld [vmem:[#allocation331_spill] sm:$0xff] }
 0x340   :  { %3408 = vmatpush1.msra.mxu1 %v10589_v47  ;;  %3332 = vmatprep.subr.mxu0 %v8081_v3  ;;  %v10599_v3 = vld [vmem:[#allocation158_spill] sm:$0xff]  ;;  %v10644_v34 = vld [vmem:[#allocation276_spill] sm:$0xff]  ;;  %v10649_v47 = vld [vmem:[#allocation271_spill] sm:$0xff] }
 0x341   :  { %3409 = vmatprep.subr.mxu1 %v10590_v41  ;;  %3333 = vmatpush1.msra.mxu0 %v10591_v4  ;;  %v10650_v41 = vld [vmem:[#allocation260_spill] sm:$0xff] }
 0x342   :  { %3410 = vmatpush1.msra.mxu1 %v10592_v59  ;;  %3334 = vmatprep.subr.mxu0 %v8092_v20  ;;  %v10602_v20 = vld [vmem:[#allocation154_spill] sm:$0xff]  ;;  %v10651_v4 = vld [vmem:[#allocation68_spill] sm:$0xff]  ;;  %v10652_v59 = vld [vmem:[#allocation69_spill] sm:$0xff] }
 0x343   :  { %3411 = vmatprep.subr.mxu1 %v10593_v14  ;;  %3335 = vmatpush1.msra.mxu0 %v10594_v11  ;;  %v10653_v14 = vld [vmem:[#allocation39_spill] sm:$0xff]  ;;  %v10654_v11 = vld [vmem:[#allocation65_spill] sm:$0xff] }
 0x344   :  { %3412 = vmatpush1.msra.mxu1 %v10595_v48  ;;  %3336 = vmatprep.subr.mxu0 %v10596_v13  ;;  %v10655_v48 = vld [vmem:[#allocation310_spill] sm:$0xff]  ;;  %v3741_v13 = vld [vmem:[%s8551_s3 + $0x8] sm:$0xff] }
 0x345   :  { %3413 = vmatprep.subr.mxu1 %v10597_v54  ;;  %3337 = vmatpush1.msra.mxu0 %v10598_v44 }
 0x346   :  { %3414 = vmatpush1.msra.mxu1 %v10599_v3  ;;  %3338 = vmatprep.subr.mxu0 %v8111_v60  ;;  %v10608_v60 = vld [vmem:[#allocation144_spill] sm:$0xff] }
 0x347   :  { %3415 = vmatprep.subr.mxu1 %v10600_v25  ;;  %3339 = vmatpush1.msra.mxu0 %v10601_v32 }
 0x348   :  { %3416 = vmatpush1.msra.mxu1 %v10602_v20  ;;  %3340 = vmatprep.subr.mxu0 %v8122_v55  ;;  %v10611_v55 = vld [vmem:[#allocation140_spill] sm:$0xff] }
 0x349   :  { %3417 = vmatprep.subr.mxu1 %v8126_v15  ;;  %3341 = vmatpush1.msra.mxu0 %v10603_v30  ;;  %v10612_v15 = vld [vmem:[#allocation14_spill] sm:$0xff] }
 0x34a   :  { %3418 = vmatpush1.msra.mxu1 %v10604_v0  ;;  %3342 = vmatprep.subr.mxu0 %v10605_v40 }
 0x34b   :  { %3419 = vmatprep.subr.mxu1 %v10606_v45  ;;  %3343 = vmatpush1.msra.mxu0 %v10607_v35 }
 0x34c   :  { %3420 = vmatpush1.msra.mxu1 %v10608_v60  ;;  %3344 = vmatprep.subr.mxu0 %v10609_v46 }
 0x34d   :  { %3421 = vmatprep.subr.mxu1 %v8151_v26  ;;  %3345 = vmatpush1.msra.mxu0 %v10610_v42  ;;  %v10616_v26 = vld [vmem:[#allocation215_spill] sm:$0xff] }
 0x34e   :  { %3422 = vmatpush1.msra.mxu1 %v10611_v55  ;;  %3346 = vmatprep.subr.mxu0 %v8155_v17  ;;  %v10617_v17 = vld [vmem:[#allocation315_spill] sm:$0xff] }
 0x34f   :  { %3423 = vmatprep.subr.mxu1 %v8159_v51  ;;  %3347 = vmatpush1.msra.mxu0 %v10612_v15  ;;  %v10618_v51 = vld [vmem:[#allocation287_spill] sm:$0xff] }
 0x350   :  { %3424 = vmatpush1.msra.mxu1 %v10613_v57  ;;  %3348 = vmatprep.subr.mxu0 %v8169_v7  ;;  %v10619_v7 = vld [vmem:[#allocation87_spill] sm:$0xff] }
 0x351   :  { %3425 = vmatprep.subr.mxu1 %v8173_v49  ;;  %3349 = vmatpush1.msra.mxu0 %v10614_v29  ;;  %v10620_v49 = vld [vmem:[#allocation176_spill] sm:$0xff] }
 0x352   :  { %3426 = vmatpush1.msra.mxu1 %v10615_v27  ;;  %3350 = vmatprep.subr.mxu0 %v8177_v56  ;;  %v10621_v56 = vld [vmem:[#allocation50_spill] sm:$0xff] }
 0x353   :  { %3427 = vmatprep.subr.mxu1 %v8187_v53  ;;  %3351 = vmatpush2.msra.mxu0 %v10616_v26  ;;  %v10622_v53 = vld [vmem:[#allocation222_spill] sm:$0xff] }
 0x354   :  { %3428 = vmatpush2.msra.mxu1 %v10617_v17  ;;  %3352 = vmatprep.subr.mxu0 %v8191_v5  ;;  %v10623_v5 = vld [vmem:[#allocation291_spill] sm:$0xff] }
 0x355   :  { %3429 = vmatprep.subr.mxu1 %v8195_v18  ;;  %3353 = vmatpush2.msra.mxu0 %v10618_v51  ;;  %v10624_v18 = vld [vmem:[#allocation297_spill] sm:$0xff] }
 0x356   :  { %3430 = vmatpush2.msra.mxu1 %v10619_v7  ;;  %3354 = vmatprep.subr.mxu0 %v8205_v1  ;;  %v10625_v1 = vld [vmem:[#allocation373_spill] sm:$0xff] }
 0x357   :  { %3431 = vmatprep.subr.mxu1 %v8209_v37  ;;  %3355 = vmatpush2.msra.mxu0 %v10620_v49  ;;  %v10626_v37 = vld [vmem:[#allocation293_spill] sm:$0xff] }
 0x358   :  { %3432 = vmatpush2.msra.mxu1 %v10621_v56  ;;  %3356 = vmatprep.subr.mxu0 %v8213_v62  ;;  %v10627_v62 = vld [vmem:[#allocation369_spill] sm:$0xff] }
 0x359   :  { %3433 = vmatprep.subr.mxu1 %v8223_v19  ;;  %3357 = vmatpush2.msra.mxu0 %v10622_v53  ;;  %v10628_v19 = vld [vmem:[#allocation84_spill] sm:$0xff] }
 0x35a   :  { %3434 = vmatpush2.msra.mxu1 %v10623_v5  ;;  %3358 = vmatprep.subr.mxu0 %v8227_v52  ;;  %v10629_v52 = vld [vmem:[#allocation299_spill] sm:$0xff] }
 0x35b   :  { %3435 = vmatprep.subr.mxu1 %v8231_v33  ;;  %3359 = vmatpush2.msra.mxu0 %v10624_v18  ;;  %v10630_v33 = vld [vmem:[#allocation202_spill] sm:$0xff] }
 0x35c   :  { %3436 = vmatpush2.msra.mxu1 %v10625_v1  ;;  %3360 = vmatprep.subr.mxu0 %v8241_v6  ;;  %v10631_v6 = vld [vmem:[#allocation307_spill] sm:$0xff] }
 0x35d   :  { %3437 = vmatprep.subr.mxu1 %v8245_v2  ;;  %3361 = vmatpush2.msra.mxu0 %v10626_v37  ;;  %v10632_v2 = vld [vmem:[#allocation90_spill] sm:$0xff] }
 0x35e   :  { %3438 = vmatpush2.msra.mxu1 %v10627_v62  ;;  %3362 = vmatprep.subr.mxu0 %v8249_v58  ;;  %v10634_v58 = vld [vmem:[#allocation292_spill] sm:$0xff] }
 0x35f   :  { %3439 = vmatprep.subr.mxu1 %v8259_v10  ;;  %3363 = vmatpush2.msra.mxu0 %v10628_v19  ;;  %v10635_v10 = vld [vmem:[#allocation311_spill] sm:$0xff] }
 0x360   :  { %3440 = vmatpush2.msra.mxu1 %v10629_v52  ;;  %3364 = vmatprep.subr.mxu0 %v8263_v38  ;;  %v10637_v38 = vld [vmem:[#allocation81_spill] sm:$0xff] }
 0x361   :  { %3441 = vmatprep.subr.mxu1 %v8267_v28  ;;  %3365 = vmatpush2.msra.mxu0 %v10630_v33  ;;  %v10638_v28 = vld [vmem:[#allocation53_spill] sm:$0xff] }
 0x362   :  { %3442 = vmatpush2.msra.mxu1 %v10631_v6  ;;  %3366 = vmatprep.subr.mxu0 %v8277_v12  ;;  %v10639_v12 = vld [vmem:[#allocation54_spill] sm:$0xff] }
 0x363   :  { %3443 = vmatprep.subr.mxu1 %v10632_v2  ;;  %3367 = vmatpush2.msra.mxu0 %v10633_v31 }
 0x364   :  { %3444 = vmatpush2.msra.mxu1 %v10634_v58  ;;  %3368 = vmatprep.subr.mxu0 %v10635_v10 }
 0x365   :  { %3445 = vmatprep.subr.mxu1 %v8295_v24  ;;  %3369 = vmatpush2.msra.mxu0 %v10636_v21  ;;  %v10643_v24 = vld [vmem:[#allocation269_spill] sm:$0xff] }
 0x366   :  { %3446 = vmatpush2.msra.mxu1 %v10637_v38  ;;  %3370 = vmatprep.subr.mxu0 %v8299_v36  ;;  %v10645_v36 = vld [vmem:[#allocation335_spill] sm:$0xff] }
 0x367   :  { %3447 = vmatprep.subr.mxu1 %v8303_v9  ;;  %3371 = vmatpush2.msra.mxu0 %v10638_v28  ;;  %v10646_v9 = vld [vmem:[#allocation42_spill] sm:$0xff] }
 0x368   :  { %3448 = vmatpush2.msra.mxu1 %v10639_v12  ;;  %3372 = vmatprep.subr.mxu0 %v8313_v43  ;;  %v10648_v43 = vld [vmem:[#allocation334_spill] sm:$0xff] }
 0x369   :  { %3449 = vmatprep.subr.mxu1 %v10640_v39  ;;  %3373 = vmatpush2.msra.mxu0 %v10641_v8 }
 0x36a   :  { %3450 = vmatpush2.msra.mxu1 %v10642_v16  ;;  %3374 = vmatprep.subr.mxu0 %v10643_v24 }
 0x36b   :  { %3451 = vmatprep.subr.mxu1 %v8331_v63  ;;  %3375 = vmatpush2.msra.mxu0 %v10644_v34  ;;  %v132_v63 = vld [vmem:[%s8551_s3 + $0x18] sm:$0xff] }
 0x36c   :  { %3452 = vmatpush2.msra.mxu1 %v10645_v36  ;;  %3376 = vmatprep.subr.mxu0 %v8335_v23  ;;  %v131_v23 = vld [vmem:[%s8551_s3 + $0x10] sm:$0xff]  ;;  %s3485_s3 = sshll.u32 %s3787_s19, 4  ;;  %s3486_s3 = int_to_ptr.vmem [resolvable:$true] %s3485_s3 }
 0x36d   :  { %3453 = vmatprep.subr.mxu1 %v10646_v9  ;;  %3377 = vmatpush2.msra.mxu0 %v10647_v22  ;;  %s3742_s20 = scalar_lea.vmem %s3486_s3, 1024  ;;  %p3747_p1 = scmp.lt.s32.totalorder %s3486_s3, %s3486_s3 }
 0x36e   :  { %3454 = vmatpush2.msra.mxu1 %v10648_v43  ;;  %3378 = vmatprep.subr.mxu0 %v10649_v47  ;;  %p3743_p0 = scmp.ne.s32.totalorder %s3486_s3, %s3742_s20  ;;  %p3748_p2 = scmp.lt.s32.totalorder %s3742_s20, %s3742_s20 }
 0x36f   :  { %3455 = vmatprep.subr.mxu1 %v10650_v41  ;;  %3379 = vmatpush2.msra.mxu0 %v10651_v4 }
 0x370   :  { %3456 = vmatpush2.msra.mxu1 %v10652_v59  ;;  %3380 = vmatprep.subr.mxu0 %v10653_v14  ;;  %p3749_p3 = por %p3748_p2, %p3747_p1 }
 0x371   :  { %3457 = vmatprep.subr.mxu1 %v8371_v61  ;;  %3381 = vmatpush2.msra.mxu0 %v10654_v11 }
 0x372   :  { %3458 = vmatpush2.msra.mxu1 %v10655_v48  ;;  %3226 = vmatprep.mubr.f32.mxu0 %v132_v63  ;;  %p3750_p4 = pnand %p3749_p3, %p3743_p0 }
 0x373   :  { %3303 = vmatprep.mubr.f32.mxu1 %v132_v63  ;;  %3227 = vmatmul.mubr.f32.gmra.mxu0 %v131_v23 }
 0x374   :  { %3304 = vmatmul.mubr.f32.gmra.mxu1 %v131_v23  ;;  %3382 = vmatprep.mubr.f32.mxu0 %v3741_v13 }
 0x375   :  { %3459 = vmatprep.mubr.f32.mxu1 %v3741_v13 }
 0x377   :  { %3383 = vmatmul.mubr.f32.vlgmr.msra.gmra.mxu0 %v8398_v50 }
 0x378   :  { %3460 = vmatmul.mubr.f32.vlgmr.msra.gmra.mxu1 %v8398_v50  ;;  %3388 = vmatprep.mubr.f32.mxu0 %v132_v63 }
 0x379   :  { %3465 = vmatprep.mubr.f32.mxu1 %v132_v63 }
 0x37b   :  { %3389 = vmatmul.mubr.f32.gmra.mxu0 %v131_v23 }
 0x37c   :  { %3466 = vmatmul.mubr.f32.gmra.mxu1 %v131_v23 }
 0x3f1   :  { %v3222_v61 = vpop.f32.mrf.mxu0 }
 0x3f2   :  { %3310 = vst [vmem:[#allocation2] sm:$0xff] %v3222_v61 }
 0x3f3   :  { %v3299_v54 = vpop.f32.mrf.mxu1  ;;  %v3224_v44 = vpop.f32.mrf.mxu0 }
 0x3f4   :  { %3312 = vst [vmem:[#allocation2 + $0x10] sm:$0xff] %v3299_v54  ;;  %3311 = vst [vmem:[#allocation2 + $0x8] sm:$0xff] %v3224_v44 }
 0x3f5   :  { %v3301_v3 = vpop.f32.mrf.mxu1 }
 0x3f6   :  { %3313 = vst [vmem:[#allocation2 + $0x18] sm:$0xff] %v3301_v3 }
 0x433   :  { %v3228_v25 = vpop.f32.mrf.mxu0 }
 0x434   :  { %3314 = vst [vmem:[#allocation2 + $0x20] sm:$0xff] %v3228_v25  ;;  %v3305_v32 = vpop.f32.mrf.mxu1 }
 0x435   :  { %3316 = vst [vmem:[#allocation2 + $0x30] sm:$0xff] %v3305_v32  ;;  %v3230_v20 = vpop.f32.mrf.mxu0 }
 0x436   :  { %3315 = vst [vmem:[#allocation2 + $0x28] sm:$0xff] %v3230_v20  ;;  %v3307_v50 = vpop.f32.mrf.mxu1 }
 0x437   :  { %3317 = vst [vmem:[#allocation2 + $0x38] sm:$0xff] %v3307_v50  ;;  %v3384_v30 = vpop.f32.mrf.mxu0 }
 0x438   :  { %3472 = vst [vmem:[#allocation4] sm:$0xff] %v3384_v30  ;;  %v3461_v0 = vpop.f32.mrf.mxu1 }
 0x439   :  { %3753 = shalt.err (!%p3750_p4)
}
 0x43a   :  { %s3788_s21 = smov 512   ;;  %s3789_s22 = smov 32   ;;  %3474 = vst [vmem:[#allocation4 + $0x10] sm:$0xff] %v3461_v0  ;;  %v3386_v40 = vpop.f32.mrf.mxu0  ;;  %v3463_v45 = vpop.f32.mrf.mxu1 }
 0x43b   :  { %3491 = dma.vmem_to_hbm [thread:$0]  %s3486_s3, 1024, %s8556_s8, [#allocation3], %s3788_s21, %s3788_s21, %s3789_s22   ;;  %3473 = vst [vmem:[#allocation4 + $0x8] sm:$0xff] %v3386_v40  ;;  %3475 = vst [vmem:[#allocation4 + $0x18] sm:$0xff] %v3463_v45 }
 0x43c   :  { %s3790_s2 = smov [#allocation4]   ;;  %v3390_v35 = vpop.f32.mrf.mxu0  ;;  %v3467_v60 = vpop.f32.mrf.mxu1 }
 0x43d   :  { %s3497_s25 = sshll.u32 %s3790_s2, 4  ;;  %3476 = vst [vmem:[#allocation4 + $0x20] sm:$0xff] %v3390_v35  ;;  %3478 = vst [vmem:[#allocation4 + $0x30] sm:$0xff] %v3467_v60  ;;  %s3498_s25 = int_to_ptr.vmem [resolvable:$true] %s3497_s25 }
 0x43e   :  { %v3392_v46 = vpop.f32.mrf.mxu0  ;;  %v3469_v42 = vpop.f32.mrf.mxu1  ;;  %s3762_s26 = scalar_lea.vmem %s3498_s25, 1024  ;;  %p3767_p6 = scmp.lt.s32.totalorder %s3498_s25, %s3498_s25 }
 0x43f   :  { %3477 = vst [vmem:[#allocation4 + $0x28] sm:$0xff] %v3392_v46  ;;  %3479 = vst [vmem:[#allocation4 + $0x38] sm:$0xff] %v3469_v42  ;;  %p3763_p5 = scmp.ne.s32.totalorder %s3498_s25, %s3762_s26  ;;  %p3768_p7 = scmp.lt.s32.totalorder %s3762_s26, %s3762_s26 }
 0x441   :  { %p3769_p8 = por %p3768_p7, %p3767_p6 }
 0x443   :  { %p3770_p9 = pnand %p3769_p8, %p3763_p5 }
 0x445   :  { %3773 = shalt.err (!%p3770_p9)
}
 0x446   :  { %3503 = dma.vmem_to_hbm [thread:$0]  %s3498_s25, 1024, %s8557_s9, [#allocation5], %s3788_s21, %s3788_s21, %s3789_s22  }
 0x447   :  { %3782 = dma.done.wait [#allocation3], 1024  }
 0x448   :  { %3783 = vsyncadd [#allocation3], 4294966272 }
 0x449   :  { %3784 = dma.done.wait [#allocation5], 1024  }
 0x44a   :  { %3785 = vsyncadd [#allocation5], 4294966272 }
 0x44b   :  { %3510 = vsyncpa [#allocation3], 1 }
 0x44c   :  { %3511 = vsyncpa [#allocation5], 1 }

</bundles_post_ra>
